<compile_context>
chip_gen: v5e
topology: v5e:2x2
jax: 0.10.0
libtpu: 0.0.40
codegen_flags: <defaults>
</compile_context>

<pallas_src>
import numpy as np
import jax
import jax.numpy as jnp
from jax.experimental import pallas as pl
from jax.experimental.pallas import tpu as pltpu

EMBED_DIM = 32


# ----------------------------------------------------------------------------
# Pallas kernel
# ----------------------------------------------------------------------------
def surrogate_kernel(x_ref, flags_ref, w_ref, b_ref, o_ref):
    # w_ref is the (4E, 2E) block-diagonal fused weight.
    E = w_ref.shape[0] // 4

    x = x_ref[...]                                        # (TB, 4E) lane-dense
    # Single lane-dense MXU matmul (K = 4E = 128) + fused bias.
    lin = jnp.dot(x, w_ref[...], preferred_element_type=jnp.float32) + b_ref[...]

    # Zero-neighbor fallback: emb = raw self embedding (static lane slices of x).
    u_self = x[:, 0:E]
    v_self = x[:, 2 * E:3 * E]
    u_emb = jnp.where(flags_ref[:, 0:1] > 0.0, lin[:, :E], u_self)   # (TB, E)
    v_emb = jnp.where(flags_ref[:, 1:2] > 0.0, lin[:, E:], v_self)   # (TB, E)

    # Lane-dense score row: (1, TB).
    o_ref[...] = jnp.sum(u_emb * v_emb, axis=1).reshape(1, -1)


# ----------------------------------------------------------------------------
# Tiling / VMEM sizing
# ----------------------------------------------------------------------------
def default_vmem_budget():
    """Generation-aware VMEM budget for the double-buffered input slabs."""
    try:
        cap = pltpu.get_tpu_info().vmem_capacity_bytes    # 64 MiB v7x, 128 MiB v5e/v6e
        return int(min(cap // 4, 24 * 1024 * 1024))
    except Exception:
        return 12 * 1024 * 1024                           # safe under v5e's 16 MiB scoped default


def per_row_bytes(embed_dim):
    # double-buffered f32 x (4E lanes) + flags (2) + double-buffered output row
    return 2 * (4 * embed_dim + 2) * 4 + 2 * 4


def choose_batch_tile(embed_dim, vmem_budget_bytes=None):
    """Pick the per-grid-step batch tile from the post-pre-sum byte count."""
    if vmem_budget_bytes is None:
        vmem_budget_bytes = default_vmem_budget()
    tb = vmem_budget_bytes // max(per_row_bytes(embed_dim), 1)
    tb = (tb // 128) * 128                                # keep output lane-dense
    return int(max(128, min(tb, 8192)))


def vmem_limit_for(tb, embed_dim):
    """Explicit scoped-VMEM limit: computed usage + headroom, capped at 48 MiB
    (safe on v7x's 64 MiB physical VMEM, and well under v5e/v6e's 128 MiB)."""
    e = embed_dim
    needed = tb * per_row_bytes(e)                        # inputs + output, double-buffered
    needed += (4 * e * 2 * e + 2 * e) * 4 * 2             # resident fused weight + bias
    limit = min(max(2 * needed, 16 * 1024 * 1024), 48 * 1024 * 1024)
    return int(max(limit, needed + (1 << 20)))


# ----------------------------------------------------------------------------
# pallas_call wrapper
# ----------------------------------------------------------------------------
def surrogate_forward(x, flags, w_fused, b_fused, *, tb):
    b_pad, k = x.shape                                    # k = 4E
    two_e = w_fused.shape[1]
    assert b_pad % tb == 0
    n_tiles = b_pad // tb
    e = k // 4

    out = pl.pallas_call(
        surrogate_kernel,
        out_shape=jax.ShapeDtypeStruct((1, b_pad), jnp.float32),
        grid=(n_tiles,),
        in_specs=[
            pl.BlockSpec((tb, k), lambda i: (i, 0)),          # lane-dense MXU input
            pl.BlockSpec((tb, 2), lambda i: (i, 0)),          # has-neighbor flags
            pl.BlockSpec((k, two_e), lambda i: (0, 0)),       # resident fused weight
            pl.BlockSpec((1, two_e), lambda i: (0, 0)),       # resident fused bias
        ],
        out_specs=pl.BlockSpec((1, tb), lambda i: (0, i)),    # lane-dense score row
        compiler_params=pltpu.CompilerParams(
            # TODO(synk): on v7x verify both TensorCores are used; switch to
            # pltpu.CORE_PARALLEL if the trace shows a single core.
            dimension_semantics=("parallel",),
            vmem_limit_bytes=vmem_limit_for(tb, e),
        ),
    )(x, flags, w_fused, b_fused)

    return out.reshape(-1)                                    # (b_pad,)


# ----------------------------------------------------------------------------
# Host-side glue mirroring the PyTorch module's data-dependent Python logic
# ----------------------------------------------------------------------------
def build_indexes(domain_list):
    # exact mirror of Probabilstic_Surrogate.__init__ index construction
    indexes = []
    for domain in domain_list:
        player_index = []
        for dom in domain:
            if dom is not None:
                pd_index = [{x: i for i, x in enumerate(d)} for d in dom]
                player_index.append(pd_index)
            else:
                player_index.append(None)
        indexes.append(player_index)
    return indexes


def user_sel_vectors(nodes_u, u_neibs_list, indexes, all_sels, player_num):
    # exact mirror of the user-side sel_vec loop in forward()
    sels = []
    for n, neibs in zip(nodes_u, u_neibs_list):
        sel = np.ones(len(neibs), np.float32)
        for ps in range(player_num):
            idx = indexes[ps][1]
            if idx is not None and (int(n) in idx[0] or int(n) in idx[1]):
                for t, nb in enumerate(neibs):
                    if int(nb) in idx[0] and int(n) in idx[1]:
                        sel[t] *= all_sels[ps][1][idx[0][int(nb)]][idx[1][int(n)]]
                    elif int(nb) in idx[1] and int(n) in idx[0]:
                        sel[t] *= all_sels[ps][1][idx[0][int(n)]][idx[1][int(nb)]]
        sels.append(sel)
    return sels


def item_sel_vectors(nodes_v, v_neibs_list, indexes, all_sels, player_num):
    # TODO(synk): item-domain sel logic in the reference compares a node tensor
    # against a dict ("n == Indexes[ps][2][1]"); here the item domains are None
    # so the branch is skipped and sel stays at 1.0, matching the reference.
    return [np.ones(len(neibs), np.float32) for neibs in v_neibs_list]


def weighted_neighbor_sum(neibs_list, sel_list, emb_table):
    """Host pre-aggregation: sum_k emb[nb_k] * sel_k / len(neibs)  -> (B, E),
    plus a per-row 'has neighbors' flag."""
    B = len(neibs_list)
    E = emb_table.shape[1]
    nemb = np.zeros((B, E), np.float32)
    flag = np.zeros((B,), np.float32)
    for i, (nb, sl) in enumerate(zip(neibs_list, sel_list)):
        k = len(nb)
        if k:
            emb = emb_table[np.asarray(nb, np.int64)]           # (k, E)
            nemb[i] = (emb * (sl[:, None] / float(k))).sum(0)
            flag[i] = 1.0
    return nemb, flag


def pad_rows(x, b_pad):
    pad = b_pad - x.shape[0]
    if pad:
        x = np.concatenate([x, np.zeros((pad,) + x.shape[1:], x.dtype)], axis=0)
    return x


def build_fused_weights(wu, bu, wv, bv, e):
    # x layout: [u_self | u_nemb | v_self | v_nemb]  ->  lin = [u_lin | v_lin]
    w_fused = np.zeros((4 * e, 2 * e), np.float32)
    w_fused[0:2 * e, 0:e] = wu
    w_fused[2 * e:4 * e, e:2 * e] = wv
    b_fused = np.concatenate([bu, bv])[None, :].astype(np.float32)
    return w_fused, b_fused


def ref_forward(nodes_u, nodes_v, u_neibs_list, v_neibs_list,
                u_sels, v_sels, u2e, v2e, wu, bu, wv, bv):
    # pure numpy reference (semantics of the PyTorch forward)
    U, V = [], []
    for i, n in enumerate(nodes_u):
        neibs = u_neibs_list[i]
        if len(neibs) > 0:
            nemb = (u2e[np.asarray(neibs)] * u_sels[i][:, None]).mean(0)
            emb = np.concatenate([u2e[n], nemb]) @ wu + bu
        else:
            emb = u2e[n]
        U.append(emb)
    for i, n in enumerate(nodes_v):
        neibs = v_neibs_list[i]
        if len(neibs) > 0:
            nemb = (v2e[np.asarray(neibs)] * v_sels[i][:, None]).mean(0)
            emb = np.concatenate([v2e[n], nemb]) @ wv + bv
        else:
            emb = v2e[n]
        V.append(emb)
    U = np.stack(U)
    V = np.stack(V)
    return (U * V).sum(1)


# ----------------------------------------------------------------------------
if __name__ == "__main__":
    E = EMBED_DIM
    num_users, num_items = 20, 25
    B = 8

    key = jax.random.PRNGKey(0)
    k1, k2, k3, k4, k5, k6 = jax.random.split(key, 6)
    u2e = np.asarray(jax.random.normal(k1, (num_users, E), jnp.float32)) * 0.1
    v2e = np.asarray(jax.random.normal(k2, (num_items, E), jnp.float32)) * 0.1
    # torch Linear weight is (E, 2E); kept pre-transposed as (2E, E)
    wu = np.asarray(jax.random.normal(k3, (2 * E, E), jnp.float32)) * 0.1
    bu = np.asarray(jax.random.normal(k4, (E,), jnp.float32)) * 0.1
    wv = np.asarray(jax.random.normal(k5, (2 * E, E), jnp.float32)) * 0.1
    bv = np.asarray(jax.random.normal(k6, (E,), jnp.float32)) * 0.1

    # deterministic adjacency lists (one empty list per side to hit fallback)
    social_adj = {i: [(i + 1) % num_users, (i + 3) % num_users,
                      (2 * i + 1) % num_users] for i in range(num_users)}
    social_adj[5] = []
    item_adj = {i: [(i + 2) % num_items, (i + 5) % num_items,
                    (3 * i + 1) % num_items] for i in range(num_items)}
    item_adj[7] = []

    # deterministic Domain_list / all_sels (2 players, user-domain only)
    Domain_list = [
        [None, [[1, 2, 3, 6], [0, 4, 7]], None],
        [None, [[0, 5], [2, 6, 7]], None],
    ]
    all_sels = [
        [None, np.linspace(0.2, 0.9, 12).reshape(4, 3).astype(np.float32), None],
        [None, np.linspace(0.3, 0.8, 6).reshape(2, 3).astype(np.float32), None],
    ]
    indexes = build_indexes(Domain_list)
    player_num = len(Domain_list)

    nodes_u = [0, 1, 2, 3, 4, 5, 6, 7]
    nodes_v = [3, 5, 7, 9, 11, 0, 2, 4]

    u_neibs_list = [social_adj[int(n)] for n in nodes_u]
    v_neibs_list = [item_adj[int(n)] for n in nodes_v]

    u_sels = user_sel_vectors(nodes_u, u_neibs_list, indexes, all_sels, player_num)
    v_sels = item_sel_vectors(nodes_v, v_neibs_list, indexes, all_sels, player_num)

    # host pre-aggregation: weighted-mean neighbor embeddings + has-neib flags
    u_nemb, u_flag = weighted_neighbor_sum(u_neibs_list, u_sels, u2e)
    v_nemb, v_flag = weighted_neighbor_sum(v_neibs_list, v_sels, v2e)
    flags = np.stack([u_flag, v_flag], axis=1).astype(np.float32)   # (B, 2)

    u_self = u2e[np.asarray(nodes_u)].astype(np.float32)            # (B, E)
    v_self = v2e[np.asarray(nodes_v)].astype(np.float32)            # (B, E)

    # single lane-dense MXU input: [u_self | u_nemb | v_self | v_nemb] -> (B, 4E)
    x = np.concatenate([u_self, u_nemb, v_self, v_nemb], axis=1).astype(np.float32)

    # TB sized from the real post-pre-sum bytes (real workloads: 2K-8K rows);
    # clamp to 512 only because this demo batch is 8 rows.
    TB = choose_batch_tile(E)
    TB = min(TB, 512)
    n_tiles = max(2, pl.cdiv(B, TB))
    if n_tiles % 2:
        n_tiles += 1                  # even split for v7x's two TensorCores
    B_pad = n_tiles * TB

    x_p = jnp.asarray(pad_rows(x, B_pad))
    flags_p = jnp.asarray(pad_rows(flags, B_pad))

    w_fused, b_fused = build_fused_weights(wu, bu, wv, bv, E)

    scores_pad = surrogate_forward(
        x_p, flags_p, jnp.asarray(w_fused), jnp.asarray(b_fused), tb=TB)
    scores_pad = jax.block_until_ready(scores_pad)
    scores = np.asarray(scores_pad)[:B]

    ref = ref_forward(nodes_u, nodes_v, u_neibs_list, v_neibs_list,
                      u_sels, v_sels, u2e, v2e, wu, bu, wv, bv)
    np.testing.assert_allclose(scores, ref, rtol=1e-4, atol=1e-5)

    print("KERNEL_OK")
</pallas_src>

<mosaic_0001>
module attributes {stable_mosaic.version = 11 : i64} {
  func.func @surrogate_kernel(%arg0: i32, %arg1: memref<512x128xf32, #tpu.memory_space<vmem>>, %arg2: memref<512x2xf32, #tpu.memory_space<vmem>>, %arg3: memref<128x64xf32, #tpu.memory_space<vmem>>, %arg4: memref<1x64xf32, #tpu.memory_space<vmem>>, %arg5: memref<1x512xf32, #tpu.memory_space<vmem>>) attributes {dimension_semantics = [#tpu.dimension_semantics<parallel>], iteration_bounds = array<i64: 2>, scalar_prefetch = 0 : i64, scratch_operands = 0 : i64, tpu.core_type = #tpu.core_type<tc>, window_params = [{transform_indices = @transform_0, window_bounds = array<i64: 512, 128>}, {transform_indices = @transform_1, window_bounds = array<i64: 512, 2>}, {pipeline_mode = #tpu.pipeline_mode<synchronous>, transform_indices = @transform_2, window_bounds = array<i64: 128, 64>}, {pipeline_mode = #tpu.pipeline_mode<synchronous>, transform_indices = @transform_3, window_bounds = array<i64: 1, 64>}, {transform_indices = @transform_4, window_bounds = array<i64: 1, 512>}]} {
    %c0 = arith.constant 0 : index
    %c0_0 = arith.constant 0 : index
    %0 = vector.load %arg1[%c0, %c0_0] : memref<512x128xf32, #tpu.memory_space<vmem>>, vector<512x128xf32>
    %c0_1 = arith.constant 0 : index
    %c0_2 = arith.constant 0 : index
    %1 = vector.load %arg3[%c0_1, %c0_2] : memref<128x64xf32, #tpu.memory_space<vmem>>, vector<128x64xf32>
    %cst = arith.constant dense<0.000000e+00> : vector<512x64xf32>
    %2 = tpu.matmul %0, %1, %cst {dimension_numbers = #tpu.dot_dimension_numbers<[1], [0], [0], [1], [0, 0, 1, 1], [], []>} : vector<512x128xf32>, vector<128x64xf32>, vector<512x64xf32> -> vector<512x64xf32>
    %c0_3 = arith.constant 0 : index
    %c0_4 = arith.constant 0 : index
    %3 = vector.load %arg4[%c0_3, %c0_4] : memref<1x64xf32, #tpu.memory_space<vmem>>, vector<1x64xf32>
    %4 = vector.broadcast %3 : vector<1x64xf32> to vector<512x64xf32>
    %5 = arith.addf %2, %4 : vector<512x64xf32>
    %6 = vector.extract_strided_slice %0 {offsets = [0, 0], sizes = [512, 32], strides = [1, 1]} : vector<512x128xf32> to vector<512x32xf32>
    %7 = vector.extract_strided_slice %0 {offsets = [0, 64], sizes = [512, 32], strides = [1, 1]} : vector<512x128xf32> to vector<512x32xf32>
    %c0_5 = arith.constant 0 : index
    %c0_6 = arith.constant 0 : index
    %8 = vector.load %arg2[%c0_5, %c0_6] : memref<512x2xf32, #tpu.memory_space<vmem>>, vector<512x1xf32>
    %cst_7 = arith.constant 0.000000e+00 : f32
    %9 = vector.broadcast %cst_7 : f32 to vector<512x1xf32>
    %10 = arith.cmpf ogt, %8, %9 : vector<512x1xf32>
    %11 = vector.extract_strided_slice %5 {offsets = [0, 0], sizes = [512, 32], strides = [1, 1]} : vector<512x64xf32> to vector<512x32xf32>
    %12 = vector.shape_cast %10 : vector<512x1xi1> to vector<512x1xi1>
    %13 = vector.broadcast %12 : vector<512x1xi1> to vector<512x32xi1>
    %14 = arith.select %13, %11, %6 : vector<512x32xi1>, vector<512x32xf32>
    %c0_8 = arith.constant 0 : index
    %c1 = arith.constant 1 : index
    %15 = vector.load %arg2[%c0_8, %c1] : memref<512x2xf32, #tpu.memory_space<vmem>>, vector<512x1xf32>
    %cst_9 = arith.constant 0.000000e+00 : f32
    %16 = vector.broadcast %cst_9 : f32 to vector<512x1xf32>
    %17 = arith.cmpf ogt, %15, %16 : vector<512x1xf32>
    %18 = vector.extract_strided_slice %5 {offsets = [0, 32], sizes = [512, 32], strides = [1, 1]} : vector<512x64xf32> to vector<512x32xf32>
    %19 = vector.shape_cast %17 : vector<512x1xi1> to vector<512x1xi1>
    %20 = vector.broadcast %19 : vector<512x1xi1> to vector<512x32xi1>
    %21 = arith.select %20, %18, %7 : vector<512x32xi1>, vector<512x32xf32>
    %22 = arith.mulf %14, %21 : vector<512x32xf32>
    %cst_10 = arith.constant dense<0.000000e+00> : vector<512xf32>
    %23 = vector.multi_reduction <add>, %22, %cst_10 [1] : vector<512x32xf32> to vector<512xf32>
    %24 = vector.shape_cast %23 : vector<512xf32> to vector<1x512xf32>
    %c0_11 = arith.constant 0 : index
    %c0_12 = arith.constant 0 : index
    %25 = vector.load %arg5[%c0_11, %c0_12] : memref<1x512xf32, #tpu.memory_space<vmem>>, vector<1x512xf32>
    tpu.vector_store %arg5[%c0_11, %c0_12], %24 {strides = array<i32>} : memref<1x512xf32, #tpu.memory_space<vmem>>, vector<1x512xf32>,
    return
  }
  func.func @transform_0(%arg0: i32) -> (i32, i32) {
    %c0_i32 = arith.constant 0 : i32
    %c0_i32_0 = arith.constant 0 : i32
    return %arg0, %c0_i32 : i32, i32
  }
  func.func @transform_1(%arg0: i32) -> (i32, i32) {
    %c0_i32 = arith.constant 0 : i32
    %c0_i32_0 = arith.constant 0 : i32
    return %arg0, %c0_i32 : i32, i32
  }
  func.func @transform_2(%arg0: i32) -> (i32, i32) {
    %c0_i32 = arith.constant 0 : i32
    %c0_i32_0 = arith.constant 0 : i32
    %c0_i32_1 = arith.constant 0 : i32
    return %c0_i32, %c0_i32_0 : i32, i32
  }
  func.func @transform_3(%arg0: i32) -> (i32, i32) {
    %c0_i32 = arith.constant 0 : i32
    %c0_i32_0 = arith.constant 0 : i32
    %c0_i32_1 = arith.constant 0 : i32
    return %c0_i32, %c0_i32_0 : i32, i32
  }
  func.func @transform_4(%arg0: i32) -> (i32, i32) {
    %c0_i32 = arith.constant 0 : i32
    %c0_i32_0 = arith.constant 0 : i32
    return %c0_i32, %arg0 : i32, i32
  }
}

</mosaic_0001>

<bundles_post_ra>
// kernel: tpu_custom_call.1
= control target key start
LH: loop header
LB: loop body
LE: loop exit
PB: predicated region body
PF: predicated region fallthrough
CT: control target
= control target key end

     0   :  { %9 = vsyncpa [#allocation3], 0  ;;  %s6739_s0 = inlined_call_operand.vmem [shape: f32[1024,128], index: 0, kind: input, shape index: {}]   ;;  %s6740_s1 = inlined_call_operand.vmem [shape: f32[1024,2], index: 1, kind: input, shape index: {}]   ;;  %s6741_s2 = inlined_call_operand.vmem [shape: f32[128,64], index: 2, kind: input, shape index: {}]   ;;  %s6742_s3 = inlined_call_operand.vmem [shape: f32[1,64], index: 3, kind: input, shape index: {}]   ;;  %s6743_s4 = inlined_call_operand.hbm [shape: f32[1,1024], index: 4, kind: output, shape index: {}]  }
   0x1   :  { %11 = vsyncpa [#allocation3 + $0x1], 0  ;;  %s3992_s15 = smov 0   ;;  %s3994_s16 = smov 0  }
   0x2   :  { %s3996_s17 = smov 0   ;;  %s3998_s18 = smov 0  }
   0x3 LB: > { %s4013_s19 = sadd.s32 4294967295, %s3962_s18   ;;  %s3724_s20 = sadd.s32 4294967294, %s3962_s18   ;;  %s3962_s18 = sphi %s3998_s18, %s7252_s18   ;;  %s3958_s17 = sphi %s3996_s17, %s7251_s17   ;;  %s3954_s16 = sphi %s3994_s16, %s7250_s16   ;;  %s3950_s15 = sphi %s3992_s15, %s7249_s15  }
   0x4   : > { %s4017_s21 = sadd.s32 1, %s3962_s18   ;;  %s118_s22 = sadd.s32 1, %s3958_s17 }
   0x5   : > { %s115_s23 = ssub.s32 %s3962_s18, %s4017_s21  ;;  %p128_p0 = scmp.ne.s32.totalorder %s3958_s17, %s3954_s16 }
   0x6   : > { %p116_p1 = scmp.eq.s32.totalorder %s115_s23, 0  ;;  %p129_p2 = scmp.eq.s32.totalorder %s4013_s19, 1 }
   0x7   : > { %p134_p3 = scmp.ne.s32.totalorder %s3954_s16, %s3950_s15  ;;  %p135_p4 = scmp.eq.s32.totalorder %s3724_s20, 1 }
   0x8   : > { %s4028_s24 = scalar_select %p116_p1, %s3958_s17, %s118_s22  }
   0x9   : > { %p4030_p5 = por %p129_p2, %p128_p0  ;;  %p4034_p6 = por %p135_p4, %p134_p3 }
   0xa   : > { %p3727_p7 = scmp.ge.s32.totalorder %s3962_s18, 1  ;;  %p177_p8 = scmp.lt.s32.totalorder %s3962_s18, 3 }
   0xc   : > { %p178_p9 = pnand %p3727_p7, %p177_p8 }
   0xe   : > { %181 = sbr.rel (%p178_p9) target bundleno = 2054 (0x806), region = 36 }
  0x13   : > { %s3729_s27 = sshll.u32 %s4013_s19, 6  ;;  %v3964_v0 = vmov 1   ;;  %v6747_v1 = vmov 0   ;;  %v300_v2 = vld [vmem:[%s6741_s2 + $0x78] sm:$0xff]  ;;  %v299_v3 = vld [vmem:[%s6741_s2 + $0x70] sm:$0xff]  ;;  %v298_v4 = vld [vmem:[%s6741_s2 + $0x68] sm:$0xff] }
  0x14   : > { %3830 = vset.pattern.permute.xlu0 %v3964_v0  ;;  %3829 = vset.pattern.permute.xlu2 %v3964_v0  ;;  %p209_p10 = scmp.lt.s32.totalorder %s3729_s27, 127  ;;  %v297_v12 = vld [vmem:[%s6741_s2 + $0x60] sm:$0xff]  ;;  %v296_v13 = vld [vmem:[%s6741_s2 + $0x58] sm:$0xff]  ;;  %v295_v14 = vld [vmem:[%s6741_s2 + $0x50] sm:$0xff]  ;;  %s205_s20 = sand.u32 1, %s3954_s16  }
  0x15   : > { %3827 = vset.pattern.permute.xlu1 %v6747_v1  ;;  %305 = vmatpush.msra.mxu0 %v300_v2  ;;  %v294_v18 = vld [vmem:[%s6741_s2 + $0x48] sm:$0xff]  ;;  %v293_v22 = vld [vmem:[%s6741_s2 + $0x40] sm:$0xff]  ;;  %v292_v23 = vld [vmem:[%s6741_s2 + $0x38] sm:$0xff]  ;;  %s3728_s22 = sshll.u32 %s205_s20, 2  ;;  %s3734_s23 = sshll.u32 %s4013_s19, 2 }
  0x16   : > { %s7254_s27 = smov (!%p209_p10, %s3729_s27), 127  ;;  %3737 = vmatpush.msra.mxu1 %v300_v2  ;;  %3738 = vmatpush.msra.mxu2 %v300_v2  ;;  %v291_v24 = vld [vmem:[%s6741_s2 + $0x30] sm:$0xff]  ;;  %v290_v29 = vld [vmem:[%s6741_s2 + $0x28] sm:$0xff]  ;;  %v289_v31 = vld [vmem:[%s6741_s2 + $0x20] sm:$0xff]  ;;  %s3648_s30 = scalar_lea.hbm %s6743_s4, %s3734_s23 }
  0x17   : > { %s3730_s6 = sshll.u32 %s7254_s27, 3  ;;  %3739 = vmatpush.msra.mxu3 %v300_v2  ;;  %306 = vmatpush.msra.mxu0 %v299_v3  ;;  %v288_v32 = vld [vmem:[%s6741_s2 + $0x18] sm:$0xff]  ;;  %v287_v34 = vld [vmem:[%s6741_s2 + $0x10] sm:$0xff]  ;;  %v286_v37 = vld [vmem:[%s6741_s2 + $0x8] sm:$0xff]  ;;  %s3966_s27 = smov 96  }
  0x18   : > { %s4061_s11 = scalar_lea.vmem %s6740_s1, %s3730_s6  ;;  %3740 = vmatpush.msra.mxu1 %v299_v3  ;;  %3741 = vmatpush.msra.mxu2 %v299_v3  ;;  %s4151_s9 = scalar_lea.vmem %s6739_s0, %s3730_s6  ;;  %v285_v40 = vld [vmem:[%s6741_s2] sm:$0xff] }
  0x19   : > { %v516_v5 = vld [vmem:[%s4061_s11 + $0x10] sm:$0xff]  ;;  %v515_v6 = vld [vmem:[%s4061_s11 + $0x8] sm:$0xff]  ;;  %3742 = vmatpush.msra.mxu3 %v299_v3  ;;  %307 = vmatpush.msra.mxu0 %v298_v4  ;;  %v521_v9 = vld [vmem:[%s4061_s11 + $0x38] sm:$0xff]  ;;  %s207_s19 = scalar_lea.vmem [#allocation2], %s3728_s22  ;;  %s3652_s7 = sshll.u32 %s3648_s30, 4  ;;  %s3653_s7 = int_to_ptr.hbm [resolvable:$true] %s3652_s7 }
  0x1a   : > { %vm580_vm0 = vcmp.gt.f32.partialorder %v516_v5, 0.0  ;;  %vm579_vm1 = vcmp.gt.f32.partialorder %v515_v6, 0.0  ;;  %3743 = vmatpush.msra.mxu1 %v298_v4  ;;  %v517_v10 = vld [vmem:[%s4061_s11 + $0x18] sm:$0xff]  ;;  %3744 = vmatpush.msra.mxu2 %v298_v4  ;;  %v518_v11 = vld [vmem:[%s4061_s11 + $0x20] sm:$0xff]  ;;  %vm585_vm2 = vcmp.gt.f32.partialorder %v521_v9, 0.0  ;;  %v524_v19 = vld [vmem:[%s4061_s11 + $0x50] sm:$0xff] }
  0x1b   : > { %v644_v7 = vsel %vm580_vm0, 1, %v6747_v1  ;;  %v4067_v8 = vsel %vm579_vm1, 1, %v6747_v1  ;;  %3745 = vmatpush.msra.mxu3 %v298_v4  ;;  %vm581_vm3 = vcmp.gt.f32.partialorder %v517_v10, 0.0  ;;  %vm582_vm4 = vcmp.gt.f32.partialorder %v518_v11, 0.0  ;;  %308 = vmatpush.msra.mxu0 %v297_v12  ;;  %v520_v20 = vld [vmem:[%s4061_s11 + $0x30] sm:$0xff]  ;;  %v514_v21 = vld [vmem:[%s4061_s11] sm:$0xff] }
  0x1c   : > { %1033 = vperm.xlu0 %3830, %v644_v7   ;;  %713 = vperm.xlu1 %3827, %v644_v7   ;;  %v4083_v15 = vsel %vm585_vm2, 1, %v6747_v1  ;;  %v4086_v16 = vsel %vm581_vm3, 1, %v6747_v1  ;;  %v4089_v17 = vsel %vm582_vm4, 1, %v6747_v1  ;;  %vm588_vm5 = vcmp.gt.f32.partialorder %v524_v19, 0.0  ;;  %v527_v28 = vld [vmem:[%s4061_s11 + $0x68] sm:$0xff]  ;;  %v530_v36 = vld [vmem:[%s4061_s11 + $0x80] sm:$0xff] }
  0x1d   : > { %1030 = vperm.xlu2 %3829, %v4067_v8   ;;  %3746 = vmatpush.msra.mxu1 %v297_v12  ;;  %6840 = vst [vmem:[#allocation5_spill] sm:$0xff] %v4083_v15  ;;  %vm584_vm6 = vcmp.gt.f32.partialorder %v520_v20, 0.0  ;;  %vm578_vm7 = vcmp.gt.f32.partialorder %v514_v21, 0.0  ;;  %v4110_v25 = vsel %vm588_vm5, 1, %v6747_v1  ;;  %v523_v30 = vld [vmem:[%s4061_s11 + $0x48] sm:$0xff]  ;;  %vm591_vm8 = vcmp.gt.f32.partialorder %v527_v28, 0.0 }
  0x1e   : > { %3747 = vmatpush.msra.mxu2 %v297_v12  ;;  %3748 = vmatpush.msra.mxu3 %v297_v12  ;;  %6841 = vst [vmem:[#allocation6_spill] sm:$0xff] %v4089_v17  ;;  %v4113_v26 = vsel %vm584_vm6, 1, %v6747_v1  ;;  %v4116_v27 = vsel %vm578_vm7, 1, %v6747_v1  ;;  %vm587_vm9 = vcmp.gt.f32.partialorder %v523_v30, 0.0  ;;  %v4134_v33 = vsel %vm591_vm8, 1, %v6747_v1  ;;  %v526_v38 = vld [vmem:[%s4061_s11 + $0x60] sm:$0xff] }
  0x1f   : > { %309 = vmatpush.msra.mxu0 %v296_v13  ;;  %3749 = vmatpush.msra.mxu1 %v296_v13  ;;  %6842 = vst [vmem:[#allocation7_spill] sm:$0xff] %v4110_v25  ;;  %v4140_v35 = vsel %vm587_vm9, 1, %v6747_v1  ;;  %v519_v39 = vld [vmem:[%s4061_s11 + $0x28] sm:$0xff]  ;;  %vm594_vm10 = vcmp.gt.f32.partialorder %v530_v36, 0.0  ;;  %v4162_v41 = vld [vmem:[%s4151_s9] sm:$0xff]  ;;  %vm590_vm11 = vcmp.gt.f32.partialorder %v526_v38, 0.0 }
  0x20   : > { %3750 = vmatpush.msra.mxu2 %v296_v13  ;;  %3751 = vmatpush.msra.mxu3 %v296_v13  ;;  %6843 = vst [vmem:[#allocation8_spill] sm:$0xff] %v4134_v33  ;;  %vm583_vm12 = vcmp.gt.f32.partialorder %v519_v39, 0.0  ;;  %v4165_v42 = vsel %vm594_vm10, 1, %v6747_v1  ;;  %v4169_v43 = vsel %vm590_vm11, 1, %v6747_v1  ;;  %v533_v45 = vld [vmem:[%s4061_s11 + $0x98] sm:$0xff]  ;;  %v522_v47 = vld [vmem:[%s4061_s11 + $0x40] sm:$0xff] }
  0x21   : > { %310 = vmatpush.msra.mxu0 %v295_v14  ;;  %3752 = vmatpush.msra.mxu1 %v295_v14  ;;  %6844 = vst [vmem:[#allocation9_spill] sm:$0xff] %v4165_v42  ;;  %v4172_v44 = vsel %vm583_vm12, 1, %v6747_v1  ;;  %v529_v46 = vld [vmem:[%s4061_s11 + $0x78] sm:$0xff]  ;;  %vm597_vm13 = vcmp.gt.f32.partialorder %v533_v45, 0.0  ;;  %v4181_v48 = vld [vmem:[%s4151_s9 + $0x8] sm:$0xff]  ;;  %vm586_vm15 = vcmp.gt.f32.partialorder %v522_v47, 0.0 }
  0x22   : > { %3753 = vmatpush.msra.mxu2 %v295_v14  ;;  %3754 = vmatpush.msra.mxu3 %v295_v14  ;;  %6845 = vst [vmem:[#allocation10_spill] sm:$0xff] %v4172_v44  ;;  %vm593_vm14 = vcmp.gt.f32.partialorder %v529_v46, 0.0  ;;  %v4184_v49 = vsel %vm597_vm13, 1, %v6747_v1  ;;  %v4191_v51 = vsel %vm586_vm15, 1, %v6747_v1  ;;  %v536_v52 = vld [vmem:[%s4061_s11 + $0xb0] sm:$0xff]  ;;  %v525_v54 = vld [vmem:[%s4061_s11 + $0x58] sm:$0xff] }
  0x23   : > { %311 = vmatpush.msra.mxu0 %v294_v18  ;;  %3755 = vmatpush.msra.mxu1 %v294_v18  ;;  %6846 = vst [vmem:[#allocation11_spill] sm:$0xff] %v4184_v49  ;;  %v4188_v50 = vsel %vm593_vm14, 1, %v6747_v1  ;;  %v532_v53 = vld [vmem:[%s4061_s11 + $0x90] sm:$0xff]  ;;  %vm600_vm0 = vcmp.gt.f32.partialorder %v536_v52, 0.0  ;;  %vm589_vm2 = vcmp.gt.f32.partialorder %v525_v54, 0.0  ;;  %v539_v59 = vld [vmem:[%s4061_s11 + $0xc8] sm:$0xff] }
  0x24   : > { %1048 = vperm.xlu0 %3830, %v4083_v15   ;;  %716 = vperm.xlu1 %3827, %v4086_v16   ;;  %6847 = vst [vmem:[#allocation12_spill] sm:$0xff] %v4191_v51  ;;  %v4200_v55 = vld [vmem:[%s4151_s9 + $0x10] sm:$0xff]  ;;  %vm596_vm1 = vcmp.gt.f32.partialorder %v532_v53, 0.0  ;;  %v4203_v56 = vsel %vm600_vm0, 1, %v6747_v1  ;;  %v4210_v58 = vsel %vm589_vm2, 1, %v6747_v1  ;;  %v535_v60 = vld [vmem:[%s4061_s11 + $0xa8] sm:$0xff] }
  0x25   : > { %1039 = vperm.xlu2 %3829, %v4089_v17   ;;  %312 = vmatpush.msra.mxu0 %v293_v22  ;;  %6848 = vst [vmem:[#allocation13_spill] sm:$0xff] %v4203_v56  ;;  %v4207_v57 = vsel %vm596_vm1, 1, %v6747_v1  ;;  %v528_v61 = vld [vmem:[%s4061_s11 + $0x70] sm:$0xff]  ;;  %vm603_vm3 = vcmp.gt.f32.partialorder %v539_v59, 0.0  ;;  %v4219_v62 = vld [vmem:[%s4151_s9 + $0x18] sm:$0xff]  ;;  %vm599_vm4 = vcmp.gt.f32.partialorder %v535_v60, 0.0 }
  0x26   : > { %3758 = vmatpush.msra.mxu1 %v293_v22  ;;  %3756 = vmatpush.msra.mxu2 %v294_v18  ;;  %6849 = vst [vmem:[#allocation14_spill] sm:$0xff] %v4210_v58  ;;  %vm592_vm5 = vcmp.gt.f32.partialorder %v528_v61, 0.0  ;;  %v4222_v63 = vsel %vm603_vm3, 1, %v6747_v1  ;;  %v542_v3 = vld [vmem:[%s4061_s11 + $0xe0] sm:$0xff]  ;;  %v531_v5 = vld [vmem:[%s4061_s11 + $0x88] sm:$0xff]  ;;  %v545_v11 = vld [vmem:[%s4061_s11 + $0xf8] sm:$0xff] }
  0x27   : > { %313 = vmatpush.msra.mxu0 %v292_v23  ;;  %3757 = vmatpush.msra.mxu3 %v294_v18  ;;  %6850 = vst [vmem:[#allocation15_spill] sm:$0xff] %v4222_v63  ;;  %v4229_v2 = vsel %vm592_vm5, 1, %v6747_v1  ;;  %v538_v4 = vld [vmem:[%s4061_s11 + $0xc0] sm:$0xff]  ;;  %vm606_vm6 = vcmp.gt.f32.partialorder %v542_v3, 0.0  ;;  %vm595_vm8 = vcmp.gt.f32.partialorder %v531_v5, 0.0  ;;  %v541_v12 = vld [vmem:[%s4061_s11 + $0xd8] sm:$0xff] }
  0x28   : > { %3761 = vmatpush.msra.mxu1 %v292_v23  ;;  %3759 = vmatpush.msra.mxu2 %v293_v22  ;;  %6851 = vst [vmem:[#allocation16_spill] sm:$0xff] %v4229_v2  ;;  %vm602_vm7 = vcmp.gt.f32.partialorder %v538_v4, 0.0  ;;  %v4238_v6 = vld [vmem:[%s4151_s9 + $0x20] sm:$0xff]  ;;  %v4241_v7 = vsel %vm606_vm6, 1, %v6747_v1  ;;  %v4248_v10 = vsel %vm595_vm8, 1, %v6747_v1  ;;  %vm609_vm9 = vcmp.gt.f32.partialorder %v545_v11, 0.0 }
  0x29   : > { %314 = vmatpush.msra.mxu0 %v291_v24  ;;  %3760 = vmatpush.msra.mxu3 %v293_v22  ;;  %6852 = vst [vmem:[#allocation17_spill] sm:$0xff] %v4241_v7  ;;  %v4245_v9 = vsel %vm602_vm7, 1, %v6747_v1  ;;  %v534_v13 = vld [vmem:[%s4061_s11 + $0xa0] sm:$0xff]  ;;  %vm605_vm10 = vcmp.gt.f32.partialorder %v541_v12, 0.0  ;;  %v4257_v14 = vld [vmem:[%s4151_s9 + $0x28] sm:$0xff]  ;;  %v548_v20 = vld [vmem:[%s4061_s11 + $0x110] sm:$0xff] }
  0x2a   : > { %3764 = vmatpush.msra.mxu1 %v291_v24  ;;  %3762 = vmatpush.msra.mxu2 %v292_v23  ;;  %6853 = vst [vmem:[#allocation18_spill] sm:$0xff] %v4248_v10  ;;  %vm598_vm11 = vcmp.gt.f32.partialorder %v534_v13, 0.0  ;;  %v4264_v18 = vsel %vm605_vm10, 1, %v6747_v1  ;;  %v544_v21 = vld [vmem:[%s4061_s11 + $0xf0] sm:$0xff]  ;;  %v537_v22 = vld [vmem:[%s4061_s11 + $0xb8] sm:$0xff]  ;;  %vm612_vm12 = vcmp.gt.f32.partialorder %v548_v20, 0.0 }
  0x2b   : > { %315 = vmatpush.msra.mxu0 %v290_v29  ;;  %3763 = vmatpush.msra.mxu3 %v292_v23  ;;  %v4267_v19 = vsel %vm598_vm11, 1, %v6747_v1  ;;  %vm608_vm13 = vcmp.gt.f32.partialorder %v544_v21, 0.0  ;;  %vm601_vm14 = vcmp.gt.f32.partialorder %v537_v22, 0.0  ;;  %v4276_v23 = vld [vmem:[%s4151_s9 + $0x30] sm:$0xff]  ;;  %v4283_v28 = vsel %vm612_vm12, 1, %v6747_v1  ;;  %v4299_v36 = vld [vmem:[%s4151_s9 + $0x38] sm:$0xff] }
  0x2c   : > { %1057 = vperm.xlu0 %3830, %v4110_v25   ;;  %3828 = vset.pattern.permute.xlu1 %v3964_v0  ;;  %v4226_v0 = vsel %vm599_vm4, 1, %v6747_v1  ;;  %6855 = vst [vmem:[#allocation20_spill] sm:$0xff] %v4267_v19  ;;  %v4290_v30 = vsel %vm601_vm14, 1, %v6747_v1  ;;  %v554_v45 = vld [vmem:[%s4061_s11 + $0x140] sm:$0xff]  ;;  %v543_v47 = vld [vmem:[%s4061_s11 + $0xe8] sm:$0xff]  ;;  %v4325_v53 = vld [vmem:[%s4151_s9 + $0x90] sm:$0xff] }
  0x2d   : > { %1045 = vperm.xlu2 %3829, %v4113_v26   ;;  %1027 = vperm.xlu1 %3828, %v4116_v27   ;;  %6856 = vst [vmem:[#allocation21_spill] sm:$0xff] %v4283_v28  ;;  %v550_v46 = vld [vmem:[%s4061_s11 + $0x120] sm:$0xff]  ;;  %vm618_vm2 = vcmp.gt.f32.partialorder %v554_v45, 0.0  ;;  %vm607_vm4 = vcmp.gt.f32.partialorder %v543_v47, 0.0  ;;  %v557_v61 = vld [vmem:[%s4061_s11 + $0x158] sm:$0xff]  ;;  %v4345_v5 = vld [vmem:[%s4151_s9 + $0x48] sm:$0xff] }
  0x2e   : > { %316 = vmatpush.msra.mxu0 %v289_v31  ;;  %3767 = vmatpush.msra.mxu1 %v290_v29  ;;  %6857 = vst [vmem:[#allocation22_spill] sm:$0xff] %v4290_v30  ;;  %vm614_vm3 = vcmp.gt.f32.partialorder %v550_v46, 0.0  ;;  %v4322_v52 = vld [vmem:[%s4151_s9 + $0x40] sm:$0xff]  ;;  %v4329_v54 = vsel %vm618_vm2, 1, %v6747_v1  ;;  %v4336_v60 = vsel %vm607_vm4, 1, %v6747_v1  ;;  %v553_v3 = vld [vmem:[%s4061_s11 + $0x138] sm:$0xff] }
  0x2f   : > { %3765 = vmatpush.msra.mxu2 %v291_v24  ;;  %3766 = vmatpush.msra.mxu3 %v291_v24  ;;  %v4279_v24 = vld [vmem:[%s4151_s9 + $0x80] sm:$0xff]  ;;  %6860 = vst [vmem:[#allocation25_spill] sm:$0xff] %v4325_v53  ;;  %v4333_v59 = vsel %vm614_vm3, 1, %v6747_v1  ;;  %vm621_vm5 = vcmp.gt.f32.partialorder %v557_v61, 0.0  ;;  %vm617_vm6 = vcmp.gt.f32.partialorder %v553_v3, 0.0  ;;  %v4348_v11 = vld [vmem:[%s4151_s9 + $0x98] sm:$0xff] }
  0x30   : > { %317 = vmatpush.msra.mxu0 %v288_v32  ;;  %3770 = vmatpush.msra.mxu1 %v289_v31  ;;  %6861 = vst [vmem:[#allocation26_spill] sm:$0xff] %v4329_v54  ;;  %v546_v4 = vld [vmem:[%s4061_s11 + $0x100] sm:$0xff]  ;;  %v4357_v20 = vsel %vm621_vm5, 1, %v6747_v1  ;;  %v4362_v21 = vsel %vm617_vm6, 1, %v6747_v1  ;;  %v4374_v45 = vld [vmem:[%s4151_s9 + $0x50] sm:$0xff]  ;;  %v4381_v47 = vld [vmem:[%s4151_s9 + $0x108] sm:$0xff] }
  0x31   : > { %3768 = vmatpush.msra.mxu2 %v290_v29  ;;  %3769 = vmatpush.msra.mxu3 %v290_v29  ;;  %v4287_v29 = vsel %vm608_vm13, 1, %v6747_v1  ;;  %6862 = vst [vmem:[#allocation27_spill] sm:$0xff] %v4336_v60  ;;  %vm610_vm7 = vcmp.gt.f32.partialorder %v546_v4, 0.0  ;;  %v4354_v13 = vld [vmem:[%s4151_s9 + $0x100] sm:$0xff]  ;;  %v4443_v15 = vld [vmem:[%s4151_s9 + $0xb0] sm:$0xff]  ;;  %s3650_s5 = sshll.u32 %s207_s19, 4  ;;  %s3651_s5 = int_to_ptr.vmem [resolvable:$true] %s3650_s5 }
  0x32   : > { %318 = vmatpush.msra.mxu0 %v287_v34  ;;  %3773 = vmatpush.msra.mxu1 %v288_v32  ;;  %6863 = vst [vmem:[#allocation28_spill] sm:$0xff] %v4357_v20  ;;  %v4365_v22 = vsel %vm610_vm7, 1, %v6747_v1  ;;  %v4377_v46 = vld [vmem:[%s4151_s9 + $0xa0] sm:$0xff]  ;;  %s3638_s8 = scalar_lea.sflag [#allocation3], %s205_s20  ;;  %s3920_s6 = scalar_lea.hbm %s6743_s4, 8 }
  0x33   : > { %3771 = vmatpush.msra.mxu2 %v289_v31  ;;  %3772 = vmatpush.msra.mxu3 %v289_v31  ;;  %v551_v31 = vld [vmem:[%s4061_s11 + $0x128] sm:$0xff]  ;;  %6864 = vst [vmem:[#allocation29_spill] sm:$0xff] %v4365_v22  ;;  %v4440_v25 = vld [vmem:[%s4151_s9 + $0x60] sm:$0xff] }
  0x34   : > { %1066 = vperm.xlu0 %3830, %v4134_v33   ;;  %319 = vmatpush.msra.mxu0 %v286_v37  ;;  %vm615_vm15 = vcmp.gt.f32.partialorder %v551_v31, 0.0  ;;  %v560_v31 = vld [vmem:[%s4061_s11 + $0x170] sm:$0xff]  ;;  %6865 = vst [vmem:[#allocation30_spill] sm:$0xff] %v4381_v47  ;;  %v4507_v17 = vld [vmem:[%s4151_s9 + $0xc0] sm:$0xff] }
  0x35   : > { %1054 = vperm.xlu2 %3829, %v4140_v35   ;;  %1036 = vperm.xlu1 %3828, %v4086_v16   ;;  %v4260_v16 = vsel %vm609_vm9, 1, %v6747_v1  ;;  %v4306_v38 = vsel %vm615_vm15, 1, %v6747_v1  ;;  %vm624_vm8 = vcmp.gt.f32.partialorder %v560_v31, 0.0  ;;  %6885 = vst [vmem:[#allocation49_spill] sm:$0xff] %v4507_v17 }
  0x36   : > { %320 = vmatpush.msra.mxu0 %v285_v40  ;;  %3776 = vmatpush.msra.mxu1 %v287_v34  ;;  %6854 = vst [vmem:[#allocation19_spill] sm:$0xff] %v4260_v16  ;;  %v4384_v61 = vsel %vm624_vm8, 1, %v6747_v1 }
  0x37   : > { %321 = vmatmul.f32.vlgmr.msra.gmra.mxu0 %v4162_v41  ;;  %3774 = vmatpush.msra.mxu2 %v288_v32  ;;  %6858 = vst [vmem:[#allocation23_spill] sm:$0xff] %v4306_v38 }
  0x38   : > { %3779 = vmatpush.msra.mxu1 %v286_v37  ;;  %3775 = vmatpush.msra.mxu3 %v288_v32  ;;  %v547_v32 = vld [vmem:[%s4061_s11 + $0x108] sm:$0xff]  ;;  %6866 = vst [vmem:[#allocation31_spill] sm:$0xff] %v4384_v61 }
  0x39   : > { %3777 = vmatpush.msra.mxu2 %v287_v34  ;;  %vm611_vm0 = vcmp.gt.f32.partialorder %v547_v32, 0.0  ;;  %v556_v32 = vld [vmem:[%s4061_s11 + $0x150] sm:$0xff] }
  0x3a   : > { %3782 = vmatpush.msra.mxu1 %v285_v40  ;;  %3778 = vmatpush.msra.mxu3 %v287_v34  ;;  %v540_v34 = vld [vmem:[%s4061_s11 + $0xd0] sm:$0xff]  ;;  %v4310_v39 = vsel %vm611_vm0, 1, %v6747_v1  ;;  %vm620_vm9 = vcmp.gt.f32.partialorder %v556_v32, 0.0  ;;  %v563_v32 = vld [vmem:[%s4061_s11 + $0x188] sm:$0xff] }
  0x3b   : > { %3780 = vmatpush.msra.mxu2 %v286_v37  ;;  %369 = vmatmul.f32.vlgmr.msra.gmra.mxu1 %v4279_v24  ;;  %vm604_vm1 = vcmp.gt.f32.partialorder %v540_v34, 0.0  ;;  %v549_v34 = vld [vmem:[%s4061_s11 + $0x118] sm:$0xff]  ;;  %v4391_v4 = vsel %vm620_vm9, 1, %v6747_v1  ;;  %vm627_vm11 = vcmp.gt.f32.partialorder %v563_v32, 0.0 }
  0x3c   : > { %1075 = vperm.xlu0 %3830, %v4165_v42   ;;  %3781 = vmatpush.msra.mxu3 %v286_v37  ;;  %v4302_v37 = vld [vmem:[%s4151_s9 + $0x88] sm:$0xff]  ;;  %vm613_vm10 = vcmp.gt.f32.partialorder %v549_v34, 0.0 }
  0x3d   : > { %1063 = vperm.xlu2 %3829, %v4169_v43   ;;  %1042 = vperm.xlu1 %3828, %v4172_v44   ;;  %v4394_v31 = vsel %vm613_vm10, 1, %v6747_v1  ;;  %v559_v34 = vld [vmem:[%s4061_s11 + $0x168] sm:$0xff]  ;;  %v4504_v44 = vld [vmem:[%s4151_s9 + $0x70] sm:$0xff] }
  0x3e   : > { %3783 = vmatpush.msra.mxu2 %v285_v40  ;;  %3784 = vmatpush.msra.mxu3 %v285_v40  ;;  %v4313_v40 = vsel %vm604_vm1, 1, %v6747_v1  ;;  %6867 = vst [vmem:[#allocation32_spill] sm:$0xff] %v4394_v31  ;;  %vm623_vm12 = vcmp.gt.f32.partialorder %v559_v34, 0.0  ;;  %v4407_v1 = vld [vmem:[%s4151_s9 + $0x58] sm:$0xff]  ;;  %v566_v34 = vld [vmem:[%s4061_s11 + $0x1a0] sm:$0xff] }
  0x3f   : > { %324 = vmatmul.f32.gmra.mxu0 %v4181_v48  ;;  %6859 = vst [vmem:[#allocation24_spill] sm:$0xff] %v4313_v40  ;;  %417 = vmatmul.f32.vlgmr.msra.gmra.mxu2 %v4354_v13  ;;  %vm630_vm14 = vcmp.gt.f32.partialorder %v566_v34, 0.0  ;;  %v569_v34 = vld [vmem:[%s4061_s11 + $0x1b8] sm:$0xff] }
  0x40   : > { %vm633_vm1 = vcmp.gt.f32.partialorder %v569_v34, 0.0  ;;  %v572_v34 = vld [vmem:[%s4061_s11 + $0x1d0] sm:$0xff] }
  0x41   : > { %vm636_vm4 = vcmp.gt.f32.partialorder %v572_v34, 0.0  ;;  %v575_v34 = vld [vmem:[%s4061_s11 + $0x1e8] sm:$0xff] }
  0x42   : > { %vm639_vm7 = vcmp.gt.f32.partialorder %v575_v34, 0.0 }
  0x43   : > { %372 = vmatmul.f32.gmra.mxu1 %v4302_v37 }
  0x44   : > { %1084 = vperm.xlu0 %3830, %v4184_v49   ;;  %v555_v49 = vld [vmem:[%s4061_s11 + $0x148] sm:$0xff] }
  0x45   : > { %1072 = vperm.xlu2 %3829, %v4188_v50   ;;  %1051 = vperm.xlu1 %3828, %v4191_v51   ;;  %vm619_vm0 = vcmp.gt.f32.partialorder %v555_v49, 0.0 }
  0x47   : > { %327 = vmatmul.f32.gmra.mxu0 %v4200_v55  ;;  %420 = vmatmul.f32.gmra.mxu2 %v4381_v47 }
  0x4b   : > { %375 = vmatmul.f32.gmra.mxu1 %v4325_v53  ;;  %v4603_v53 = vld [vmem:[%s4151_s9 + $0xd8] sm:$0xff] }
  0x4c   : > { %1093 = vperm.xlu0 %3830, %v4203_v56   ;;  %v562_v56 = vld [vmem:[%s4061_s11 + $0x180] sm:$0xff]  ;;  %6903 = vst [vmem:[#allocation67_spill] sm:$0xff] %v4603_v53 }
  0x4d   : > { %1081 = vperm.xlu2 %3829, %v4207_v57   ;;  %1060 = vperm.xlu1 %3828, %v4210_v58   ;;  %vm626_vm15 = vcmp.gt.f32.partialorder %v562_v56, 0.0 }
  0x4f   : > { %330 = vmatmul.f32.gmra.mxu0 %v4219_v62 }
  0x53   : > { %378 = vmatmul.f32.gmra.mxu1 %v4348_v11 }
  0x54   : > { %1102 = vperm.xlu0 %3830, %v4222_v63  }
  0x55   : > { %1090 = vperm.xlu2 %3829, %v4226_v0   ;;  %1069 = vperm.xlu1 %3828, %v4229_v2   ;;  %v561_v2 = vld [vmem:[%s4061_s11 + $0x178] sm:$0xff] }
  0x56   : > { %vm625_vm6 = vcmp.gt.f32.partialorder %v561_v2, 0.0 }
  0x57   : > { %333 = vmatmul.f32.gmra.mxu0 %v4238_v6 }
  0x5b   : > { %381 = vmatmul.f32.gmra.mxu1 %v4377_v46 }
  0x5c   : > { %1111 = vperm.xlu0 %3830, %v4241_v7  }
  0x5d   : > { %1099 = vperm.xlu2 %3829, %v4245_v9   ;;  %1078 = vperm.xlu1 %3828, %v4248_v10   ;;  %v568_v10 = vld [vmem:[%s4061_s11 + $0x1b0] sm:$0xff] }
  0x5e   : > { %vm632_vm5 = vcmp.gt.f32.partialorder %v568_v10, 0.0 }
  0x5f   : > { %336 = vmatmul.f32.gmra.mxu0 %v4257_v14 }
  0x64   : > { %1120 = vperm.xlu0 %3830, %v4260_v16   ;;  %v6871_v16 = vmov 0  }
  0x65   : > { %1108 = vperm.xlu2 %3829, %v4264_v18   ;;  %1087 = vperm.xlu1 %3828, %v4267_v19   ;;  %v4417_v7 = vsel %vm627_vm11, 1, %v6871_v16  ;;  %v4422_v32 = vsel %vm623_vm12, 1, %v6871_v16  ;;  %v4455_v56 = vsel %vm626_vm15, 1, %v6871_v16  ;;  %v4458_v49 = vsel %vm619_vm0, 1, %v6871_v16  ;;  %v4480_v19 = vld [vmem:[%s4151_s9 + $0x120] sm:$0xff] }
  0x66   : > { %6872 = vst [vmem:[#allocation36_spill] sm:$0xff] %v4417_v7  ;;  %v4521_v2 = vsel %vm632_vm5, 1, %v6871_v16  ;;  %v4524_v10 = vsel %vm625_vm6, 1, %v6871_v16 }
  0x67   : > { %339 = vmatmul.f32.gmra.mxu0 %v4276_v23  ;;  %6877 = vst [vmem:[#allocation41_spill] sm:$0xff] %v4458_v49 }
  0x68   : > { %6880 = vst [vmem:[#allocation44_spill] sm:$0xff] %v4480_v19 }
  0x69   : > { %6888 = vst [vmem:[#allocation52_spill] sm:$0xff] %v4524_v10 }
  0x6c   : > { %1129 = vperm.xlu0 %3830, %v4283_v28   ;;  %v4410_v28 = vld [vmem:[%s4151_s9 + $0xa8] sm:$0xff] }
  0x6d   : > { %1117 = vperm.xlu2 %3829, %v4287_v29   ;;  %1096 = vperm.xlu1 %3828, %v4290_v30   ;;  %6870 = vst [vmem:[#allocation35_spill] sm:$0xff] %v4410_v28 }
  0x6e   : > { %384 = vmatmul.f32.gmra.mxu1 %v4410_v28  ;;  %v4579_v28 = vld [vmem:[%s4151_s9 + $0x188] sm:$0xff] }
  0x6f   : > { %342 = vmatmul.f32.gmra.mxu0 %v4299_v36 }
  0x74   : > { %1138 = vperm.xlu0 %3830, %v4306_v38  }
  0x75   : > { %1126 = vperm.xlu2 %3829, %v4310_v39   ;;  %1105 = vperm.xlu1 %3828, %v4313_v40  }
  0x76   : > { %387 = vmatmul.f32.gmra.mxu1 %v4443_v15 }
  0x77   : > { %345 = vmatmul.f32.gmra.mxu0 %v4322_v52  ;;  %v4350_v12 = vpop.permute.xlu2 %1030 }
  0x78   : > { %vm1219_vm0 = vcmp.eq.s32.totalorder %v4350_v12, 1 }
  0x7c   : > { %1147 = vperm.xlu0 %3830, %v4329_v54  }
  0x7d   : > { %1135 = vperm.xlu2 %3829, %v4333_v59   ;;  %1114 = vperm.xlu1 %3828, %v4336_v60  }
  0x7f   : > { %348 = vmatmul.f32.gmra.mxu0 %v4345_v5  ;;  %v4388_v3 = vpop.permute.xlu2 %1039 }
  0x84   : > { %1156 = vperm.xlu0 %3830, %v4357_v20   ;;  %v552_v20 = vld [vmem:[%s4061_s11 + $0x130] sm:$0xff] }
  0x85   : > { %1144 = vperm.xlu2 %3829, %v4362_v21   ;;  %1123 = vperm.xlu1 %3828, %v4365_v22   ;;  %vm616_vm13 = vcmp.gt.f32.partialorder %v552_v20, 0.0  ;;  %v558_v22 = vld [vmem:[%s4061_s11 + $0x160] sm:$0xff] }
  0x86   : > { %v4425_v20 = vsel %vm616_vm13, 1, %v6871_v16  ;;  %vm622_vm3 = vcmp.gt.f32.partialorder %v558_v22, 0.0 }
  0x87   : > { %351 = vmatmul.f32.gmra.mxu0 %v4374_v45  ;;  %6873 = vst [vmem:[#allocation37_spill] sm:$0xff] %v4425_v20  ;;  %v4428_v63 = vpop.permute.xlu2 %1045  ;;  %v4491_v22 = vsel %vm622_vm3, 1, %v6871_v16 }
  0x88   : > { %6874 = vst [vmem:[#allocation38_spill] sm:$0xff] %v4428_v63 }
  0x89   : > { %6882 = vst [vmem:[#allocation46_spill] sm:$0xff] %v4491_v22 }
  0x8c   : > { %1165 = vperm.xlu0 %3830, %v4384_v61   ;;  %v4414_v61 = vld [vmem:[%s4151_s9 + $0x110] sm:$0xff] }
  0x8d   : > { %1153 = vperm.xlu2 %3829, %v4391_v4   ;;  %1132 = vperm.xlu1 %3828, %v4394_v31   ;;  %v4450_v31 = vsel %vm630_vm14, 1, %v6871_v16 }
  0x8e   : > { %v4402_v54 = vpop.permute.xlu0 %1033  ;;  %v4404_v38 = vpop.permute.xlu1 %713  ;;  %423 = vmatmul.f32.gmra.mxu2 %v4414_v61  ;;  %6876 = vst [vmem:[#allocation40_spill] sm:$0xff] %v4450_v31 }
  0x8f   : > { %6868 = vst [vmem:[#allocation33_spill] sm:$0xff] %v4402_v54  ;;  %354 = vmatmul.f32.gmra.mxu0 %v4407_v1  ;;  %v4466_v60 = vpop.permute.xlu2 %1054  ;;  %v571_v54 = vld [vmem:[%s4061_s11 + $0x1c8] sm:$0xff] }
  0x90   : > { %6869 = vst [vmem:[#allocation34_spill] sm:$0xff] %v4404_v38  ;;  %v4513_v38 = vld [vmem:[%s4151_s9 + $0x128] sm:$0xff]  ;;  %vm635_vm8 = vcmp.gt.f32.partialorder %v571_v54, 0.0 }
  0x91   : > { %6878 = vst [vmem:[#allocation42_spill] sm:$0xff] %v4466_v60 }
  0x94   : > { %1174 = vperm.xlu0 %3830, %v4417_v7   ;;  %v4447_v7 = vld [vmem:[%s4151_s9 + $0x118] sm:$0xff] }
  0x95   : > { %1162 = vperm.xlu2 %3829, %v4422_v32   ;;  %1141 = vperm.xlu1 %3828, %v4425_v20   ;;  %v565_v20 = vld [vmem:[%s4061_s11 + $0x198] sm:$0xff] }
  0x96   : > { %v4435_v42 = vpop.permute.xlu0 %1048  ;;  %v4437_v33 = vpop.permute.xlu1 %716  ;;  %426 = vmatmul.f32.gmra.mxu2 %v4447_v7  ;;  %vm629_vm2 = vcmp.gt.f32.partialorder %v565_v20, 0.0 }
  0x97   : > { %6875 = vst [vmem:[#allocation39_spill] sm:$0xff] %v4437_v33  ;;  %357 = vmatmul.f32.gmra.mxu0 %v4440_v25  ;;  %v4473_v33 = vld [vmem:[%s4151_s9 + $0x68] sm:$0xff]  ;;  %v4488_v20 = vsel %vm629_vm2, 1, %v6871_v16  ;;  %vm1225_vm2 = vcmp.eq.s32.totalorder %v4435_v42, 1 }
  0x9c   : > { %1183 = vperm.xlu0 %3830, %v4450_v31   ;;  %v4476_v31 = vld [vmem:[%s4151_s9 + $0xb8] sm:$0xff] }
  0x9d   : > { %1171 = vperm.xlu2 %3829, %v4455_v56   ;;  %1150 = vperm.xlu1 %3828, %v4458_v49   ;;  %v4483_v49 = vsel %vm633_vm1, 1, %v6871_v16  ;;  %vm1222_vm1 = vcmp.eq.s32.totalorder %v4388_v3, 1 }
  0x9e   : > { %v4468_v40 = vpop.permute.xlu0 %1057  ;;  %390 = vmatmul.f32.gmra.mxu1 %v4476_v31  ;;  %6881 = vst [vmem:[#allocation45_spill] sm:$0xff] %v4483_v49  ;;  %429 = vmatmul.f32.gmra.mxu2 %v4480_v19  ;;  %v567_v19 = vld [vmem:[%s4061_s11 + $0x1a8] sm:$0xff] }
  0x9f   : > { %v4470_v30 = vpop.permute.xlu1 %1027  ;;  %360 = vmatmul.f32.gmra.mxu0 %v4473_v33  ;;  %vm631_vm11 = vcmp.gt.f32.partialorder %v567_v19, 0.0  ;;  %vm1228_vm3 = vcmp.eq.s32.totalorder %v4468_v40, 1 }
  0xa0   : > { %6879 = vst [vmem:[#allocation43_spill] sm:$0xff] %v4470_v30  ;;  %v4544_v30 = vld [vmem:[%s4151_s9 + $0x180] sm:$0xff] }
  0xa1   : > { %6891 = vst [vmem:[#allocation55_spill] sm:$0xff] %v4544_v30  ;;  %465 = vmatmul.f32.vlgmr.msra.gmra.mxu3 %v4544_v30 }
  0xa4   : > { %1192 = vperm.xlu0 %3830, %v4483_v49   ;;  %v4509_v49 = vpop.permute.xlu2 %1063 }
  0xa5   : > { %1180 = vperm.xlu2 %3829, %v4488_v20   ;;  %1159 = vperm.xlu1 %3828, %v4491_v22   ;;  %6886 = vst [vmem:[#allocation50_spill] sm:$0xff] %v4509_v49  ;;  %v4516_v22 = vsel %vm636_vm4, 1, %v6871_v16  ;;  %v564_v49 = vld [vmem:[%s4061_s11 + $0x190] sm:$0xff] }
  0xa6   : > { %v4499_v58 = vpop.permute.xlu0 %1066  ;;  %393 = vmatmul.f32.gmra.mxu1 %v4507_v17  ;;  %6887 = vst [vmem:[#allocation51_spill] sm:$0xff] %v4516_v22  ;;  %432 = vmatmul.f32.gmra.mxu2 %v4513_v38  ;;  %vm628_vm9 = vcmp.gt.f32.partialorder %v564_v49, 0.0  ;;  %v4554_v49 = vsel %vm635_vm8, 1, %v6871_v16  ;;  %v4573_v17 = vld [vmem:[%s4151_s9 + $0x78] sm:$0xff] }
  0xa7   : > { %6883 = vst [vmem:[#allocation47_spill] sm:$0xff] %v4499_v58  ;;  %v4501_v51 = vpop.permute.xlu1 %1036  ;;  %363 = vmatmul.f32.gmra.mxu0 %v4504_v44  ;;  %v4557_v34 = vsel %vm628_vm9, 1, %v6871_v16  ;;  %v4610_v58 = vld [vmem:[%s4151_s9 + $0x190] sm:$0xff] }
  0xa8   : > { %6884 = vst [vmem:[#allocation48_spill] sm:$0xff] %v4501_v51  ;;  %v4537_v51 = vld [vmem:[%s4151_s9 + $0xc8] sm:$0xff] }
  0xa9   : > { %6894 = vst [vmem:[#allocation58_spill] sm:$0xff] %v4557_v34  ;;  %468 = vmatmul.f32.gmra.mxu3 %v4579_v28 }
  0xaa   : > { %6897 = vst [vmem:[#allocation61_spill] sm:$0xff] %v4573_v17 }
  0xac   : > { %1201 = vperm.xlu0 %3830, %v4516_v22   ;;  %v4541_v22 = vld [vmem:[%s4151_s9 + $0x130] sm:$0xff]  ;;  %v4551_v54 = vpop.permute.xlu2 %1072 }
  0xad   : > { %1189 = vperm.xlu2 %3829, %v4521_v2   ;;  %1168 = vperm.xlu1 %3828, %v4524_v10   ;;  %v4547_v10 = vsel %vm639_vm7, 1, %v6871_v16  ;;  %6893 = vst [vmem:[#allocation57_spill] sm:$0xff] %v4551_v54  ;;  %v4569_v54 = vld [vmem:[%s4151_s9 + $0xd0] sm:$0xff] }
  0xae   : > { %v4532_v60 = vpop.permute.xlu0 %1075  ;;  %396 = vmatmul.f32.gmra.mxu1 %v4537_v51  ;;  %6892 = vst [vmem:[#allocation56_spill] sm:$0xff] %v4547_v10  ;;  %435 = vmatmul.f32.gmra.mxu2 %v4541_v22 }
  0xaf   : > { %6889 = vst [vmem:[#allocation53_spill] sm:$0xff] %v4532_v60  ;;  %v4534_v63 = vpop.permute.xlu1 %1042  ;;  %366 = vmatmul.f32.gmra.mxu0 %v4573_v17  ;;  %v4635_v17 = vld [vmem:[%s4151_s9 + $0x148] sm:$0xff] }
  0xb0   : > { %6890 = vst [vmem:[#allocation54_spill] sm:$0xff] %v4534_v63  ;;  %v574_v63 = vld [vmem:[%s4061_s11 + $0x1e0] sm:$0xff] }
  0xb1   : > { %vm638_vm10 = vcmp.gt.f32.partialorder %v574_v63, 0.0  ;;  %v4588_v63 = vsel %vm631_vm11, 1, %v6871_v16  ;;  %471 = vmatmul.f32.gmra.mxu3 %v4610_v58 }
  0xb2   : > { %6899 = vst [vmem:[#allocation63_spill] sm:$0xff] %v4588_v63 }
  0xb4   : > { %1210 = vperm.xlu0 %3830, %v4547_v10   ;;  %v4576_v10 = vld [vmem:[%s4151_s9 + $0x138] sm:$0xff]  ;;  %v4590_v19 = vpop.permute.xlu2 %1081 }
  0xb5   : > { %1198 = vperm.xlu2 %3829, %v4554_v49   ;;  %1177 = vperm.xlu1 %3828, %v4557_v34   ;;  %6898 = vst [vmem:[#allocation62_spill] sm:$0xff] %v4576_v10  ;;  %v4584_v34 = vsel %vm638_vm10, 1, %v6871_v16 }
  0xb6   : > { %v4564_v47 = vpop.permute.xlu0 %1084  ;;  %399 = vmatmul.f32.gmra.mxu1 %v4569_v54  ;;  %438 = vmatmul.f32.gmra.mxu2 %v4576_v10  ;;  %6900 = vst [vmem:[#allocation64_spill] sm:$0xff] %v4590_v19  ;;  %v570_v10 = vld [vmem:[%s4061_s11 + $0x1c0] sm:$0xff] }
  0xb7   : > { %6895 = vst [vmem:[#allocation59_spill] sm:$0xff] %v4564_v47  ;;  %v4566_v30 = vpop.permute.xlu1 %1051  ;;  %vm634_vm13 = vcmp.gt.f32.partialorder %v570_v10, 0.0  ;;  %v4607_v19 = vld [vmem:[%s4151_s9 + $0x140] sm:$0xff]  ;;  %v573_v10 = vld [vmem:[%s4061_s11 + $0x1d8] sm:$0xff] }
  0xb8   : > { %6896 = vst [vmem:[#allocation60_spill] sm:$0xff] %v4566_v30  ;;  %v577_v30 = vld [vmem:[%s4061_s11 + $0x1f8] sm:$0xff]  ;;  %vm637_vm14 = vcmp.gt.f32.partialorder %v573_v10, 0.0  ;;  %v576_v10 = vld [vmem:[%s4061_s11 + $0x1f0] sm:$0xff] }
  0xb9   : > { %vm641_vm12 = vcmp.gt.f32.partialorder %v577_v30, 0.0  ;;  %v4618_v30 = vsel %vm634_vm13, 1, %v6871_v16  ;;  %vm640_vm15 = vcmp.gt.f32.partialorder %v576_v10, 0.0 }
  0xba   : > { %6905 = vst [vmem:[#allocation69_spill] sm:$0xff] %v4618_v30 }
  0xbc   : > { %3831 = vset.pattern.permute.xlu0 %v6871_v16 }
  0xbd   : > { %1207 = vperm.xlu2 %3829, %v4584_v34   ;;  %707 = vperm.xlu0 %3831, %v4116_v27   ;;  %v4614_v27 = vsel %vm641_vm12, 1, %v6871_v16 }
  0xbe   : > { %1186 = vperm.xlu1 %3828, %v4588_v63   ;;  %v4598_v47 = vpop.permute.xlu0 %1093  ;;  %402 = vmatmul.f32.gmra.mxu1 %v4603_v53  ;;  %6904 = vst [vmem:[#allocation68_spill] sm:$0xff] %v4614_v27  ;;  %v4623_v63 = vpop.permute.xlu2 %1090 }
  0xbf   : > { %6901 = vst [vmem:[#allocation65_spill] sm:$0xff] %v4598_v47  ;;  %v4600_v60 = vpop.permute.xlu1 %1060  ;;  %441 = vmatmul.f32.gmra.mxu2 %v4607_v19  ;;  %v4631_v47 = vld [vmem:[%s4151_s9 + $0xe0] sm:$0xff] }
  0xc0   : > { %6902 = vst [vmem:[#allocation66_spill] sm:$0xff] %v4600_v60 }
  0xc1   : > { %6906 = vst [vmem:[#allocation70_spill] sm:$0xff] %v4623_v63  ;;  %v4656_v63 = vld [vmem:[%s4151_s9 + $0xe8] sm:$0xff] }
  0xc5   : > { %1216 = vperm.xlu2 %3829, %v4614_v27   ;;  %710 = vperm.xlu0 %3831, %v4067_v8   ;;  %v4638_v27 = vld [vmem:[%s4151_s9 + $0x198] sm:$0xff]  ;;  %v4643_v8 = vsel %vm637_vm14, 1, %v6871_v16 }
  0xc6   : > { %1195 = vperm.xlu1 %3828, %v4618_v30   ;;  %v4626_v60 = vpop.permute.xlu0 %1102  ;;  %405 = vmatmul.f32.gmra.mxu1 %v4631_v47  ;;  %6908 = vst [vmem:[#allocation72_spill] sm:$0xff] %v4638_v27 }
  0xc7   : > { %v4628_v53 = vpop.permute.xlu1 %1069  ;;  %444 = vmatmul.f32.gmra.mxu2 %v4635_v17  ;;  %474 = vmatmul.f32.gmra.mxu3 %v4638_v27  ;;  %6909 = vst [vmem:[#allocation73_spill] sm:$0xff] %v4643_v8  ;;  %v4658_v27 = vpop.permute.xlu2 %1099  ;;  %vm1243_vm8 = vcmp.eq.s32.totalorder %v4626_v60, 1 }
  0xc8   : > { %6907 = vst [vmem:[#allocation71_spill] sm:$0xff] %v4628_v53 }
  0xc9   : > { %6912 = vst [vmem:[#allocation76_spill] sm:$0xff] %v4658_v27  ;;  %v4681_v27 = vld [vmem:[%s4151_s9 + $0x158] sm:$0xff] }
  0xcd   : > { %1350 = vrot.lane.b32.xlu2 %v4200_v55, %s3966_s27  ;;  %725 = vperm.xlu0 %3831, %v4113_v26   ;;  %v4662_v55 = vld [vmem:[%s4151_s9 + $0x150] sm:$0xff]  ;;  %v4665_v26 = vld [vmem:[%s4151_s9 + $0x1a0] sm:$0xff] }
  0xce   : > { %1204 = vperm.xlu1 %3828, %v4643_v8   ;;  %v4650_v30 = vpop.permute.xlu0 %1111  ;;  %3832 = vset.pattern.permute.xlu2 %v6871_v16  ;;  %6913 = vst [vmem:[#allocation77_spill] sm:$0xff] %v4662_v55  ;;  %v4670_v8 = vsel %vm640_vm15, 1, %v6871_v16 }
  0xcf   : > { %6910 = vst [vmem:[#allocation74_spill] sm:$0xff] %v4650_v30  ;;  %v4653_v53 = vpop.permute.xlu1 %1078  ;;  %408 = vmatmul.f32.gmra.mxu1 %v4656_v63  ;;  %447 = vmatmul.f32.gmra.mxu2 %v4662_v55  ;;  %v4684_v55 = vld [vmem:[%s4151_s9 + $0x1a8] sm:$0xff]  ;;  %v4687_v30 = vpop.permute.xlu2 %1108 }
  0xd0   : > { %6911 = vst [vmem:[#allocation75_spill] sm:$0xff] %v4653_v53  ;;  %477 = vmatmul.f32.gmra.mxu3 %v4665_v26 }
  0xd1   : > { %6914 = vst [vmem:[#allocation78_spill] sm:$0xff] %v4670_v8 }
  0xd2   : > { %6916 = vst [vmem:[#allocation80_spill] sm:$0xff] %v4687_v30  ;;  %v4707_v30 = vld [vmem:[%s4151_s9 + $0x1b0] sm:$0xff] }
  0xd5   : > { %1356 = vrot.lane.b32.xlu2 %v4257_v14, %s3966_s27  ;;  %734 = vperm.xlu0 %3831, %v4140_v35  }
  0xd6   : > { %1213 = vperm.xlu1 %3828, %v4670_v8   ;;  %v4676_v10 = vpop.permute.xlu0 %1120  ;;  %v4701_v8 = vld [vmem:[%s4151_s9 + $0xf0] sm:$0xff] }
  0xd7   : > { %v4678_v53 = vpop.permute.xlu1 %1087  ;;  %450 = vmatmul.f32.gmra.mxu2 %v4681_v27  ;;  %411 = vmatmul.f32.gmra.mxu1 %v4701_v8  ;;  %vm1249_vm10 = vcmp.eq.s32.totalorder %v4676_v10, 1 }
  0xd8   : > { %6915 = vst [vmem:[#allocation79_spill] sm:$0xff] %v4678_v53  ;;  %480 = vmatmul.f32.gmra.mxu3 %v4684_v55  ;;  %v4704_v53 = vld [vmem:[%s4151_s9 + $0x160] sm:$0xff] }
  0xdd   : > { %1362 = vrot.lane.b32.xlu2 %v4322_v52, %s3966_s27  ;;  %743 = vperm.xlu0 %3831, %v4169_v43   ;;  %v4712_v43 = vpop.permute.xlu2 %1117  ;;  %v4724_v52 = vld [vmem:[%s4151_s9 + $0x168] sm:$0xff] }
  0xde   : > { %1348 = vrot.lane.b32.xlu1 %v4181_v48, %s3966_s27  ;;  %v4695_v35 = vpop.permute.xlu0 %1129  ;;  %6918 = vst [vmem:[#allocation82_spill] sm:$0xff] %v4712_v43  ;;  %v4746_v43 = vld [vmem:[%s4151_s9 + $0x1c0] sm:$0xff] }
  0xdf   : > { %v4697_v14 = vpop.permute.xlu1 %1096  ;;  %3833 = vset.pattern.permute.xlu1 %v6871_v16  ;;  %453 = vmatmul.f32.gmra.mxu2 %v4704_v53  ;;  %vm1252_vm11 = vcmp.eq.s32.totalorder %v4695_v35, 1 }
  0xe0   : > { %6917 = vst [vmem:[#allocation81_spill] sm:$0xff] %v4697_v14  ;;  %483 = vmatmul.f32.gmra.mxu3 %v4707_v30  ;;  %v4727_v14 = vld [vmem:[%s4151_s9 + $0x1b8] sm:$0xff] }
  0xe5   : > { %1368 = vrot.lane.b32.xlu2 %v4407_v1, %s3966_s27  ;;  %752 = vperm.xlu0 %3831, %v4188_v50   ;;  %v4734_v1 = vpop.permute.xlu2 %1126 }
  0xe6   : > { %1354 = vrot.lane.b32.xlu1 %v4238_v6, %s3966_s27  ;;  %v4719_v48 = vpop.permute.xlu0 %1138  ;;  %6920 = vst [vmem:[#allocation84_spill] sm:$0xff] %v4734_v1  ;;  %v4765_v1 = vld [vmem:[%s4151_s9 + $0x1c8] sm:$0xff] }
  0xe7   : > { %v4721_v16 = vpop.permute.xlu1 %1105  ;;  %456 = vmatmul.f32.gmra.mxu2 %v4724_v52  ;;  %vm1255_vm12 = vcmp.eq.s32.totalorder %v4719_v48, 1 }
  0xe8   : > { %6919 = vst [vmem:[#allocation83_spill] sm:$0xff] %v4721_v16  ;;  %486 = vmatmul.f32.gmra.mxu3 %v4727_v14  ;;  %v4743_v16 = vld [vmem:[%s4151_s9 + $0x170] sm:$0xff] }
  0xed   : > { %1374 = vrot.lane.b32.xlu2 %v4504_v44, %s3966_s27  ;;  %761 = vperm.xlu0 %3831, %v4207_v57  }
  0xee   : > { %1360 = vrot.lane.b32.xlu1 %v4299_v36, %s3966_s27  ;;  %v4738_v50 = vpop.permute.xlu0 %1147  ;;  %v4759_v36 = vpop.permute.xlu2 %1135 }
  0xef   : > { %v4740_v6 = vpop.permute.xlu1 %1114  ;;  %459 = vmatmul.f32.gmra.mxu2 %v4743_v16  ;;  %6923 = vst [vmem:[#allocation87_spill] sm:$0xff] %v4759_v36  ;;  %vm1258_vm14 = vcmp.eq.s32.totalorder %v4738_v50, 1 }
  0xf0   : > { %6921 = vst [vmem:[#allocation85_spill] sm:$0xff] %v4740_v6  ;;  %489 = vmatmul.f32.gmra.mxu3 %v4746_v43  ;;  %v4762_v6 = vld [vmem:[%s4151_s9 + $0x178] sm:$0xff] }
  0xf5   : > { %1380 = vrot.lane.b32.xlu2 %v4302_v37, %s3966_s27  ;;  %770 = vperm.xlu0 %3831, %v4226_v0  }
  0xf6   : > { %1366 = vrot.lane.b32.xlu1 %v4374_v45, %s3966_s27  ;;  %v4755_v44 = vpop.permute.xlu0 %1156  ;;  %v252_v45 = vld [vmem:[%s4151_s9 + $0xf8] sm:$0xff]  ;;  %v4782_v36 = vpop.permute.xlu2 %1144 }
  0xf7   : > { %v4757_v57 = vpop.permute.xlu1 %1123  ;;  %462 = vmatmul.f32.gmra.mxu2 %v4762_v6  ;;  %414 = vmatmul.f32.gmra.mxu1 %v252_v45  ;;  %6925 = vst [vmem:[#allocation89_spill] sm:$0xff] %v4782_v36 }
  0xf8   : > { %6922 = vst [vmem:[#allocation86_spill] sm:$0xff] %v4757_v57  ;;  %492 = vmatmul.f32.gmra.mxu3 %v4765_v1  ;;  %v4780_v57 = vld [vmem:[%s4151_s9 + $0x1d0] sm:$0xff] }
  0xfd   : > { %1386 = vrot.lane.b32.xlu2 %v4377_v46, %s3966_s27  ;;  %779 = vperm.xlu0 %3831, %v4245_v9   ;;  %v4795_v46 = vld [vmem:[%s4151_s9 + $0x1d8] sm:$0xff] }
  0xfe   : > { %1372 = vrot.lane.b32.xlu1 %v4473_v33, %s3966_s27  ;;  %v4774_v0 = vpop.permute.xlu0 %1165  ;;  %v4800_v36 = vpop.permute.xlu2 %1153 }
  0xff   : > { %v4776_v37 = vpop.permute.xlu1 %1132  ;;  %6927 = vst [vmem:[#allocation91_spill] sm:$0xff] %v4800_v36 }
 0x100   : > { %6924 = vst [vmem:[#allocation88_spill] sm:$0xff] %v4776_v37  ;;  %495 = vmatmul.f32.gmra.mxu3 %v4780_v57  ;;  %v4797_v37 = vpop.f32.mrf.mxu0 }
 0x105   : > { %1392 = vrot.lane.b32.xlu2 %v4476_v31, %s3966_s27  ;;  %788 = vperm.xlu0 %3831, %v4264_v18   ;;  %v4812_v31 = vld [vmem:[%s4151_s9 + $0x1e0] sm:$0xff] }
 0x106   : > { %1378 = vrot.lane.b32.xlu1 %v4279_v24, %s3966_s27  ;;  %v4790_v33 = vpop.permute.xlu0 %1174 }
 0x107   : > { %v4792_v9 = vpop.permute.xlu1 %1141 }
 0x108   : > { %6926 = vst [vmem:[#allocation90_spill] sm:$0xff] %v4792_v9  ;;  %498 = vmatmul.f32.gmra.mxu3 %v4795_v46  ;;  %v4815_v9 = vpop.f32.mrf.mxu0 }
 0x10d   : > { %1398 = vrot.lane.b32.xlu2 %v4569_v54, %s3966_s27  ;;  %797 = vperm.xlu0 %3831, %v4287_v29   ;;  %v4820_v29 = vpop.permute.xlu2 %1162 }
 0x10e   : > { %1384 = vrot.lane.b32.xlu1 %v4348_v11, %s3966_s27  ;;  %v4807_v18 = vpop.permute.xlu0 %1183  ;;  %6929 = vst [vmem:[#allocation93_spill] sm:$0xff] %v4820_v29 }
 0x10f   : > { %v4809_v24 = vpop.permute.xlu1 %1150 }
 0x110   : > { %6928 = vst [vmem:[#allocation92_spill] sm:$0xff] %v4809_v24  ;;  %501 = vmatmul.f32.gmra.mxu3 %v4812_v31  ;;  %v4829_v24 = vld [vmem:[%s4151_s9 + $0x1e8] sm:$0xff] }
 0x115   : > { %1404 = vrot.lane.b32.xlu2 %v4656_v63, %s3966_s27  ;;  %806 = vperm.xlu0 %3831, %v4310_v39   ;;  %v4835_v63 = vpop.f32.mrf.mxu0  ;;  %v4843_v29 = vpop.permute.xlu2 %1171 }
 0x116   : > { %1390 = vrot.lane.b32.xlu1 %v4443_v15, %s3966_s27  ;;  %v4824_v11 = vpop.permute.xlu0 %1192  ;;  %6932 = vst [vmem:[#allocation96_spill] sm:$0xff] %v4843_v29 }
 0x117   : > { %v4826_v54 = vpop.permute.xlu1 %1159 }
 0x118   : > { %6930 = vst [vmem:[#allocation94_spill] sm:$0xff] %v4826_v54  ;;  %504 = vmatmul.f32.gmra.mxu3 %v4829_v24  ;;  %v4846_v54 = vld [vmem:[%s4151_s9 + $0x1f0] sm:$0xff] }
 0x11d   : > { %1410 = vrot.lane.b32.xlu2 %v4354_v13, %s3966_s27  ;;  %815 = vperm.xlu0 %3831, %v4333_v59   ;;  %v4858_v13 = vpop.f32.mrf.mxu0  ;;  %v4862_v29 = vpop.permute.xlu2 %1180 }
 0x11e   : > { %1396 = vrot.lane.b32.xlu1 %v4537_v51, %s3966_s27  ;;  %v4839_v39 = vpop.permute.xlu0 %1201  ;;  %6934 = vst [vmem:[#allocation98_spill] sm:$0xff] %v4862_v29 }
 0x11f   : > { %v4841_v15 = vpop.permute.xlu1 %1168 }
 0x120   : > { %6931 = vst [vmem:[#allocation95_spill] sm:$0xff] %v4841_v15  ;;  %507 = vmatmul.f32.gmra.mxu3 %v4846_v54  ;;  %v4860_v15 = vpop.f32.mrf.mxu1 }
 0x125   : > { %1416 = vrot.lane.b32.xlu2 %v4447_v7, %s3966_s27  ;;  %824 = vperm.xlu0 %3831, %v4362_v21   ;;  %v4876_v36 = vpop.permute.xlu2 %1189 }
 0x126   : > { %1402 = vrot.lane.b32.xlu1 %v4631_v47, %s3966_s27  ;;  %v4854_v59 = vpop.permute.xlu0 %1210  ;;  %v4872_v47 = vpop.f32.mrf.mxu0  ;;  %6937 = vst [vmem:[#allocation101_spill] sm:$0xff] %v4876_v36 }
 0x127   : > { %v4856_v51 = vpop.permute.xlu1 %1177 }
 0x128   : > { %6933 = vst [vmem:[#allocation97_spill] sm:$0xff] %v4856_v51  ;;  %v4874_v51 = vpop.f32.mrf.mxu1 }
 0x12d   : > { %1422 = vrot.lane.b32.xlu2 %v4541_v22, %s3966_s27  ;;  %833 = vperm.xlu0 %3831, %v4391_v4  }
 0x12e   : > { %1408 = vrot.lane.b32.xlu1 %v252_v45, %s3966_s27  ;;  %v4887_v45 = vpop.f32.mrf.mxu0 }
 0x12f   : > { %v4868_v7 = vpop.permute.xlu0 %707 }
 0x130   : > { %6935 = vst [vmem:[#allocation99_spill] sm:$0xff] %v4868_v7  ;;  %v4870_v21 = vpop.permute.xlu1 %1186  ;;  %v4889_v7 = vpop.f32.mrf.mxu1 }
 0x131   : > { %6936 = vst [vmem:[#allocation100_spill] sm:$0xff] %v4870_v21  ;;  %v4894_v21 = vpop.permute.xlu2 %1198 }
 0x132   : > { %6940 = vst [vmem:[#allocation104_spill] sm:$0xff] %v4894_v21 }
 0x135   : > { %1428 = vrot.lane.b32.xlu2 %v4635_v17, %s3966_s27  ;;  %842 = vperm.xlu0 %3831, %v4422_v32  }
 0x136   : > { %1414 = vrot.lane.b32.xlu1 %v4414_v61, %s3966_s27  ;;  %v4905_v32 = vpop.f32.mrf.mxu0 }
 0x137   : > { %v4883_v4 = vpop.permute.xlu0 %710 }
 0x138   : > { %6938 = vst [vmem:[#allocation102_spill] sm:$0xff] %v4883_v4  ;;  %v4885_v22 = vpop.permute.xlu1 %1195 }
 0x139   : > { %6939 = vst [vmem:[#allocation103_spill] sm:$0xff] %v4885_v22  ;;  %v4913_v22 = vpop.permute.xlu2 %1207 }
 0x13a   : > { %6944 = vst [vmem:[#allocation108_spill] sm:$0xff] %v4913_v22 }
 0x13d   : > { %1434 = vrot.lane.b32.xlu2 %v4704_v53, %s3966_s27  ;;  %851 = vperm.xlu0 %3831, %v4455_v56   ;;  %v4909_v53 = vpop.f32.mrf.mxu1 }
 0x13e   : > { %1420 = vrot.lane.b32.xlu1 %v4513_v38, %s3966_s27 }
 0x13f   : > { %v4898_v17 = vpop.permute.xlu0 %725 }
 0x140   : > { %6941 = vst [vmem:[#allocation105_spill] sm:$0xff] %v4898_v17  ;;  %v4900_v61 = vpop.permute.xlu1 %1204 }
 0x141   : > { %6942 = vst [vmem:[#allocation106_spill] sm:$0xff] %v4900_v61  ;;  %v4924_v17 = vpop.permute.xlu2 %1216 }
 0x142   : > { %6947 = vst [vmem:[#allocation111_spill] sm:$0xff] %v4924_v17 }
 0x145   : > { %1440 = vrot.lane.b32.xlu2 %v4762_v6, %s3966_s27  ;;  %860 = vperm.xlu0 %3831, %v4488_v20   ;;  %v4926_v61 = vpop.f32.mrf.mxu1 }
 0x146   : > { %1426 = vrot.lane.b32.xlu1 %v4607_v19, %s3966_s27  ;;  %v343_v19 = vpop.f32.mrf.mxu0 }
 0x147   : > { %v4911_v56 = vpop.permute.xlu0 %734 }
 0x148   : > { %6943 = vst [vmem:[#allocation107_spill] sm:$0xff] %v4911_v56  ;;  %v4915_v38 = vpop.permute.xlu1 %1213 }
 0x149   : > { %6945 = vst [vmem:[#allocation109_spill] sm:$0xff] %v4915_v38 }
 0x14d   : > { %1446 = vrot.lane.b32.xlu2 %v4610_v58, %s3966_s27  ;;  %869 = vperm.xlu0 %3831, %v4521_v2   ;;  %v4941_v17 = vpop.f32.mrf.mxu1 }
 0x14e   : > { %1432 = vrot.lane.b32.xlu1 %v4681_v27, %s3966_s27  ;;  %v4935_v27 = vpop.f32.mrf.mxu2  ;;  %v4937_v38 = vpop.f32.mrf.mxu0 }
 0x14f   : > { %v4922_v20 = vpop.permute.xlu0 %743  ;;  %6949 = vst [vmem:[#allocation113_spill] sm:$0xff] %v4935_v27 }
 0x150   : > { %6946 = vst [vmem:[#allocation110_spill] sm:$0xff] %v4922_v20  ;;  %v1349_v6 = vpop.permute.xlu1 %1348  ;;  %v4939_v20 = vpop.permute.xlu2 %1350 }
 0x155   : > { %1452 = vrot.lane.b32.xlu2 %v4684_v55, %s3966_s27  ;;  %878 = vperm.xlu0 %3831, %v4554_v49  }
 0x156   : > { %1438 = vrot.lane.b32.xlu1 %v4743_v16, %s3966_s27  ;;  %v4950_v16 = vpop.f32.mrf.mxu2 }
 0x157   : > { %v4933_v58 = vpop.permute.xlu0 %752 }
 0x158   : > { %6948 = vst [vmem:[#allocation112_spill] sm:$0xff] %v4933_v58  ;;  %v1355_v2 = vpop.permute.xlu1 %1354  ;;  %v4952_v58 = vpop.f32.mrf.mxu0 }
 0x159   : > { %v4958_v56 = vpop.permute.xlu2 %1356 }
 0x15d   : > { %1458 = vrot.lane.b32.xlu2 %v4746_v43, %s3966_s27  ;;  %887 = vperm.xlu0 %3831, %v4584_v34   ;;  %v4960_v43 = vpop.f32.mrf.mxu1 }
 0x15e   : > { %1444 = vrot.lane.b32.xlu1 %v4579_v28, %s3966_s27 }
 0x15f   : > { %v4948_v49 = vpop.permute.xlu0 %761 }
 0x160   : > { %6950 = vst [vmem:[#allocation114_spill] sm:$0xff] %v4948_v49  ;;  %v1361_v55 = vpop.permute.xlu1 %1360 }
 0x165   : > { %1464 = vrot.lane.b32.xlu2 %v4795_v46, %s3966_s27  ;;  %1346 = vrot.lane.b32.xlu0 %v4162_v41, %s3966_s27  ;;  %v4970_v46 = vpop.f32.mrf.mxu2  ;;  %v352_v41 = vpop.f32.mrf.mxu0 }
 0x166   : > { %1450 = vrot.lane.b32.xlu1 %v4665_v26, %s3966_s27  ;;  %v4979_v26 = vld [vmem:[%s6742_s3] ss:$0 sm:$0xff]  ;;  %v4983_v4 = vpop.f32.mrf.mxu1 }
 0x167   : > { %v4964_v28 = vpop.permute.xlu0 %770  ;;  %v5000_v22 = vadd.f32 %v4979_v26, %v4872_v47  ;;  %v5020_v47 = vadd.f32 %v4979_v26, %v343_v19  ;;  %v5036_v19 = vadd.f32 %v4979_v26, %v352_v41 }
 0x168   : > { %6951 = vst [vmem:[#allocation115_spill] sm:$0xff] %v4964_v28  ;;  %v1367_v34 = vpop.permute.xlu1 %1366  ;;  %v4981_v28 = vpop.permute.xlu2 %1362 }
 0x169   : > { %6955 = vst [vmem:[#allocation119_spill] sm:$0xff] %v5000_v22 }
 0x16a   : > { %6958 = vst [vmem:[#allocation122_spill] sm:$0xff] %v5020_v47 }
 0x16b   : > { %6960 = vst [vmem:[#allocation124_spill] sm:$0xff] %v5036_v19 }
 0x16d   : > { %1470 = vrot.lane.b32.xlu2 %v4846_v54, %s3966_s27  ;;  %1352 = vrot.lane.b32.xlu0 %v4219_v62, %s3966_s27  ;;  %v4987_v62 = vadd.f32 %v4979_v26, %v4815_v9  ;;  %v5002_v9 = vpop.f32.mrf.mxu2  ;;  %v5004_v21 = vpop.f32.mrf.mxu0 }
 0x16e   : > { %1456 = vrot.lane.b32.xlu1 %v4727_v14, %s3966_s27  ;;  %6956 = vst [vmem:[#allocation120_spill] sm:$0xff] %v5002_v9  ;;  %v5042_v9 = vpop.f32.mrf.mxu3 }
 0x16f   : > { %v4974_v49 = vpop.permute.xlu0 %779  ;;  %6953 = vst [vmem:[#allocation117_spill] sm:$0xff] %v4987_v62  ;;  %v1539_v14 = vsel %vm1219_vm0, %v4987_v62, %v1349_v6  ;;  %v5008_v6 = vpop.f32.mrf.mxu1  ;;  %vm1261_vm0 = vcmp.eq.s32.totalorder %v4755_v44, 1 }
 0x170   : > { %6952 = vst [vmem:[#allocation116_spill] sm:$0xff] %v4974_v49  ;;  %v1373_v54 = vpop.permute.xlu1 %1372  ;;  %v5006_v12 = vpop.permute.xlu2 %1368 }
 0x171   : > { %6961 = vst [vmem:[#allocation125_spill] sm:$0xff] %v5042_v9  ;;  %v6980_v9 = vld [vmem:[#allocation65_spill] sm:$0xff] }
 0x172   : > { %vm1240_vm7 = vcmp.eq.s32.totalorder %v6980_v9, 1 }
 0x175   : > { %1668 = vrot.lane.b32.xlu2 %v1539_v14, %s3966_s27  ;;  %1358 = vrot.lane.b32.xlu0 %v4276_v23, %s3966_s27  ;;  %v1542_v14 = vsel %vm1222_vm1, %v5000_v22, %v1355_v2  ;;  %v5025_v3 = vpop.f32.mrf.mxu0  ;;  %v1545_v22 = vsel %vm1225_vm2, %v5020_v47, %v1361_v55  ;;  %v6966_v47 = vld [vmem:[#allocation47_spill] sm:$0xff]  ;;  %vm1264_vm2 = vcmp.eq.s32.totalorder %v4774_v0, 1 }
 0x176   : > { %1462 = vrot.lane.b32.xlu1 %v4780_v57, %s3966_s27  ;;  %vm1231_vm4 = vcmp.eq.s32.totalorder %v6966_v47, 1 }
 0x177   : > { %v4996_v49 = vpop.permute.xlu0 %788 }
 0x178   : > { %6954 = vst [vmem:[#allocation118_spill] sm:$0xff] %v4996_v49  ;;  %v1379_v23 = vpop.permute.xlu1 %1378  ;;  %v5022_v49 = vpop.f32.mrf.mxu2 }
 0x179   : > { %v5027_v2 = vpop.permute.xlu2 %1374 }
 0x17d   : > { %1674 = vrot.lane.b32.xlu2 %v1542_v14, %s3966_s27  ;;  %1364 = vrot.lane.b32.xlu0 %v4345_v5, %s3966_s27  ;;  %v397_v14 = vpop.f32.mrf.mxu1  ;;  %v361_v62 = vpop.f32.mrf.mxu0 }
 0x17e   : > { %1468 = vrot.lane.b32.xlu1 %v4829_v24, %s3966_s27  ;;  %v5054_v40 = vadd.f32 %v4979_v26, %v361_v62 }
 0x17f   : > { %v5017_v57 = vpop.permute.xlu0 %797 }
 0x180   : > { %6957 = vst [vmem:[#allocation121_spill] sm:$0xff] %v5017_v57  ;;  %v1385_v5 = vpop.permute.xlu1 %1384  ;;  %v5039_v42 = vpop.f32.mrf.mxu2  ;;  %v1548_v57 = vsel %vm1228_vm3, %v5036_v19, %v1367_v34  ;;  %v1551_v34 = vsel %vm1231_vm4, %v5054_v40, %v1373_v54  ;;  %vm1267_vm4 = vcmp.eq.s32.totalorder %v4790_v33, 1 }
 0x181   : > { %6965 = vst [vmem:[#allocation127_spill] sm:$0xff] %v5054_v40  ;;  %v5063_v19 = vpop.f32.mrf.mxu3  ;;  %v6971_v40 = vld [vmem:[#allocation53_spill] sm:$0xff] }
 0x182   : > { %vm1234_vm5 = vcmp.eq.s32.totalorder %v6971_v40, 1  ;;  %v6976_v40 = vld [vmem:[#allocation59_spill] sm:$0xff] }
 0x183   : > { %vm1237_vm6 = vcmp.eq.s32.totalorder %v6976_v40, 1 }
 0x185   : > { %1680 = vrot.lane.b32.xlu2 %v1545_v22, %s3966_s27  ;;  %1370 = vrot.lane.b32.xlu0 %v4440_v25, %s3966_s27  ;;  %v6962_v22 = vld [vmem:[#allocation61_spill] sm:$0xff]  ;;  %v5047_v25 = vpop.permute.xlu2 %1380  ;;  %v5049_v55 = vpop.f32.mrf.mxu1 }
 0x186   : > { %6963 = vst [vmem:[#allocation61_spill] sm:$0xff] %v5049_v55 }
 0x187   : > { %v5033_v24 = vpop.permute.xlu0 %806 }
 0x188   : > { %6959 = vst [vmem:[#allocation123_spill] sm:$0xff] %v5033_v24  ;;  %v1391_v41 = vpop.permute.xlu1 %1390 }
 0x189   : > { %v5088_v27 = vpop.f32.mrf.mxu3 }
 0x18a   : > { %6975 = vst [vmem:[#allocation129_spill] sm:$0xff] %v5088_v27 }
 0x18d   : > { %1686 = vrot.lane.b32.xlu2 %v1548_v57, %s3966_s27  ;;  %1376 = vrot.lane.b32.xlu0 %v6962_v22, %s3966_s27  ;;  %v6967_v57 = vld [vmem:[#allocation25_spill] sm:$0xff]  ;;  %v5061_v22 = vpop.f32.mrf.mxu2  ;;  %v5071_v62 = vpop.permute.xlu2 %1386 }
 0x18e   : > { %6968 = vst [vmem:[#allocation47_spill] sm:$0xff] %v5061_v22  ;;  %v5073_v47 = vpop.f32.mrf.mxu1 }
 0x18f   : > { %v5051_v24 = vpop.permute.xlu0 %815 }
 0x190   : > { %6964 = vst [vmem:[#allocation126_spill] sm:$0xff] %v5051_v24  ;;  %v5069_v24 = vadd.f32 %v4979_v26, %v4860_v15  ;;  %v1397_v54 = vpop.permute.xlu1 %1396  ;;  %v5084_v15 = vadd.f32 %v4979_v26, %v4909_v53  ;;  %v5101_v53 = vadd.f32 %v4979_v26, %v4960_v43  ;;  %v5117_v43 = vadd.f32 %v4979_v26, %v397_v14 }
 0x191   : > { %v5104_v55 = vpop.f32.mrf.mxu3 }
 0x192   : > { %6970 = vst [vmem:[#allocation128_spill] sm:$0xff] %v5069_v24 }
 0x193   : > { %6981 = vst [vmem:[#allocation65_spill] sm:$0xff] %v5104_v55  ;;  %v1563_v55 = vsel %vm1243_vm8, %v5117_v43, %v1397_v54  ;;  %vm1273_vm8 = vcmp.eq.s32.totalorder %v4824_v11, 1 }
 0x194   : > { %6984 = vst [vmem:[#allocation130_spill] sm:$0xff] %v5117_v43 }
 0x195   : > { %1692 = vrot.lane.b32.xlu2 %v1551_v34, %s3966_s27  ;;  %1382 = vrot.lane.b32.xlu0 %v6967_v57, %s3966_s27  ;;  %v1554_v34 = vsel %vm1234_vm5, %v5069_v24, %v1379_v23  ;;  %v6972_v57 = vld [vmem:[#allocation35_spill] sm:$0xff]  ;;  %v5090_v29 = vpop.permute.xlu2 %1392 }
 0x196   : > { %6974 = vst [vmem:[#allocation35_spill] sm:$0xff] %v5084_v15  ;;  %v406_v23 = vpop.f32.mrf.mxu1 }
 0x197   : > { %v5065_v36 = vpop.permute.xlu0 %824  ;;  %v5135_v60 = vadd.f32 %v4979_v26, %v406_v23 }
 0x198   : > { %6969 = vst [vmem:[#allocation25_spill] sm:$0xff] %v5065_v36  ;;  %v5086_v36 = vpop.f32.mrf.mxu2  ;;  %v1403_v24 = vpop.permute.xlu1 %1402 }
 0x199   : > { %6988 = vst [vmem:[#allocation134_spill] sm:$0xff] %v5135_v60 }
 0x19d   : > { %1698 = vrot.lane.b32.xlu2 %v1554_v34, %s3966_s27  ;;  %1388 = vrot.lane.b32.xlu0 %v6972_v57, %s3966_s27  ;;  %v1557_v34 = vsel %vm1237_vm6, %v5084_v15, %v1385_v5  ;;  %v6977_v57 = vld [vmem:[#allocation49_spill] sm:$0xff]  ;;  %v5106_v40 = vpop.permute.xlu2 %1398  ;;  %v1560_v5 = vsel %vm1240_vm7, %v5101_v53, %v1391_v41  ;;  %v5123_v41 = vpop.f32.mrf.mxu3  ;;  %vm1270_vm6 = vcmp.eq.s32.totalorder %v4807_v18, 1 }
 0x19e   : > { %6979 = vst [vmem:[#allocation49_spill] sm:$0xff] %v5101_v53  ;;  %v5109_v15 = vpop.f32.mrf.mxu1  ;;  %v5276_v33 = vadd.f32 %v4979_v26, %v5123_v41 }
 0x19f   : > { %v5080_v22 = vpop.permute.xlu0 %833 }
 0x1a0   : > { %6973 = vst [vmem:[#allocation53_spill] sm:$0xff] %v5080_v22  ;;  %v442_v27 = vpop.f32.mrf.mxu2 }
 0x1a1   : > { %v5196_v48 = vadd.f32 %v4979_v26, %v442_v27  ;;  %v5215_v27 = vadd.f32 %v4979_v26, %v4858_v13  ;;  %v7006_v13 = vld [vmem:[#allocation55_spill] sm:$0xff] }
 0x1a5   : > { %1704 = vrot.lane.b32.xlu2 %v1557_v34, %s3966_s27  ;;  %1394 = vrot.lane.b32.xlu0 %v6977_v57, %s3966_s27  ;;  %v1409_v34 = vpop.permute.xlu1 %1408  ;;  %v6982_v57 = vld [vmem:[#allocation67_spill] sm:$0xff] }
 0x1a6   : > { %v5125_v53 = vpop.f32.mrf.mxu1 }
 0x1a7   : > { %v5097_v22 = vpop.permute.xlu0 %842 }
 0x1a8   : > { %6978 = vst [vmem:[#allocation59_spill] sm:$0xff] %v5097_v22  ;;  %v5120_v9 = vpop.f32.mrf.mxu2 }
 0x1a9   : > { %6985 = vst [vmem:[#allocation131_spill] sm:$0xff] %v5120_v9 }
 0x1ad   : > { %1710 = vrot.lane.b32.xlu2 %v1560_v5, %s3966_s27  ;;  %1400 = vrot.lane.b32.xlu0 %v6982_v57, %s3966_s27  ;;  %v5130_v5 = vpop.permute.xlu2 %1404  ;;  %v1415_v57 = vpop.permute.xlu1 %1414 }
 0x1ae   : > { %6986 = vst [vmem:[#allocation132_spill] sm:$0xff] %v5130_v5  ;;  %v415_v43 = vpop.f32.mrf.mxu1 }
 0x1af   : > { %v5114_v22 = vpop.permute.xlu0 %851  ;;  %v5151_v23 = vadd.f32 %v4979_v26, %v415_v43 }
 0x1b0   : > { %6983 = vst [vmem:[#allocation67_spill] sm:$0xff] %v5114_v22  ;;  %v6989_v22 = vld [vmem:[#allocation74_spill] sm:$0xff]  ;;  %v5142_v9 = vpop.f32.mrf.mxu2 }
 0x1b1   : > { %vm1246_vm9 = vcmp.eq.s32.totalorder %v6989_v22, 1  ;;  %6993 = vst [vmem:[#allocation135_spill] sm:$0xff] %v5151_v23 }
 0x1b2   : > { %v1566_v54 = vsel %vm1246_vm9, %v5135_v60, %v1403_v24  ;;  %v1569_v24 = vsel %vm1249_vm10, %v5151_v23, %v1409_v34  ;;  %vm1276_vm10 = vcmp.eq.s32.totalorder %v4839_v39, 1 }
 0x1b5   : > { %1716 = vrot.lane.b32.xlu2 %v1563_v55, %s3966_s27  ;;  %1406 = vrot.lane.b32.xlu0 %v4701_v8, %s3966_s27  ;;  %v6990_v55 = vld [vmem:[#allocation30_spill] sm:$0xff]  ;;  %v5144_v8 = vpop.f32.mrf.mxu3  ;;  %v1421_v22 = vpop.permute.xlu1 %1420 }
 0x1b6   : > { %6991 = vst [vmem:[#allocation74_spill] sm:$0xff] %v5144_v8 }
 0x1b7   : > { %v5132_v14 = vpop.permute.xlu0 %860 }
 0x1b8   : > { %6987 = vst [vmem:[#allocation133_spill] sm:$0xff] %v5132_v14  ;;  %v5148_v14 = vpop.permute.xlu2 %1410  ;;  %v451_v60 = vpop.f32.mrf.mxu2 }
 0x1bd   : > { %1722 = vrot.lane.b32.xlu2 %v1566_v54, %s3966_s27  ;;  %1412 = vrot.lane.b32.xlu0 %v6990_v55, %s3966_s27  ;;  %v6994_v54 = vld [vmem:[#allocation44_spill] sm:$0xff]  ;;  %v5164_v8 = vpop.f32.mrf.mxu3  ;;  %v1427_v10 = vpop.permute.xlu1 %1426 }
 0x1bf   : > { %v5146_v5 = vpop.permute.xlu0 %869 }
 0x1c0   : > { %6992 = vst [vmem:[#allocation30_spill] sm:$0xff] %v5146_v5  ;;  %v5162_v5 = vadd.f32 %v4979_v26, %v4970_v46  ;;  %v5166_v43 = vpop.permute.xlu2 %1416  ;;  %v5177_v46 = vadd.f32 %v4979_v26, %v5039_v42  ;;  %v5192_v42 = vadd.f32 %v4979_v26, %v4797_v37  ;;  %v1578_v37 = vsel %vm1258_vm14, %v5196_v48, %v1427_v10 }
 0x1c2   : > { %6996 = vst [vmem:[#allocation136_spill] sm:$0xff] %v5162_v5  ;;  %v1572_v34 = vsel %vm1252_vm11, %v5162_v5, %v1415_v57  ;;  %v1575_v57 = vsel %vm1255_vm12, %v5177_v46, %v1421_v22  ;;  %v5201_v22 = vld [vmem:[%s4151_s9 + $0x1f8] sm:$0xff] }
 0x1c3   : > { %6999 = vst [vmem:[#allocation137_spill] sm:$0xff] %v5177_v46  ;;  %510 = vmatmul.f32.gmra.mxu3 %v5201_v22  ;;  %v5221_v46 = vadd.f32 %v4979_v26, %v451_v60  ;;  %v7007_v60 = vld [vmem:[#allocation38_spill] sm:$0xff] }
 0x1c4   : > { %vm1224_vm1 = vcmp.eq.s32.totalorder %v7007_v60, 1  ;;  %v7010_v60 = vld [vmem:[#allocation42_spill] sm:$0xff]  ;;  %7013 = vst [vmem:[#allocation38_spill] sm:$0xff] %v5276_v33 }
 0x1c5   : > { %1728 = vrot.lane.b32.xlu2 %v1569_v24, %s3966_s27  ;;  %1418 = vrot.lane.b32.xlu0 %v6994_v54, %s3966_s27  ;;  %v6997_v24 = vld [vmem:[#allocation62_spill] sm:$0xff]  ;;  %v5182_v35 = vpop.f32.mrf.mxu3  ;;  %vm1227_vm3 = vcmp.eq.s32.totalorder %v7010_v60, 1 }
 0x1c6   : > { %v5295_v18 = vadd.f32 %v4979_v26, %v5182_v35 }
 0x1c7   : > { %v5158_v55 = vpop.permute.xlu0 %878 }
 0x1c8   : > { %6995 = vst [vmem:[#allocation44_spill] sm:$0xff] %v5158_v55  ;;  %v5179_v55 = vpop.f32.mrf.mxu2  ;;  %v5184_v23 = vpop.permute.xlu2 %1422 }
 0x1c9   : > { %7000 = vst [vmem:[#allocation138_spill] sm:$0xff] %v5179_v55 }
 0x1cd   : > { %1734 = vrot.lane.b32.xlu2 %v1572_v34, %s3966_s27  ;;  %1424 = vrot.lane.b32.xlu0 %v6997_v24, %s3966_s27  ;;  %v1433_v34 = vpop.permute.xlu1 %1432  ;;  %v7001_v24 = vld [vmem:[#allocation77_spill] sm:$0xff] }
 0x1ce   : > { %7003 = vst [vmem:[#allocation77_spill] sm:$0xff] %v5196_v48 }
 0x1cf   : > { %v5173_v54 = vpop.permute.xlu0 %887 }
 0x1d0   : > { %6998 = vst [vmem:[#allocation62_spill] sm:$0xff] %v5173_v54  ;;  %v7002_v54 = vld [vmem:[#allocation43_spill] sm:$0xff] }
 0x1d1   : > { %vm1218_vm13 = vcmp.eq.s32.totalorder %v7002_v54, 1  ;;  %7005 = vst [vmem:[#allocation43_spill] sm:$0xff] %v5221_v46 }
 0x1d5   : > { %1740 = vrot.lane.b32.xlu2 %v1575_v57, %s3966_s27  ;;  %1430 = vrot.lane.b32.xlu0 %v7001_v24, %s3966_s27  ;;  %v5205_v57 = vpop.f32.mrf.mxu2  ;;  %v5208_v24 = vpop.f32.mrf.mxu3 }
 0x1d6   : > { %v1439_v50 = vpop.permute.xlu1 %1438 }
 0x1d7   : > { %v1347_v5 = vpop.permute.xlu0 %1346 }
 0x1d8   : > { %v1538_v55 = vsel %vm1218_vm13, %v5192_v42, %v1347_v5  ;;  %v5217_v5 = vpop.permute.xlu2 %1428  ;;  %vm1279_vm13 = vcmp.eq.s32.totalorder %v4854_v59, 1 }
 0x1d9   : > { %1666 = vrot.lane.b32.xlu1 %v1538_v55, %s3966_s27  ;;  %v7004_v55 = vld [vmem:[#allocation48_spill] sm:$0xff] }
 0x1da   : > { %vm1221_vm15 = vcmp.eq.s32.totalorder %v7004_v55, 1 }
 0x1dd   : > { %1746 = vrot.lane.b32.xlu2 %v1578_v37, %s3966_s27  ;;  %1436 = vrot.lane.b32.xlu0 %v4724_v52, %s3966_s27  ;;  %v1581_v52 = vsel %vm1261_vm0, %v5221_v46, %v1433_v34  ;;  %v5232_v37 = vadd.f32 %v4979_v26, %v4905_v32  ;;  %v460_v55 = vpop.f32.mrf.mxu2  ;;  %v5235_v48 = vpop.f32.mrf.mxu3 }
 0x1df   : > { %v1353_v54 = vpop.permute.xlu0 %1352 }
 0x1e0   : > { %v1541_v10 = vsel %vm1221_vm15, %v5215_v27, %v1353_v54  ;;  %v5240_v44 = vpop.permute.xlu2 %1434 }
 0x1e1   : > { %1672 = vrot.lane.b32.xlu1 %v1541_v10, %s3966_s27  ;;  %v5238_v10 = vadd.f32 %v4979_v26, %v460_v55  ;;  %v5251_v55 = vadd.f32 %v4979_v26, %v4952_v58 }
 0x1e3   : > { %7008 = vst [vmem:[#allocation48_spill] sm:$0xff] %v5238_v10  ;;  %v1584_v32 = vsel %vm1264_vm2, %v5238_v10, %v1439_v50 }
 0x1e5   : > { %1752 = vrot.lane.b32.xlu2 %v1581_v52, %s3966_s27  ;;  %1442 = vrot.lane.b32.xlu0 %v7006_v13, %s3966_s27  ;;  %v1445_v52 = vpop.permute.xlu1 %1444  ;;  %v7009_v13 = vld [vmem:[#allocation72_spill] sm:$0xff] }
 0x1e6   : > { %7015 = vst [vmem:[#allocation72_spill] sm:$0xff] %v5295_v18 }
 0x1e7   : > { %v1359_v54 = vpop.permute.xlu0 %1358 }
 0x1e8   : > { %v1544_v34 = vsel %vm1224_vm1, %v5232_v37, %v1359_v54  ;;  %v5256_v54 = vadd.f32 %v4979_v26, %v5063_v19  ;;  %v5260_v50 = vpop.permute.xlu2 %1440  ;;  %v5271_v19 = vadd.f32 %v4979_v26, %v5025_v3 }
 0x1e9   : > { %1678 = vrot.lane.b32.xlu1 %v1544_v34, %s3966_s27  ;;  %v496_v34 = vpop.f32.mrf.mxu3 }
 0x1ea   : > { %7011 = vst [vmem:[#allocation55_spill] sm:$0xff] %v5256_v54  ;;  %v5314_v11 = vadd.f32 %v4979_v26, %v496_v34 }
 0x1ec   : > { %7017 = vst [vmem:[#allocation42_spill] sm:$0xff] %v5314_v11 }
 0x1ed   : > { %1758 = vrot.lane.b32.xlu2 %v1584_v32, %s3966_s27  ;;  %1448 = vrot.lane.b32.xlu0 %v7009_v13, %s3966_s27  ;;  %v5263_v32 = vpop.f32.mrf.mxu0  ;;  %v1451_v58 = vpop.permute.xlu1 %1450  ;;  %v1587_v13 = vsel %vm1267_vm4, %v5256_v54, %v1445_v52 }
 0x1ee   : > { %v1590_v3 = vsel %vm1270_vm6, %v5276_v33, %v1451_v58  ;;  %v7082_v33 = vld [vmem:[#allocation103_spill] sm:$0xff] }
 0x1ef   : > { %v1365_v46 = vpop.permute.xlu0 %1364 }
 0x1f0   : > { %v1547_v0 = vsel %vm1227_vm3, %v5251_v55, %v1365_v46  ;;  %v7012_v46 = vld [vmem:[#allocation50_spill] sm:$0xff] }
 0x1f1   : > { %1684 = vrot.lane.b32.xlu1 %v1547_v0, %s3966_s27  ;;  %vm1230_vm5 = vcmp.eq.s32.totalorder %v7012_v46, 1  ;;  %v7014_v46 = vld [vmem:[#allocation57_spill] sm:$0xff] }
 0x1f2   : > { %vm1233_vm7 = vcmp.eq.s32.totalorder %v7014_v46, 1 }
 0x1f5   : > { %1764 = vrot.lane.b32.xlu2 %v1587_v13, %s3966_s27  ;;  %1454 = vrot.lane.b32.xlu0 %v4707_v30, %s3966_s27  ;;  %v367_v52 = vpop.f32.mrf.mxu0  ;;  %v5281_v13 = vpop.f32.mrf.mxu3 }
 0x1f6   : > { %v5283_v30 = vpop.permute.xlu2 %1446  ;;  %v1457_v54 = vpop.permute.xlu1 %1456  ;;  %v5290_v41 = vadd.f32 %v4979_v26, %v367_v52  ;;  %v7016_v52 = vld [vmem:[#allocation64_spill] sm:$0xff] }
 0x1f7   : > { %v1371_v60 = vpop.permute.xlu0 %1370  ;;  %v1593_v58 = vsel %vm1273_vm8, %v5295_v18, %v1457_v54  ;;  %vm1236_vm9 = vcmp.eq.s32.totalorder %v7016_v52, 1  ;;  %v7080_v18 = vld [vmem:[#allocation117_spill] sm:$0xff] }
 0x1f8   : > { %v1550_v0 = vsel %vm1230_vm5, %v5271_v19, %v1371_v60 }
 0x1f9   : > { %1690 = vrot.lane.b32.xlu1 %v1550_v0, %s3966_s27 }
 0x1fd   : > { %1770 = vrot.lane.b32.xlu2 %v1590_v3, %s3966_s27  ;;  %1460 = vrot.lane.b32.xlu0 %v4765_v1, %s3966_s27  ;;  %v5301_v3 = vpop.f32.mrf.mxu3  ;;  %v5308_v1 = vadd.f32 %v4979_v26, %v4889_v7  ;;  %v5325_v7 = vadd.f32 %v4979_v26, %v4941_v17  ;;  %v7020_v17 = vld [vmem:[#allocation33_spill] sm:$0xff] }
 0x1fe   : > { %v5310_v35 = vpop.permute.xlu2 %1452  ;;  %v1463_v46 = vpop.permute.xlu1 %1462  ;;  %vm1220_vm12 = vcmp.eq.s32.totalorder %v7020_v17, 1  ;;  %v7025_v17 = vld [vmem:[#allocation80_spill] sm:$0xff] }
 0x1ff   : > { %v1377_v60 = vpop.permute.xlu0 %1376  ;;  %vm1245_vm0 = vcmp.eq.s32.totalorder %v7025_v17, 1 }
 0x200   : > { %v1553_v0 = vsel %vm1233_vm7, %v5290_v41, %v1377_v60 }
 0x201   : > { %1696 = vrot.lane.b32.xlu1 %v1553_v0, %s3966_s27  ;;  %v7018_v0 = vld [vmem:[#allocation70_spill] sm:$0xff] }
 0x202   : > { %vm1239_vm11 = vcmp.eq.s32.totalorder %v7018_v0, 1  ;;  %v5348_v0 = vadd.f32 %v4979_v26, %v5008_v6  ;;  %v5365_v6 = vadd.f32 %v4979_v26, %v5073_v47  ;;  %v5382_v47 = vadd.f32 %v4979_v26, %v5125_v53 }
 0x203   : > { %v5397_v53 = vadd.f32 %v4979_v26, %v4950_v16  ;;  %v5414_v16 = vadd.f32 %v4979_v26, %v5022_v49  ;;  %v5431_v49 = vadd.f32 %v4979_v26, %v5086_v36  ;;  %v5448_v36 = vadd.f32 %v4979_v26, %v5142_v9 }
 0x204   : > { %7021 = vst [vmem:[#allocation57_spill] sm:$0xff] %v5348_v0  ;;  %v5465_v9 = vadd.f32 %v4979_v26, %v5205_v57  ;;  %v7046_v57 = vld [vmem:[#allocation125_spill] sm:$0xff] }
 0x205   : > { %1776 = vrot.lane.b32.xlu2 %v1593_v58, %s3966_s27  ;;  %1466 = vrot.lane.b32.xlu0 %v4812_v31, %s3966_s27  ;;  %v1596_v31 = vsel %vm1276_vm10, %v5314_v11, %v1463_v46  ;;  %v505_v34 = vpop.f32.mrf.mxu3  ;;  %7024 = vst [vmem:[#allocation64_spill] sm:$0xff] %v5365_v6 }
 0x206   : > { %v5328_v52 = vpop.permute.xlu2 %1458  ;;  %v1469_v46 = vpop.permute.xlu1 %1468  ;;  %7027 = vst [vmem:[#allocation70_spill] sm:$0xff] %v5382_v47 }
 0x207   : > { %v1383_v60 = vpop.permute.xlu0 %1382  ;;  %7030 = vst [vmem:[#allocation33_spill] sm:$0xff] %v5397_v53 }
 0x208   : > { %v1556_v54 = vsel %vm1236_vm9, %v5308_v1, %v1383_v60  ;;  %v5331_v60 = vadd.f32 %v4979_v26, %v505_v34  ;;  %v7022_v34 = vld [vmem:[#allocation76_spill] sm:$0xff]  ;;  %7039 = vst [vmem:[#allocation80_spill] sm:$0xff] %v5448_v36 }
 0x209   : > { %1702 = vrot.lane.b32.xlu1 %v1556_v54, %s3966_s27  ;;  %vm1242_vm14 = vcmp.eq.s32.totalorder %v7022_v34, 1  ;;  %v7026_v34 = vld [vmem:[#allocation60_spill] sm:$0xff]  ;;  %7033 = vst [vmem:[#allocation76_spill] sm:$0xff] %v5414_v16 }
 0x20a   : > { %7019 = vst [vmem:[#allocation50_spill] sm:$0xff] %v5331_v60  ;;  %vm1226_vm1 = vcmp.eq.s32.totalorder %v7026_v34, 1  ;;  %v5404_v34 = vadd.f32 %v4979_v26, %v5263_v32  ;;  %v5419_v32 = vadd.f32 %v4979_v26, %v4874_v51 }
 0x20b   : > { %7042 = vst [vmem:[#allocation60_spill] sm:$0xff] %v5465_v9 }
 0x20d   : > { %1782 = vrot.lane.b32.xlu2 %v1596_v31, %s3966_s27  ;;  %1472 = vrot.lane.b32.xlu0 %v5201_v22, %s3966_s27  ;;  %v5337_v22 = vadd.f32 %v4979_v26, %v4835_v63  ;;  %v1599_v31 = vsel %vm1279_vm13, %v5331_v60, %v1469_v46 }
 0x20f   : > { %v1389_v58 = vpop.permute.xlu0 %1388  ;;  %v1540_v54 = vsel %vm1220_vm12, %v5337_v22, %v4939_v20  ;;  %v5357_v20 = vpop.permute.xlu2 %1464 }
 0x210   : > { %v1559_v39 = vsel %vm1239_vm11, %v5325_v7, %v1389_v58  ;;  %v5353_v58 = vadd.f32 %v4979_v26, %v4887_v45 }
 0x211   : > { %1708 = vrot.lane.b32.xlu1 %v1559_v39, %s3966_s27  ;;  %v7023_v39 = vld [vmem:[#allocation54_spill] sm:$0xff] }
 0x212   : > { %vm1223_vm15 = vcmp.eq.s32.totalorder %v7023_v39, 1  ;;  %v5387_v39 = vadd.f32 %v4979_v26, %v5004_v21  ;;  %7036 = vst [vmem:[#allocation54_spill] sm:$0xff] %v5431_v49 }
 0x213   : > { %v1543_v46 = vsel %vm1223_vm15, %v5353_v58, %v4958_v56 }
 0x215   : > { %1788 = vrot.lane.b32.xlu2 %v1599_v31, %s3966_s27  ;;  %1670 = vrot.lane.b32.xlu0 %v1540_v54, %s3966_s27  ;;  %v5370_v54 = vadd.f32 %v4979_v26, %v4937_v38 }
 0x217   : > { %v1395_v63 = vpop.permute.xlu0 %1394  ;;  %v1546_v56 = vsel %vm1226_vm1, %v5370_v54, %v4981_v28  ;;  %v7029_v28 = vld [vmem:[#allocation66_spill] sm:$0xff] }
 0x218   : > { %v1562_v59 = vsel %vm1242_vm14, %v5348_v0, %v1395_v63  ;;  %v5377_v63 = vpop.permute.xlu2 %1470  ;;  %vm1229_vm3 = vcmp.eq.s32.totalorder %v7029_v28, 1 }
 0x219   : > { %1714 = vrot.lane.b32.xlu1 %v1562_v59, %s3966_s27  ;;  %v7028_v59 = vld [vmem:[#allocation82_spill] sm:$0xff]  ;;  %v1549_v17 = vsel %vm1229_vm3, %v5387_v39, %v5006_v12  ;;  %v7032_v12 = vld [vmem:[#allocation71_spill] sm:$0xff] }
 0x21a   : > { %vm1248_vm2 = vcmp.eq.s32.totalorder %v7028_v59, 1  ;;  %vm1232_vm5 = vcmp.eq.s32.totalorder %v7032_v12, 1 }
 0x21b   : > { %v1552_v59 = vsel %vm1232_vm5, %v5404_v34, %v5027_v2  ;;  %v7035_v2 = vld [vmem:[#allocation75_spill] sm:$0xff] }
 0x21c   : > { %vm1235_vm7 = vcmp.eq.s32.totalorder %v7035_v2, 1 }
 0x21d   : > { %1676 = vrot.lane.b32.xlu0 %v1543_v46, %s3966_s27 }
 0x21f   : > { %v1401_v45 = vpop.permute.xlu0 %1400 }
 0x220   : > { %v1565_v31 = vsel %vm1245_vm0, %v5365_v6, %v1401_v45  ;;  %v5399_v45 = vpop.permute.xlu2 %1668  ;;  %v7097_v6 = vld [vmem:[#allocation20_spill] sm:$0xff] }
 0x221   : > { %1720 = vrot.lane.b32.xlu1 %v1565_v31, %s3966_s27  ;;  %v7031_v31 = vld [vmem:[#allocation84_spill] sm:$0xff] }
 0x222   : > { %vm1251_vm4 = vcmp.eq.s32.totalorder %v7031_v31, 1  ;;  %v1555_v31 = vsel %vm1235_vm7, %v5419_v32, %v5047_v25  ;;  %v7038_v25 = vld [vmem:[#allocation79_spill] sm:$0xff] }
 0x223   : > { %vm1238_vm9 = vcmp.eq.s32.totalorder %v7038_v25, 1 }
 0x225   : > { %1682 = vrot.lane.b32.xlu0 %v1546_v56, %s3966_s27 }
 0x227   : > { %v1407_v38 = vpop.permute.xlu0 %1406 }
 0x228   : > { %v1568_v46 = vsel %vm1248_vm2, %v5382_v47, %v1407_v38  ;;  %v7034_v38 = vld [vmem:[#allocation87_spill] sm:$0xff]  ;;  %v5421_v28 = vpop.permute.xlu2 %1674 }
 0x229   : > { %1726 = vrot.lane.b32.xlu1 %v1568_v46, %s3966_s27  ;;  %vm1254_vm6 = vcmp.eq.s32.totalorder %v7034_v38, 1  ;;  %v7095_v47 = vld [vmem:[#allocation99_spill] sm:$0xff] }
 0x22d   : > { %1688 = vrot.lane.b32.xlu0 %v1549_v17, %s3966_s27 }
 0x22f   : > { %v1413_v21 = vpop.permute.xlu0 %1412 }
 0x230   : > { %v1571_v56 = vsel %vm1251_vm4, %v5397_v53, %v1413_v21  ;;  %v7037_v21 = vld [vmem:[#allocation89_spill] sm:$0xff] }
 0x231   : > { %1732 = vrot.lane.b32.xlu1 %v1571_v56, %s3966_s27  ;;  %vm1257_vm8 = vcmp.eq.s32.totalorder %v7037_v21, 1  ;;  %v5436_v56 = vadd.f32 %v4979_v26, %v4926_v61 }
 0x233   : > { %v1558_v38 = vsel %vm1238_vm9, %v5436_v56, %v5071_v62 }
 0x235   : > { %1694 = vrot.lane.b32.xlu0 %v1552_v59, %s3966_s27  ;;  %v5440_v59 = vpop.permute.xlu2 %1680 }
 0x237   : > { %v1419_v46 = vpop.permute.xlu0 %1418 }
 0x238   : > { %v1574_v17 = vsel %vm1254_vm6, %v5414_v16, %v1419_v46  ;;  %v7040_v46 = vld [vmem:[#allocation91_spill] sm:$0xff]  ;;  %v5620_v16 = vadd.f32 %v4979_v26, %v5208_v24  ;;  %v5636_v24 = vadd.f32 %v4979_v26, %v5281_v13 }
 0x239   : > { %1738 = vrot.lane.b32.xlu1 %v1574_v17, %s3966_s27  ;;  %vm1260_vm10 = vcmp.eq.s32.totalorder %v7040_v46, 1  ;;  %v5453_v17 = vadd.f32 %v4979_v26, %v4983_v4 }
 0x23a   : > { %7081 = vst [vmem:[#allocation91_spill] sm:$0xff] %v5620_v16 }
 0x23d   : > { %1700 = vrot.lane.b32.xlu0 %v1555_v31, %s3966_s27  ;;  %v7041_v31 = vld [vmem:[#allocation81_spill] sm:$0xff]  ;;  %v5460_v21 = vpop.permute.xlu2 %1686 }
 0x23e   : > { %vm1241_vm11 = vcmp.eq.s32.totalorder %v7041_v31, 1  ;;  %v7048_v31 = vld [vmem:[#allocation96_spill] sm:$0xff]  ;;  %7084 = vst [vmem:[#allocation81_spill] sm:$0xff] %v5636_v24 }
 0x23f   : > { %v1425_v51 = vpop.permute.xlu0 %1424  ;;  %v1561_v62 = vsel %vm1241_vm11, %v5453_v17, %v5090_v29  ;;  %v7045_v29 = vld [vmem:[#allocation83_spill] sm:$0xff]  ;;  %vm1266_vm14 = vcmp.eq.s32.totalorder %v7048_v31, 1 }
 0x240   : > { %v1577_v12 = vsel %vm1257_vm8, %v5431_v49, %v1425_v51  ;;  %v7043_v51 = vld [vmem:[#allocation93_spill] sm:$0xff]  ;;  %vm1244_vm13 = vcmp.eq.s32.totalorder %v7045_v29, 1 }
 0x241   : > { %1744 = vrot.lane.b32.xlu1 %v1577_v12, %s3966_s27  ;;  %vm1263_vm12 = vcmp.eq.s32.totalorder %v7043_v51, 1  ;;  %v7044_v12 = vld [vmem:[#allocation61_spill] sm:$0xff]  ;;  %v5487_v51 = vadd.f32 %v4979_v26, %v5109_v15 }
 0x242   : > { %v5470_v25 = vadd.f32 %v4979_v26, %v7044_v12  ;;  %v7050_v12 = vld [vmem:[#allocation132_spill] sm:$0xff]  ;;  %v7051_v29 = vld [vmem:[#allocation65_spill] sm:$0xff] }
 0x243   : > { %v7054_v15 = vld [vmem:[#allocation113_spill] sm:$0xff] }
 0x244   : > { %v1564_v46 = vsel %vm1244_vm13, %v5470_v25, %v5106_v40  ;;  %v7049_v40 = vld [vmem:[#allocation85_spill] sm:$0xff] }
 0x245   : > { %1706 = vrot.lane.b32.xlu0 %v1558_v38, %s3966_s27  ;;  %vm1247_vm15 = vcmp.eq.s32.totalorder %v7049_v40, 1  ;;  %v7055_v40 = vld [vmem:[#allocation86_spill] sm:$0xff] }
 0x246   : > { %vm1250_vm1 = vcmp.eq.s32.totalorder %v7055_v40, 1 }
 0x247   : > { %v1431_v61 = vpop.permute.xlu0 %1430 }
 0x248   : > { %v1580_v2 = vsel %vm1260_vm10, %v5448_v36, %v1431_v61  ;;  %v5480_v61 = vadd.f32 %v4979_v26, %v7046_v57  ;;  %v7053_v57 = vld [vmem:[#allocation98_spill] sm:$0xff]  ;;  %vm1922_vm10 = vcmask 261120   ;;  %v7072_v36 = vld [vmem:[#allocation95_spill] sm:$0xff] }
 0x249   : > { %1750 = vrot.lane.b32.xlu1 %v1580_v2, %s3966_s27  ;;  %v5482_v2 = vpop.permute.xlu2 %1692  ;;  %vm1269_vm0 = vcmp.eq.s32.totalorder %v7053_v57, 1  ;;  %vm1265_vm11 = vcmp.eq.s32.totalorder %v7072_v36, 1 }
 0x24a   : > { %7047 = vst [vmem:[#allocation82_spill] sm:$0xff] %v5480_v61 }
 0x24d   : > { %1712 = vrot.lane.b32.xlu0 %v1561_v62, %s3966_s27 }
 0x24f   : > { %v1437_v4 = vpop.permute.xlu0 %1436 }
 0x250   : > { %v1583_v38 = vsel %vm1263_vm12, %v5465_v9, %v1437_v4  ;;  %v5502_v9 = vadd.f32 %v4979_v26, %v7054_v15  ;;  %v7058_v15 = vld [vmem:[#allocation120_spill] sm:$0xff] }
 0x251   : > { %1756 = vrot.lane.b32.xlu1 %v1583_v38, %s3966_s27  ;;  %v1567_v38 = vsel %vm1247_vm15, %v5487_v51, %v7050_v12  ;;  %vm1274_vm15 = vcmp.eq.s32.totalorder %v7082_v33, 1 }
 0x252   : > { %v1570_v12 = vsel %vm1250_vm1, %v5502_v9, %v5148_v14  ;;  %v7059_v14 = vld [vmem:[#allocation88_spill] sm:$0xff]  ;;  %vm898_vm1 = vcmp.eq.s32.totalorder %v7095_v47, 1  ;;  %v3838_v47 = vld [vmem:[%s4151_s9 + $0x18] sm:$0xff] }
 0x253   : > { %vm1253_vm3 = vcmp.eq.s32.totalorder %v7059_v14, 1  ;;  %v7063_v14 = vld [vmem:[#allocation90_spill] sm:$0xff] }
 0x254   : > { %vm1256_vm5 = vcmp.eq.s32.totalorder %v7063_v14, 1 }
 0x255   : > { %1718 = vrot.lane.b32.xlu0 %v1564_v46, %s3966_s27  ;;  %v5497_v46 = vadd.f32 %v4979_v26, %v7051_v29  ;;  %v7057_v29 = vld [vmem:[#allocation101_spill] sm:$0xff] }
 0x256   : > { %vm1272_vm2 = vcmp.eq.s32.totalorder %v7057_v29, 1 }
 0x257   : > { %v1443_v62 = vpop.permute.xlu0 %1442  ;;  %7052 = vst [vmem:[#allocation66_spill] sm:$0xff] %v5497_v46 }
 0x258   : > { %v1586_v4 = vsel %vm1266_vm14, %v5480_v61, %v1443_v62  ;;  %v5504_v62 = vpop.permute.xlu2 %1698  ;;  %v5519_v61 = vadd.f32 %v4979_v26, %v7058_v15  ;;  %v7062_v15 = vld [vmem:[#allocation47_spill] sm:$0xff] }
 0x259   : > { %1762 = vrot.lane.b32.xlu1 %v1586_v4, %s3966_s27 }
 0x25a   : > { %v1573_v40 = vsel %vm1253_vm3, %v5519_v61, %v5166_v43 }
 0x25d   : > { %1724 = vrot.lane.b32.xlu0 %v1567_v38, %s3966_s27  ;;  %v5514_v38 = vadd.f32 %v4979_v26, %v5164_v8  ;;  %v5531_v8 = vadd.f32 %v4979_v26, %v5235_v48  ;;  %v5548_v48 = vadd.f32 %v4979_v26, %v5301_v3 }
 0x25f   : > { %v1449_v31 = vpop.permute.xlu0 %1448  ;;  %7056 = vst [vmem:[#allocation84_spill] sm:$0xff] %v5514_v38 }
 0x260   : > { %v1589_v4 = vsel %vm1269_vm0, %v5497_v46, %v1449_v31  ;;  %7060 = vst [vmem:[#allocation71_spill] sm:$0xff] %v5531_v8 }
 0x261   : > { %1768 = vrot.lane.b32.xlu1 %v1589_v4, %s3966_s27  ;;  %v5523_v4 = vpop.permute.xlu2 %1704  ;;  %7064 = vst [vmem:[#allocation87_spill] sm:$0xff] %v5548_v48 }
 0x265   : > { %1730 = vrot.lane.b32.xlu0 %v1570_v12, %s3966_s27  ;;  %v7061_v12 = vld [vmem:[#allocation104_spill] sm:$0xff] }
 0x266   : > { %vm1275_vm4 = vcmp.eq.s32.totalorder %v7061_v12, 1  ;;  %v7065_v12 = vld [vmem:[#allocation108_spill] sm:$0xff] }
 0x267   : > { %v1455_v57 = vpop.permute.xlu0 %1454  ;;  %vm1278_vm6 = vcmp.eq.s32.totalorder %v7065_v12, 1  ;;  %v7068_v12 = vld [vmem:[#allocation138_spill] sm:$0xff] }
 0x268   : > { %v1592_v31 = vsel %vm1272_vm2, %v5514_v38, %v1455_v57  ;;  %v5536_v57 = vadd.f32 %v4979_v26, %v7062_v15  ;;  %v7066_v38 = vld [vmem:[#allocation131_spill] sm:$0xff] }
 0x269   : > { %1774 = vrot.lane.b32.xlu1 %v1592_v31, %s3966_s27 }
 0x26a   : > { %v1576_v43 = vsel %vm1256_vm5, %v5536_v57, %v5184_v23  ;;  %v7067_v23 = vld [vmem:[#allocation92_spill] sm:$0xff] }
 0x26b   : > { %vm1259_vm7 = vcmp.eq.s32.totalorder %v7067_v23, 1  ;;  %v463_v23 = vpop.f32.mrf.mxu2 }
 0x26c   : > { %v5579_v60 = vadd.f32 %v4979_v26, %v463_v23 }
 0x26d   : > { %1736 = vrot.lane.b32.xlu0 %v1573_v40, %s3966_s27  ;;  %v5543_v40 = vpop.permute.xlu2 %1710 }
 0x26e   : > { %7071 = vst [vmem:[#allocation75_spill] sm:$0xff] %v5579_v60 }
 0x26f   : > { %v1461_v29 = vpop.permute.xlu0 %1460 }
 0x270   : > { %v1595_v31 = vsel %vm1275_vm4, %v5531_v8, %v1461_v29  ;;  %v5553_v29 = vadd.f32 %v4979_v26, %v7066_v38  ;;  %v5567_v38 = vadd.f32 %v4979_v26, %v7068_v12  ;;  %v7069_v8 = vld [vmem:[#allocation94_spill] sm:$0xff] }
 0x271   : > { %1780 = vrot.lane.b32.xlu1 %v1595_v31, %s3966_s27  ;;  %vm1262_vm8 = vcmp.eq.s32.totalorder %v7069_v8, 1 }
 0x272   : > { %v1579_v14 = vsel %vm1259_vm7, %v5553_v29, %v5217_v5  ;;  %v5574_v5 = vpop.permute.xlu1 %1666 }
 0x275   : > { %1742 = vrot.lane.b32.xlu0 %v1576_v43, %s3966_s27  ;;  %v5561_v3 = vpop.permute.xlu2 %1716 }
 0x277   : > { %v1467_v15 = vpop.permute.xlu0 %1466 }
 0x278   : > { %v1598_v31 = vsel %vm1278_vm6, %v5548_v48, %v1467_v15  ;;  %v7070_v15 = vld [vmem:[#allocation34_spill] sm:$0xff]  ;;  %v3835_v48 = vld [vmem:[%s4151_s9 + $0x10] sm:$0xff] }
 0x279   : > { %1786 = vrot.lane.b32.xlu1 %v1598_v31, %s3966_s27  ;;  %vm900_vm9 = vcmp.eq.s32.totalorder %v7070_v15, 1  ;;  %v1582_v31 = vsel %vm1262_vm8, %v5567_v38, %v5240_v44  ;;  %v1585_v44 = vsel %vm1265_vm11, %v5579_v60, %v5260_v50  ;;  %v7076_v50 = vld [vmem:[#allocation74_spill] sm:$0xff] }
 0x27a   : > { %v964_v46 = vsel %vm900_vm9, %v5337_v22, %v3835_v48  ;;  %v7073_v22 = vld [vmem:[#allocation129_spill] sm:$0xff]  ;;  %v1673_v23 = vpop.permute.xlu1 %1672 }
 0x27b   : > { %v5592_v48 = vadd.f32 %v4979_v26, %v7073_v22  ;;  %v7079_v22 = vld [vmem:[#allocation100_spill] sm:$0xff] }
 0x27c   : > { %vm1271_vm14 = vcmp.eq.s32.totalorder %v7079_v22, 1 }
 0x27d   : > { %1748 = vrot.lane.b32.xlu0 %v1579_v14, %s3966_s27  ;;  %v5581_v12 = vpop.permute.xlu2 %1722  ;;  %7074 = vst [vmem:[#allocation89_spill] sm:$0xff] %v5592_v48 }
 0x27f   : > { %v5563_v43 = vpop.permute.xlu0 %1472 }
 0x282   : > { %v5608_v11 = vpop.permute.xlu1 %1678 }
 0x285   : > { %1754 = vrot.lane.b32.xlu0 %v1582_v31, %s3966_s27 }
 0x287   : > { %v1671_v14 = vpop.permute.xlu0 %1670 }
 0x288   : > { %v1860_v8 = vmul.f32 %v1671_v14, %v964_v46  ;;  %v5594_v46 = vpop.permute.xlu2 %1728  ;;  %v7075_v14 = vld [vmem:[#allocation97_spill] sm:$0xff] }
 0x289   : > { %vm1268_vm12 = vcmp.eq.s32.totalorder %v7075_v14, 1 }
 0x28a   : > { %v1929_v15 = vsel %vm1922_vm10, %v1860_v8, 0.0  ;;  %v1588_v36 = vsel %vm1268_vm12, %v5592_v48, %v5283_v30  ;;  %v5602_v8 = vadd.f32 %v4979_v26, %v7076_v50  ;;  %v3836_v30 = vld [vmem:[%s4151_s9 + $0x8] sm:$0xff] }
 0x28b   : > { %1930 = vadd.xlane.f32.xlu2 %v1929_v15 }
 0x28c   : > { %7077 = vst [vmem:[#allocation79_spill] sm:$0xff] %v5602_v8  ;;  %v1591_v14 = vsel %vm1271_vm14, %v5602_v8, %v5310_v35  ;;  %v7083_v35 = vld [vmem:[#allocation6_spill] sm:$0xff] }
 0x28d   : > { %1760 = vrot.lane.b32.xlu0 %v1585_v44, %s3966_s27  ;;  %v7078_v44 = vld [vmem:[#allocation102_spill] sm:$0xff] }
 0x28e   : > { %vm899_vm13 = vcmp.eq.s32.totalorder %v7078_v44, 1 }
 0x28f   : > { %v5588_v31 = vpop.permute.xlu0 %1676 }
 0x290   : > { %v5612_v49 = vpop.permute.xlu2 %1734 }
 0x295   : > { %1766 = vrot.lane.b32.xlu0 %v1588_v36, %s3966_s27  ;;  %v963_v36 = vsel %vm899_vm13, %v7080_v18, %v3836_v30  ;;  %v1594_v18 = vsel %vm1274_vm15, %v5620_v16, %v5328_v52  ;;  %v5629_v30 = vpop.permute.xlu1 %1684 }
 0x296   : > { %v1859_v50 = vmul.f32 %v5399_v45, %v963_v36  ;;  %v7086_v36 = vld [vmem:[#allocation10_spill] sm:$0xff] }
 0x297   : > { %v5604_v15 = vpop.permute.xlu0 %1682 }
 0x298   : > { %v1926_v22 = vsel %vm1922_vm10, %v1859_v50, 0.0  ;;  %v5632_v45 = vpop.permute.xlu2 %1740 }
 0x29d   : > { %1772 = vrot.lane.b32.xlu0 %v1591_v14, %s3966_s27  ;;  %v7085_v14 = vld [vmem:[#allocation106_spill] sm:$0xff]  ;;  %v5645_v52 = vpop.permute.xlu1 %1690 }
 0x29e   : > { %vm1277_vm0 = vcmp.eq.s32.totalorder %v7085_v14, 1  ;;  %v7090_v14 = vld [vmem:[#allocation14_spill] sm:$0xff] }
 0x29f   : > { %v5622_v44 = vpop.permute.xlu0 %1688  ;;  %v1597_v33 = vsel %vm1277_vm0, %v5636_v24, %v5357_v20 }
 0x2a3   : > { %719 = vperm.xlu2 %3832, %v7083_v35   ;;  %1927 = vadd.xlane.f32.xlu1 %v1926_v22  ;;  %v5647_v22 = vpop.permute.xlu2 %1746  ;;  %v7088_v35 = vld [vmem:[#allocation12_spill] sm:$0xff] }
 0x2a4   : > { %7087 = vst [vmem:[#allocation93_spill] sm:$0xff] %v5647_v22 }
 0x2a5   : > { %1778 = vrot.lane.b32.xlu0 %v1594_v18, %s3966_s27  ;;  %v5652_v13 = vpop.permute.xlu1 %1696 }
 0x2a7   : > { %v5642_v50 = vpop.permute.xlu0 %1694 }
 0x2ab   : > { %722 = vperm.xlu2 %3832, %v7086_v36   ;;  %v5654_v18 = vpop.permute.xlu2 %1752 }
 0x2ac   : > { %7089 = vst [vmem:[#allocation61_spill] sm:$0xff] %v5654_v18 }
 0x2ad   : > { %1784 = vrot.lane.b32.xlu0 %v1597_v33, %s3966_s27  ;;  %v5659_v36 = vpop.permute.xlu1 %1702  ;;  %v7091_v33 = vld [vmem:[#allocation16_spill] sm:$0xff] }
 0x2af   : > { %v5650_v26 = vpop.permute.xlu0 %1700 }
 0x2b3   : > { %731 = vperm.xlu2 %3832, %v7088_v35   ;;  %v5662_v24 = vpop.permute.xlu2 %1758  ;;  %v7093_v35 = vld [vmem:[#allocation18_spill] sm:$0xff] }
 0x2b4   : > { %7092 = vst [vmem:[#allocation83_spill] sm:$0xff] %v5662_v24  ;;  %v7098_v24 = vld [vmem:[#allocation39_spill] sm:$0xff] }
 0x2b5   : > { %v5667_v16 = vpop.permute.xlu1 %1708  ;;  %vm901_vm2 = vcmp.eq.s32.totalorder %v7098_v24, 1 }
 0x2b6   : > { %7094 = vst [vmem:[#allocation125_spill] sm:$0xff] %v5667_v16  ;;  %v3840_v16 = vld [vmem:[%s4151_s9 + $0x28] sm:$0xff] }
 0x2b7   : > { %v5657_v20 = vpop.permute.xlu0 %1706 }
 0x2bb   : > { %740 = vperm.xlu2 %3832, %v7090_v14   ;;  %v5670_v10 = vpop.permute.xlu2 %1764  ;;  %v3837_v14 = vld [vmem:[%s4151_s9] sm:$0xff] }
 0x2bc   : > { %7096 = vst [vmem:[#allocation96_spill] sm:$0xff] %v5670_v10  ;;  %v962_v8 = vsel %vm898_vm1, %v5192_v42, %v3837_v14  ;;  %v965_v10 = vsel %vm901_vm2, %v5215_v27, %v3838_v47  ;;  %v7101_v42 = vld [vmem:[#allocation22_spill] sm:$0xff]  ;;  %v7106_v27 = vld [vmem:[#allocation27_spill] sm:$0xff]  ;;  %v7108_v47 = vld [vmem:[#allocation29_spill] sm:$0xff] }
 0x2bd   : > { %v1858_v18 = vmul.f32 %v5574_v5, %v962_v8  ;;  %v1861_v0 = vmul.f32 %v1673_v23, %v965_v10 }
 0x2bf   : > { %v5664_v53 = vpop.permute.xlu0 %1712  ;;  %v1923_v48 = vsel %vm1922_vm10, %v1858_v18, 0.0  ;;  %v7104_v18 = vld [vmem:[#allocation24_spill] sm:$0xff] }
 0x2c3   : > { %749 = vperm.xlu2 %3832, %v7091_v33   ;;  %v5682_v22 = vpop.permute.xlu2 %1770 }
 0x2c4   : > { %7100 = vst [vmem:[#allocation132_spill] sm:$0xff] %v5682_v22 }
 0x2c7   : > { %v5676_v33 = vpop.permute.xlu0 %1718 }
 0x2cb   : > { %758 = vperm.xlu2 %3832, %v7093_v35   ;;  %v5680_v35 = vpop.permute.xlu1 %1714  ;;  %v5692_v24 = vpop.permute.xlu2 %1776 }
 0x2cc   : > { %7099 = vst [vmem:[#allocation85_spill] sm:$0xff] %v5680_v35 }
 0x2cd   : > { %7103 = vst [vmem:[#allocation98_spill] sm:$0xff] %v5692_v24 }
 0x2cf   : > { %v5687_v5 = vpop.permute.xlu0 %1724 }
 0x2d3   : > { %767 = vperm.xlu2 %3832, %v7097_v6   ;;  %v1932_v6 = vsel %vm1922_vm10, %v1861_v0, 0.0  ;;  %v5690_v8 = vpop.permute.xlu1 %1720  ;;  %v5700_v10 = vpop.permute.xlu2 %1782 }
 0x2d4   : > { %7102 = vst [vmem:[#allocation65_spill] sm:$0xff] %v5690_v8  ;;  %v7114_v8 = vld [vmem:[#allocation119_spill] sm:$0xff] }
 0x2d5   : > { %7107 = vst [vmem:[#allocation86_spill] sm:$0xff] %v5700_v10 }
 0x2d7   : > { %1924 = vadd.xlane.f32.xlu0 %v1923_v48  ;;  %v5695_v48 = vpop.permute.xlu0 %1730 }
 0x2db   : > { %776 = vperm.xlu2 %3832, %v7101_v42   ;;  %v5697_v14 = vpop.permute.xlu1 %1726  ;;  %v5707_v42 = vpop.permute.xlu2 %1788 }
 0x2dc   : > { %7105 = vst [vmem:[#allocation113_spill] sm:$0xff] %v5697_v14 }
 0x2dd   : > { %7110 = vst [vmem:[#allocation120_spill] sm:$0xff] %v5707_v42  ;;  %v7116_v42 = vld [vmem:[#allocation41_spill] sm:$0xff] }
 0x2df   : > { %1933 = vadd.xlane.f32.xlu0 %v1932_v6  ;;  %v5702_v23 = vpop.permute.xlu0 %1736  ;;  %v7111_v6 = vld [vmem:[#allocation32_spill] sm:$0xff] }
 0x2e3   : > { %785 = vperm.xlu2 %3832, %v7104_v18   ;;  %v5705_v0 = vpop.permute.xlu1 %1732 }
 0x2e4   : > { %7109 = vst [vmem:[#allocation101_spill] sm:$0xff] %v5705_v0 }
 0x2e7   : > { %v5710_v18 = vpop.permute.xlu0 %1742 }
 0x2eb   : > { %794 = vperm.xlu2 %3832, %v7106_v27   ;;  %v5714_v22 = vpop.permute.xlu1 %1738  ;;  %v7113_v27 = vld [vmem:[#allocation37_spill] sm:$0xff] }
 0x2ec   : > { %7112 = vst [vmem:[#allocation88_spill] sm:$0xff] %v5714_v22 }
 0x2ef   : > { %v5717_v10 = vpop.permute.xlu0 %1748 }
 0x2f3   : > { %803 = vperm.xlu2 %3832, %v7108_v47   ;;  %v3839_v47 = vld [vmem:[%s4151_s9 + $0x20] sm:$0xff]  ;;  %v5721_v35 = vpop.permute.xlu1 %1744 }
 0x2f4   : > { %7115 = vst [vmem:[#allocation104_spill] sm:$0xff] %v5721_v35 }
 0x2fb   : > { %812 = vperm.xlu2 %3832, %v7111_v6   ;;  %v5732_v35 = vpop.permute.xlu1 %1750 }
 0x2fc   : > { %7118 = vst [vmem:[#allocation47_spill] sm:$0xff] %v5732_v35 }
 0x2fe   : > { %v5712_v24 = vpop.xlane.xlu2 %1930 }
 0x303   : > { %821 = vperm.xlu2 %3832, %v7113_v27   ;;  %v5726_v27 = vpop.permute.xlu0 %1754 }
 0x306   : > { %v720_v14 = vpop.permute.xlu2 %719 }
 0x307   : > { %vm902_vm3 = vcmp.eq.s32.totalorder %v720_v14, 1 }
 0x308   : > { %v966_v0 = vsel %vm902_vm3, %v7114_v8, %v3839_v47  ;;  %v7117_v47 = vld [vmem:[#allocation105_spill] sm:$0xff] }
 0x309   : > { %v1862_v6 = vmul.f32 %v5421_v28, %v966_v0  ;;  %vm904_vm5 = vcmp.eq.s32.totalorder %v7117_v47, 1  ;;  %v7119_v28 = vld [vmem:[#allocation46_spill] sm:$0xff] }
 0x30b   : > { %830 = vperm.xlu2 %3832, %v7116_v42   ;;  %v1935_v60 = vsel %vm1922_vm10, %v1862_v6, 0.0 }
 0x30c   : > { %1936 = vadd.xlane.f32.xlu1 %v1935_v60  ;;  %v3841_v60 = vld [vmem:[%s4151_s9 + $0x30] sm:$0xff] }
 0x30e   : > { %v723_v22 = vpop.permute.xlu2 %722 }
 0x30f   : > { %vm903_vm4 = vcmp.eq.s32.totalorder %v723_v22, 1  ;;  %v968_v22 = vsel %vm904_vm5, %v5232_v37, %v3841_v60 }
 0x310   : > { %v967_v14 = vsel %vm903_vm4, %v5353_v58, %v3840_v16  ;;  %v1864_v6 = vmul.f32 %v5608_v11, %v968_v22  ;;  %v5739_v58 = vpop.permute.xlu0 %1760  ;;  %v7120_v16 = vld [vmem:[#allocation52_spill] sm:$0xff]  ;;  %v7123_v11 = vld [vmem:[#allocation58_spill] sm:$0xff]  ;;  %v7124_v22 = vld [vmem:[#allocation5_spill] sm:$0xff] }
 0x311   : > { %v1863_v8 = vmul.f32 %v5588_v31, %v967_v14  ;;  %v3842_v14 = vld [vmem:[%s4151_s9 + $0x40] sm:$0xff] }
 0x312   : > { %v1941_v31 = vsel %vm1922_vm10, %v1864_v6, 0.0 }
 0x313   : > { %839 = vperm.xlu2 %3832, %v7119_v28   ;;  %v1938_v0 = vsel %vm1922_vm10, %v1863_v8, 0.0  ;;  %v5745_v8 = vpop.permute.xlu1 %1756  ;;  %v7122_v28 = vld [vmem:[#allocation107_spill] sm:$0xff] }
 0x314   : > { %1939 = vadd.xlane.f32.xlu0 %v1938_v0  ;;  %7121 = vst [vmem:[#allocation90_spill] sm:$0xff] %v5745_v8  ;;  %vm907_vm7 = vcmp.eq.s32.totalorder %v7122_v28, 1  ;;  %v7127_v28 = vld [vmem:[#allocation7_spill] sm:$0xff]  ;;  %v7154_v8 = vld [vmem:[#allocation28_spill] sm:$0xff] }
 0x316   : > { %v732_v42 = vpop.permute.xlu2 %731 }
 0x317   : > { %vm906_vm6 = vcmp.eq.s32.totalorder %v732_v42, 1  ;;  %v3843_v42 = vld [vmem:[%s4151_s9 + $0x48] sm:$0xff] }
 0x318   : > { %v970_v47 = vsel %vm906_vm6, %v5370_v54, %v3842_v14  ;;  %v5751_v60 = vpop.permute.xlu0 %1766  ;;  %v971_v54 = vsel %vm907_vm7, %v5251_v55, %v3843_v42 }
 0x319   : > { %v1866_v37 = vmul.f32 %v5604_v15, %v970_v47  ;;  %v7126_v15 = vld [vmem:[#allocation63_spill] sm:$0xff]  ;;  %v3844_v47 = vld [vmem:[%s4151_s9 + $0x58] sm:$0xff] }
 0x31b   : > { %848 = vperm.xlu2 %3832, %v7120_v16   ;;  %v1947_v0 = vsel %vm1922_vm10, %v1866_v37, 0.0  ;;  %v1867_v16 = vmul.f32 %v5629_v30, %v971_v54  ;;  %v7130_v30 = vld [vmem:[#allocation110_spill] sm:$0xff]  ;;  %v7132_v54 = vld [vmem:[#allocation8_spill] sm:$0xff] }
 0x31c   : > { %1942 = vadd.xlane.f32.xlu0 %v1941_v31  ;;  %v5757_v31 = vpop.permute.xlu1 %1762  ;;  %vm910_vm9 = vcmp.eq.s32.totalorder %v7130_v30, 1  ;;  %v7138_v30 = vld [vmem:[#allocation78_spill] sm:$0xff] }
 0x31d   : > { %7125 = vst [vmem:[#allocation108_spill] sm:$0xff] %v5757_v31  ;;  %v1950_v14 = vsel %vm1922_vm10, %v1867_v16, 0.0 }
 0x31e   : > { %v741_v6 = vpop.permute.xlu2 %740 }
 0x31f   : > { %vm909_vm8 = vcmp.eq.s32.totalorder %v741_v6, 1  ;;  %v3845_v6 = vld [vmem:[%s4151_s9 + $0x60] sm:$0xff] }
 0x320   : > { %v973_v37 = vsel %vm909_vm8, %v5387_v39, %v3844_v47  ;;  %v974_v39 = vsel %vm910_vm9, %v5271_v19, %v3845_v6  ;;  %v7140_v19 = vld [vmem:[#allocation11_spill] sm:$0xff] }
 0x321   : > { %v1869_v55 = vmul.f32 %v5622_v44, %v973_v37  ;;  %v1870_v16 = vmul.f32 %v5645_v52, %v974_v39  ;;  %v7135_v44 = vld [vmem:[#allocation73_spill] sm:$0xff]  ;;  %v5792_v52 = vld [vmem:[%s6742_s3] ss:$0 sm:$0xff] }
 0x322   : > { %v7136_v37 = vld [vmem:[#allocation9_spill] sm:$0xff] }
 0x323   : > { %857 = vperm.xlu2 %3832, %v7123_v11   ;;  %v5764_v11 = vpop.permute.xlu0 %1772  ;;  %v1956_v42 = vsel %vm1922_vm10, %v1869_v55, 0.0  ;;  %v1959_v47 = vsel %vm1922_vm10, %v1870_v16, 0.0  ;;  %v508_v55 = vpop.f32.mrf.mxu3 }
 0x324   : > { %1948 = vadd.xlane.f32.xlu0 %v1947_v0  ;;  %7128 = vst [vmem:[#allocation131_spill] sm:$0xff] %v5764_v11  ;;  %v5767_v0 = vpop.permute.xlu1 %1768 }
 0x325   : > { %728 = vperm.xlu1 %3833, %v7124_v22   ;;  %7129 = vst [vmem:[#allocation92_spill] sm:$0xff] %v5767_v0  ;;  %v7131_v22 = vld [vmem:[#allocation69_spill] sm:$0xff] }
 0x32b   : > { %866 = vperm.xlu2 %3832, %v7126_v15   ;;  %v5776_v15 = vpop.permute.xlu0 %1778 }
 0x32c   : > { %1951 = vadd.xlane.f32.xlu0 %v1950_v14  ;;  %7133 = vst [vmem:[#allocation138_spill] sm:$0xff] %v5776_v15  ;;  %v5778_v14 = vpop.permute.xlu1 %1774 }
 0x32d   : > { %737 = vperm.xlu1 %3833, %v7127_v28   ;;  %7134 = vst [vmem:[#allocation94_spill] sm:$0xff] %v5778_v14 }
 0x333   : > { %875 = vperm.xlu2 %3832, %v7131_v22   ;;  %v5783_v28 = vpop.permute.xlu0 %1784 }
 0x334   : > { %1957 = vadd.xlane.f32.xlu0 %v1956_v42  ;;  %7137 = vst [vmem:[#allocation34_spill] sm:$0xff] %v5783_v28  ;;  %v5786_v22 = vpop.permute.xlu1 %1780  ;;  %v5795_v42 = vadd.f32 %v5792_v52, %v508_v55  ;;  %v7157_v28 = vld [vmem:[#allocation36_spill] sm:$0xff] }
 0x335   : > { %746 = vperm.xlu1 %3833, %v7132_v54   ;;  %7139 = vst [vmem:[#allocation95_spill] sm:$0xff] %v5786_v22  ;;  %v7142_v54 = vld [vmem:[#allocation109_spill] sm:$0xff] }
 0x336   : > { %7141 = vst [vmem:[#allocation129_spill] sm:$0xff] %v5795_v42  ;;  %vm1280_vm11 = vcmp.eq.s32.totalorder %v7142_v54, 1 }
 0x337   : > { %v1600_v6 = vsel %vm1280_vm11, %v5795_v42, %v5377_v63  ;;  %v7145_v63 = vld [vmem:[#allocation15_spill] sm:$0xff] }
 0x33b   : > { %884 = vperm.xlu2 %3832, %v7135_v44  }
 0x33c   : > { %1960 = vadd.xlane.f32.xlu0 %v1959_v47  ;;  %v5802_v55 = vpop.permute.xlu1 %1786 }
 0x33d   : > { %755 = vperm.xlu1 %3833, %v7136_v37   ;;  %7144 = vst [vmem:[#allocation97_spill] sm:$0xff] %v5802_v55  ;;  %v7147_v55 = vld [vmem:[#allocation17_spill] sm:$0xff] }
 0x343   : > { %893 = vperm.xlu2 %3832, %v7138_v30  }
 0x345   : > { %764 = vperm.xlu1 %3833, %v7140_v19   ;;  %v7143_v19 = vld [vmem:[#allocation13_spill] sm:$0xff] }
 0x34a   : > { %v1925_v39 = vpop.xlane.xlu0 %1924 }
 0x34b   : > { %v2179_v16 = vperm.slane %v1925_v39, 0  ;;  %v2180_v44 = vperm.slane %v1925_v39, 1  ;;  %v2181_v47 = vperm.slane %v1925_v39, 2  ;;  %1790 = vrot.lane.b32.xlu2 %v1600_v6, %s3966_s27  ;;  %v2182_v37 = vperm.slane %v1925_v39, 3  ;;  %v1928_v6 = vpop.xlane.xlu1 %1927 }
 0x34c   : > { %v2183_v30 = vperm.slane %v1925_v39, 4  ;;  %v2184_v22 = vperm.slane %v1925_v39, 5  ;;  %v2185_v14 = vperm.slane %v1925_v39, 6  ;;  %v2186_v54 = vperm.slane %v1925_v39, 7  ;;  %v5808_v39 = vpop.permute.xlu2 %749 }
 0x34d   : > { %2691 = vst [vmem:[#allocation1] ss:$9 sm:$0xff] %v2179_v16  ;;  %773 = vperm.xlu1 %3833, %v7143_v19   ;;  %v2187_v0 = vperm.slane %v1928_v6, 0  ;;  %v2188_v31 = vperm.slane %v1928_v6, 1  ;;  %v2189_v19 = vperm.slane %v1928_v6, 2  ;;  %vm912_vm1 = vcmp.eq.s32.totalorder %v5808_v39, 1 }
 0x34e   : > { %2693 = vst [vmem:[#allocation1 + $0x1] ss:$9 sm:$0xff] %v2180_v44  ;;  %v2190_v44 = vperm.slane %v1928_v6, 3 }
 0x34f   : > { %2695 = vst [vmem:[#allocation1 + $0x2] ss:$9 sm:$0xff] %v2181_v47  ;;  %v2191_v47 = vperm.slane %v1928_v6, 4 }
 0x350   : > { %2697 = vst [vmem:[#allocation1 + $0x3] ss:$9 sm:$0xff] %v2182_v37  ;;  %v2194_v37 = vperm.slane %v1928_v6, 7 }
 0x351   : > { %2699 = vst [vmem:[#allocation1 + $0x4] ss:$9 sm:$0xff] %v2183_v30  ;;  %v7148_v30 = vld [vmem:[#allocation19_spill] sm:$0xff] }
 0x352   : > { %2701 = vst [vmem:[#allocation1 + $0x5] ss:$9 sm:$0xff] %v2184_v22  ;;  %v2192_v22 = vperm.slane %v1928_v6, 5 }
 0x353   : > { %2703 = vst [vmem:[#allocation1 + $0x6] ss:$9 sm:$0xff] %v2185_v14  ;;  %v2193_v14 = vperm.slane %v1928_v6, 6  ;;  %v2199_v6 = vperm.slane %v5712_v24, 4 }
 0x354   : > { %2705 = vst [vmem:[#allocation1 + $0x7] ss:$9 sm:$0xff] %v2186_v54  ;;  %v5811_v54 = vpop.permute.xlu2 %758 }
 0x355   : > { %782 = vperm.xlu1 %3833, %v7145_v63   ;;  %v2197_v63 = vperm.slane %v5712_v24, 2  ;;  %vm915_vm14 = vcmp.eq.s32.totalorder %v5811_v54, 1 }
 0x35b   : > { %v5805_v16 = vld [vmem:[#allocation1] sm:$0xff] }
 0x35c   : > { %7146 = vst [vmem:[#allocation74_spill] sm:$0xff] %v5805_v16 }
 0x35d   : > { %2707 = vst [vmem:[#allocation1] ss:$9 sm:$0xff] %v2187_v0  ;;  %791 = vperm.xlu1 %3833, %v7147_v55   ;;  %v2196_v0 = vperm.slane %v5712_v24, 1 }
 0x35e   : > { %2708 = vst [vmem:[#allocation1 + $0x1] ss:$9 sm:$0xff] %v2188_v31  ;;  %v2195_v31 = vperm.slane %v5712_v24, 0 }
 0x35f   : > { %2709 = vst [vmem:[#allocation1 + $0x2] ss:$9 sm:$0xff] %v2189_v19  ;;  %v2198_v19 = vperm.slane %v5712_v24, 3 }
 0x360   : > { %2710 = vst [vmem:[#allocation1 + $0x3] ss:$9 sm:$0xff] %v2190_v44  ;;  %v7150_v44 = vld [vmem:[#allocation21_spill] sm:$0xff] }
 0x361   : > { %2711 = vst [vmem:[#allocation1 + $0x4] ss:$9 sm:$0xff] %v2191_v47  ;;  %v2200_v47 = vperm.slane %v5712_v24, 5 }
 0x362   : > { %2712 = vst [vmem:[#allocation1 + $0x5] ss:$9 sm:$0xff] %v2192_v22  ;;  %v2201_v22 = vperm.slane %v5712_v24, 6 }
 0x363   : > { %2713 = vst [vmem:[#allocation1 + $0x6] ss:$9 sm:$0xff] %v2193_v14  ;;  %v2202_v14 = vperm.slane %v5712_v24, 7 }
 0x364   : > { %2714 = vst [vmem:[#allocation1 + $0x7] ss:$9 sm:$0xff] %v2194_v37  ;;  %v5824_v37 = vpop.permute.xlu2 %767 }
 0x365   : > { %800 = vperm.xlu1 %3833, %v7148_v30   ;;  %v1934_v30 = vpop.xlane.xlu0 %1933  ;;  %vm918_vm0 = vcmp.eq.s32.totalorder %v5824_v37, 1  ;;  %v3852_v37 = vld [vmem:[%s4151_s9 + $0x70] sm:$0xff] }
 0x366   : > { %v2205_v16 = vperm.slane %v1934_v30, 2  ;;  %v2208_v24 = vperm.slane %v1934_v30, 5 }
 0x36b   : > { %v5815_v55 = vld [vmem:[#allocation1] sm:$0xff] }
 0x36c   : > { %7149 = vst [vmem:[#allocation102_spill] sm:$0xff] %v5815_v55  ;;  %v5829_v55 = vpop.permute.xlu2 %776 }
 0x36d   : > { %2716 = vst [vmem:[#allocation1] ss:$9 sm:$0xff] %v2195_v31  ;;  %809 = vperm.xlu1 %3833, %v7150_v44   ;;  %v7151_v31 = vld [vmem:[#allocation23_spill] sm:$0xff]  ;;  %v2204_v44 = vperm.slane %v1934_v30, 1  ;;  %vm921_vm2 = vcmp.eq.s32.totalorder %v5829_v55, 1 }
 0x36e   : > { %2717 = vst [vmem:[#allocation1 + $0x1] ss:$9 sm:$0xff] %v2196_v0  ;;  %v2203_v0 = vperm.slane %v1934_v30, 0 }
 0x36f   : > { %2718 = vst [vmem:[#allocation1 + $0x2] ss:$9 sm:$0xff] %v2197_v63 }
 0x370   : > { %2719 = vst [vmem:[#allocation1 + $0x3] ss:$9 sm:$0xff] %v2198_v19  ;;  %v2206_v19 = vperm.slane %v1934_v30, 3 }
 0x371   : > { %2720 = vst [vmem:[#allocation1 + $0x4] ss:$9 sm:$0xff] %v2199_v6  ;;  %v2207_v6 = vperm.slane %v1934_v30, 4 }
 0x372   : > { %2721 = vst [vmem:[#allocation1 + $0x5] ss:$9 sm:$0xff] %v2200_v47  ;;  %v7153_v47 = vld [vmem:[#allocation26_spill] sm:$0xff] }
 0x373   : > { %2722 = vst [vmem:[#allocation1 + $0x6] ss:$9 sm:$0xff] %v2201_v22  ;;  %v2209_v22 = vperm.slane %v1934_v30, 6 }
 0x374   : > { %2723 = vst [vmem:[#allocation1 + $0x7] ss:$9 sm:$0xff] %v2202_v14  ;;  %v2210_v14 = vperm.slane %v1934_v30, 7 }
 0x375   : > { %818 = vperm.xlu1 %3833, %v7151_v31  }
 0x37b   : > { %v5827_v63 = vld [vmem:[#allocation1] sm:$0xff] }
 0x37c   : > { %7152 = vst [vmem:[#allocation100_spill] sm:$0xff] %v5827_v63 }
 0x37d   : > { %2725 = vst [vmem:[#allocation1] ss:$9 sm:$0xff] %v2203_v0  ;;  %827 = vperm.xlu1 %3833, %v7153_v47   ;;  %v5833_v0 = vpop.permute.xlu2 %785 }
 0x37e   : > { %2726 = vst [vmem:[#allocation1 + $0x1] ss:$9 sm:$0xff] %v2204_v44  ;;  %vm924_vm4 = vcmp.eq.s32.totalorder %v5833_v0, 1  ;;  %v7168_v0 = vld [vmem:[#allocation35_spill] sm:$0xff] }
 0x37f   : > { %2727 = vst [vmem:[#allocation1 + $0x2] ss:$9 sm:$0xff] %v2205_v16  ;;  %v1937_v31 = vpop.xlane.xlu1 %1936 }
 0x380   : > { %2728 = vst [vmem:[#allocation1 + $0x3] ss:$9 sm:$0xff] %v2206_v19  ;;  %v2211_v63 = vperm.slane %v1937_v31, 0  ;;  %v2212_v44 = vperm.slane %v1937_v31, 1  ;;  %v2213_v35 = vperm.slane %v1937_v31, 2  ;;  %v2214_v16 = vperm.slane %v1937_v31, 3 }
 0x381   : > { %2729 = vst [vmem:[#allocation1 + $0x4] ss:$9 sm:$0xff] %v2207_v6  ;;  %v2215_v19 = vperm.slane %v1937_v31, 4  ;;  %v2216_v47 = vperm.slane %v1937_v31, 5  ;;  %v2217_v6 = vperm.slane %v1937_v31, 6  ;;  %v2218_v30 = vperm.slane %v1937_v31, 7 }
 0x382   : > { %2730 = vst [vmem:[#allocation1 + $0x5] ss:$9 sm:$0xff] %v2208_v24  ;;  %v7156_v24 = vld [vmem:[#allocation31_spill] sm:$0xff] }
 0x383   : > { %2731 = vst [vmem:[#allocation1 + $0x6] ss:$9 sm:$0xff] %v2209_v22 }
 0x384   : > { %2732 = vst [vmem:[#allocation1 + $0x7] ss:$9 sm:$0xff] %v2210_v14 }
 0x385   : > { %836 = vperm.xlu1 %3833, %v7154_v8   ;;  %v5838_v8 = vpop.permute.xlu2 %794 }
 0x386   : > { %vm927_vm7 = vcmp.eq.s32.totalorder %v5838_v8, 1 }
 0x387   : > { %v1940_v22 = vpop.xlane.xlu0 %1939 }
 0x388   : > { %v2219_v14 = vperm.slane %v1940_v22, 0  ;;  %v2225_v15 = vperm.slane %v1940_v22, 6  ;;  %v2226_v11 = vperm.slane %v1940_v22, 7 }
 0x38b   : > { %v5835_v42 = vld [vmem:[#allocation1] sm:$0xff] }
 0x38c   : > { %7155 = vst [vmem:[#allocation117_spill] sm:$0xff] %v5835_v42  ;;  %v2220_v42 = vperm.slane %v1940_v22, 1 }
 0x38d   : > { %2734 = vst [vmem:[#allocation1] ss:$9 sm:$0xff] %v2211_v63  ;;  %845 = vperm.xlu1 %3833, %v7156_v24   ;;  %v2221_v63 = vperm.slane %v1940_v22, 2 }
 0x38e   : > { %2735 = vst [vmem:[#allocation1 + $0x1] ss:$9 sm:$0xff] %v2212_v44 }
 0x38f   : > { %2736 = vst [vmem:[#allocation1 + $0x2] ss:$9 sm:$0xff] %v2213_v35  ;;  %v2222_v35 = vperm.slane %v1940_v22, 3 }
 0x390   : > { %2737 = vst [vmem:[#allocation1 + $0x3] ss:$9 sm:$0xff] %v2214_v16  ;;  %v2223_v16 = vperm.slane %v1940_v22, 4 }
 0x391   : > { %2738 = vst [vmem:[#allocation1 + $0x4] ss:$9 sm:$0xff] %v2215_v19  ;;  %v2224_v19 = vperm.slane %v1940_v22, 5  ;;  %v1943_v22 = vpop.xlane.xlu0 %1942 }
 0x392   : > { %2739 = vst [vmem:[#allocation1 + $0x5] ss:$9 sm:$0xff] %v2216_v47  ;;  %v3847_v47 = vld [vmem:[%s4151_s9 + $0x38] sm:$0xff] }
 0x393   : > { %2740 = vst [vmem:[#allocation1 + $0x6] ss:$9 sm:$0xff] %v2217_v6  ;;  %v7159_v6 = vld [vmem:[#allocation122_spill] sm:$0xff] }
 0x394   : > { %2741 = vst [vmem:[#allocation1 + $0x7] ss:$9 sm:$0xff] %v2218_v30  ;;  %v5845_v30 = vpop.permute.xlu2 %803 }
 0x395   : > { %854 = vperm.xlu1 %3833, %v7157_v28   ;;  %vm930_vm9 = vcmp.eq.s32.totalorder %v5845_v30, 1 }
 0x397   : > { %v729_v31 = vpop.permute.xlu1 %728 }
 0x398   : > { %vm905_vm12 = vcmp.eq.s32.totalorder %v729_v31, 1  ;;  %v3848_v31 = vld [vmem:[%s4151_s9 + $0x78] sm:$0xff] }
 0x399   : > { %v969_v24 = vsel %vm905_vm12, %v7159_v6, %v3847_v47  ;;  %v3849_v6 = vld [vmem:[%s4151_s9 + $0x88] sm:$0xff] }
 0x39a   : > { %v1865_v28 = vmul.f32 %v5440_v59, %v969_v24  ;;  %v2229_v24 = vperm.slane %v1943_v22, 2 }
 0x39b   : > { %v5841_v44 = vld [vmem:[#allocation1] sm:$0xff] }
 0x39c   : > { %7158 = vst [vmem:[#allocation103_spill] sm:$0xff] %v5841_v44  ;;  %v7160_v44 = vld [vmem:[#allocation112_spill] sm:$0xff] }
 0x39d   : > { %2743 = vst [vmem:[#allocation1] ss:$9 sm:$0xff] %v2219_v14  ;;  %vm913_vm13 = vcmp.eq.s32.totalorder %v7160_v44, 1  ;;  %v1944_v14 = vsel %vm1922_vm10, %v1865_v28, 0.0  ;;  %v2227_v44 = vperm.slane %v1943_v22, 0  ;;  %v2231_v28 = vperm.slane %v1943_v22, 4 }
 0x39e   : > { %2744 = vst [vmem:[#allocation1 + $0x1] ss:$9 sm:$0xff] %v2220_v42  ;;  %v7161_v42 = vld [vmem:[#allocation40_spill] sm:$0xff]  ;;  %1945 = vadd.xlane.f32.xlu2 %v1944_v14  ;;  %v977_v47 = vsel %vm913_vm13, %v5290_v41, %v3848_v31  ;;  %v7162_v41 = vld [vmem:[#allocation45_spill] sm:$0xff]  ;;  %v2232_v14 = vperm.slane %v1943_v22, 5  ;;  %v2233_v31 = vperm.slane %v1943_v22, 6 }
 0x39f   : > { %2745 = vst [vmem:[#allocation1 + $0x2] ss:$9 sm:$0xff] %v2221_v63  ;;  %863 = vperm.xlu1 %3833, %v7161_v42   ;;  %v5853_v63 = vpop.permute.xlu1 %737  ;;  %v1873_v59 = vmul.f32 %v5652_v13, %v977_v47  ;;  %v2230_v13 = vperm.slane %v1943_v22, 3  ;;  %v3850_v47 = vld [vmem:[%s4151_s9 + $0x68] sm:$0xff] }
 0x3a0   : > { %2746 = vst [vmem:[#allocation1 + $0x3] ss:$9 sm:$0xff] %v2222_v35  ;;  %v5857_v35 = vpop.permute.xlu2 %812 }
 0x3a1   : > { %2747 = vst [vmem:[#allocation1 + $0x4] ss:$9 sm:$0xff] %v2223_v16  ;;  %v2228_v16 = vperm.slane %v1943_v22, 1  ;;  %vm933_vm12 = vcmp.eq.s32.totalorder %v5857_v35, 1 }
 0x3a2   : > { %2748 = vst [vmem:[#allocation1 + $0x5] ss:$9 sm:$0xff] %v2224_v19  ;;  %v1968_v19 = vsel %vm1922_vm10, %v1873_v59, 0.0 }
 0x3a3   : > { %2749 = vst [vmem:[#allocation1 + $0x6] ss:$9 sm:$0xff] %v2225_v15  ;;  %v979_v15 = vsel %vm915_vm14, %v5419_v32, %v3849_v6  ;;  %v7163_v32 = vld [vmem:[#allocation127_spill] sm:$0xff] }
 0x3a4   : > { %2750 = vst [vmem:[#allocation1 + $0x7] ss:$9 sm:$0xff] %v2226_v11  ;;  %v1875_v42 = vmul.f32 %v5650_v26, %v979_v15 }
 0x3a6   : > { %1969 = vadd.xlane.f32.xlu2 %v1968_v19  ;;  %v2234_v19 = vperm.slane %v1943_v22, 7  ;;  %v976_v22 = vsel %vm912_vm1, %v5404_v34, %v3852_v37  ;;  %v7165_v34 = vld [vmem:[#allocation56_spill] sm:$0xff] }
 0x3a7   : > { %872 = vperm.xlu1 %3833, %v7162_v41   ;;  %v747_v54 = vpop.permute.xlu1 %746 }
 0x3a8   : > { %vm911_vm15 = vcmp.eq.s32.totalorder %v747_v54, 1  ;;  %v3853_v54 = vld [vmem:[%s4151_s9 + $0xb8] sm:$0xff] }
 0x3a9   : > { %v975_v59 = vsel %vm911_vm15, %v7163_v32, %v3850_v47  ;;  %v7166_v47 = vld [vmem:[#allocation128_spill] sm:$0xff] }
 0x3aa   : > { %v1871_v6 = vmul.f32 %v5482_v2, %v975_v59  ;;  %v5878_v2 = vpop.permute.xlu2 %821 }
 0x3ab   : > { %v5863_v11 = vld [vmem:[#allocation1] sm:$0xff]  ;;  %vm936_vm14 = vcmp.eq.s32.totalorder %v5878_v2, 1 }
 0x3ac   : > { %2752 = vst [vmem:[#allocation1] ss:$9 sm:$0xff] %v2227_v44  ;;  %v1974_v44 = vsel %vm1922_vm10, %v1875_v42, 0.0  ;;  %v1962_v26 = vsel %vm1922_vm10, %v1871_v6, 0.0 }
 0x3ad   : > { %2753 = vst [vmem:[#allocation1 + $0x1] ss:$9 sm:$0xff] %v2228_v16  ;;  %v3851_v16 = vld [vmem:[%s4151_s9 + $0xa0] sm:$0xff]  ;;  %1963 = vadd.xlane.f32.xlu0 %v1962_v26  ;;  %v3855_v26 = vld [vmem:[%s4151_s9 + $0xd0] sm:$0xff] }
 0x3ae   : > { %2754 = vst [vmem:[#allocation1 + $0x2] ss:$9 sm:$0xff] %v2229_v24  ;;  %v982_v15 = vsel %vm918_vm0, %v5436_v56, %v3851_v16  ;;  %v7164_v24 = vld [vmem:[#allocation51_spill] sm:$0xff]  ;;  %1975 = vadd.xlane.f32.xlu2 %v1974_v44  ;;  %vm908_vm0 = vcmp.eq.s32.totalorder %v5853_v63, 1 }
 0x3af   : > { %2755 = vst [vmem:[#allocation1 + $0x3] ss:$9 sm:$0xff] %v2230_v13  ;;  %881 = vperm.xlu1 %3833, %v7164_v24   ;;  %v756_v39 = vpop.permute.xlu1 %755  ;;  %v1878_v41 = vmul.f32 %v5657_v20, %v982_v15  ;;  %v1872_v13 = vmul.f32 %v5642_v50, %v976_v22  ;;  %v3857_v22 = vld [vmem:[%s4151_s9 + $0xe8] sm:$0xff] }
 0x3b0   : > { %2756 = vst [vmem:[#allocation1 + $0x4] ss:$9 sm:$0xff] %v2231_v28  ;;  %vm914_vm3 = vcmp.eq.s32.totalorder %v756_v39, 1  ;;  %v511_v28 = vpop.f32.mrf.mxu3  ;;  %v991_v39 = vsel %vm927_vm7, %v5487_v51, %v3857_v22 }
 0x3b1   : > { %2757 = vst [vmem:[#allocation1 + $0x5] ss:$9 sm:$0xff] %v2232_v14  ;;  %v1983_v56 = vsel %vm1922_vm10, %v1878_v41, 0.0  ;;  %v985_v14 = vsel %vm921_vm2, %v5453_v17, %v3853_v54  ;;  %v1965_v42 = vsel %vm1922_vm10, %v1872_v13, 0.0  ;;  %v5891_v55 = vadd.f32 %v5792_v52, %v511_v28  ;;  %v3858_v13 = vld [vmem:[%s4151_s9 + $0xb0] sm:$0xff] }
 0x3b2   : > { %2758 = vst [vmem:[#allocation1 + $0x6] ss:$9 sm:$0xff] %v2233_v31  ;;  %v3854_v31 = vld [vmem:[%s4151_s9 + $0x80] sm:$0xff]  ;;  %v5893_v32 = vpop.permute.xlu2 %830  ;;  %v1881_v59 = vmul.f32 %v5664_v53, %v985_v14  ;;  %v988_v52 = vsel %vm924_vm4, %v5470_v25, %v3855_v26  ;;  %v1887_v8 = vmul.f32 %v5687_v5, %v991_v39  ;;  %v3866_v39 = vld [vmem:[%s4151_s9 + $0x148] sm:$0xff] }
 0x3b3   : > { %2759 = vst [vmem:[#allocation1 + $0x7] ss:$9 sm:$0xff] %v2234_v19  ;;  %v978_v20 = vsel %vm914_vm3, %v7166_v47, %v3854_v31  ;;  %v7167_v19 = vld [vmem:[#allocation111_spill] sm:$0xff]  ;;  %v1884_v24 = vmul.f32 %v5676_v33, %v988_v52  ;;  %v3860_v31 = vld [vmem:[%s4151_s9 + $0xc8] sm:$0xff]  ;;  %v7170_v47 = vld [vmem:[#allocation130_spill] sm:$0xff]  ;;  %vm939_vm1 = vcmp.eq.s32.totalorder %v5893_v32, 1 }
 0x3b4   : > { %v1874_v17 = vmul.f32 %v5504_v62, %v978_v20  ;;  %vm1281_vm5 = vcmp.eq.s32.totalorder %v7167_v19, 1  ;;  %v1992_v44 = vsel %vm1922_vm10, %v1881_v59, 0.0  ;;  %v3856_v62 = vld [vmem:[%s4151_s9 + $0x98] sm:$0xff]  ;;  %v2010_v51 = vsel %vm1922_vm10, %v1887_v8, 0.0  ;;  %v3859_v14 = vld [vmem:[%s4151_s9 + $0x100] sm:$0xff]  ;;  %v3863_v52 = vld [vmem:[%s4151_s9 + $0x130] sm:$0xff] }
 0x3b5   : > { %1966 = vadd.xlane.f32.xlu0 %v1965_v42  ;;  %v1601_v6 = vsel %vm1281_vm5, %v5891_v55, %v5563_v43  ;;  %v2001_v25 = vsel %vm1922_vm10, %v1884_v24, 0.0  ;;  %v3868_v8 = vld [vmem:[%s4151_s9 + $0x90] sm:$0xff] }
 0x3b6   : > { %1984 = vadd.xlane.f32.xlu2 %v1983_v56  ;;  %v1971_v53 = vsel %vm1922_vm10, %v1874_v17, 0.0  ;;  %v7169_v56 = vld [vmem:[#allocation49_spill] sm:$0xff] }
 0x3b7   : > { %890 = vperm.xlu1 %3833, %v7165_v34   ;;  %v765_v50 = vpop.permute.xlu1 %764  ;;  %v994_v34 = vsel %vm930_vm9, %v5502_v9, %v3859_v14  ;;  %v3861_v9 = vld [vmem:[%s4151_s9 + $0x118] sm:$0xff] }
 0x3b8   : > { %vm917_vm6 = vcmp.eq.s32.totalorder %v765_v50, 1  ;;  %v1890_v30 = vmul.f32 %v5695_v48, %v994_v34  ;;  %v997_v59 = vsel %vm933_vm12, %v5519_v61, %v3861_v9 }
 0x3b9   : > { %v981_v16 = vsel %vm917_vm6, %v7168_v0, %v3856_v62  ;;  %v1893_v35 = vmul.f32 %v5702_v23, %v997_v59  ;;  %v3864_v0 = vld [vmem:[%s4151_s9 + $0xf8] sm:$0xff]  ;;  %v7173_v23 = vld [vmem:[#allocation124_spill] sm:$0xff] }
 0x3ba   : > { %v1877_v43 = vmul.f32 %v5523_v4, %v981_v16  ;;  %v5911_v37 = vpop.permute.xlu2 %839  ;;  %v2019_v50 = vsel %vm1922_vm10, %v1890_v30, 0.0  ;;  %v7172_v16 = vld [vmem:[#allocation135_spill] sm:$0xff]  ;;  %v3871_v30 = vld [vmem:[%s4151_s9 + $0xa8] sm:$0xff] }
 0x3bb   : > { %v2028_v61 = vsel %vm1922_vm10, %v1893_v35, 0.0  ;;  %vm942_vm4 = vcmp.eq.s32.totalorder %v5911_v37, 1 }
 0x3bc   : > { %v1980_v41 = vsel %vm1922_vm10, %v1877_v43, 0.0 }
 0x3bd   : > { %1972 = vadd.xlane.f32.xlu0 %v1971_v53  ;;  %v1000_v53 = vsel %vm936_vm14, %v5536_v57, %v3863_v52  ;;  %v3874_v52 = vld [vmem:[%s4151_s9 + $0xc0] sm:$0xff] }
 0x3be   : > { %1993 = vadd.xlane.f32.xlu2 %v1992_v44  ;;  %v7171_v44 = vld [vmem:[#allocation134_spill] sm:$0xff]  ;;  %v1896_v63 = vmul.f32 %v5710_v18, %v1000_v53  ;;  %v3867_v18 = vld [vmem:[%s4151_s9 + $0x110] sm:$0xff] }
 0x3bf   : > { %1792 = vrot.lane.b32.xlu1 %v1601_v6, %s3966_s27  ;;  %v774_v15 = vpop.permute.xlu1 %773  ;;  %v3862_v6 = vld [vmem:[%s4151_s9 + $0xe0] sm:$0xff]  ;;  %v7182_v53 = vld [vmem:[#allocation57_spill] sm:$0xff] }
 0x3c0   : > { %vm920_vm8 = vcmp.eq.s32.totalorder %v774_v15, 1  ;;  %v2037_v22 = vsel %vm1922_vm10, %v1896_v63, 0.0 }
 0x3c1   : > { %v984_v33 = vsel %vm920_vm8, %v7169_v56, %v3858_v13  ;;  %v7174_v56 = vld [vmem:[#allocation114_spill] sm:$0xff] }
 0x3c2   : > { %v1880_v28 = vmul.f32 %v5543_v40, %v984_v33  ;;  %v5922_v54 = vpop.permute.xlu2 %848  ;;  %vm916_vm3 = vcmp.eq.s32.totalorder %v7174_v56, 1  ;;  %v7175_v33 = vld [vmem:[#allocation136_spill] sm:$0xff] }
 0x3c3   : > { %vm945_vm7 = vcmp.eq.s32.totalorder %v5922_v54, 1 }
 0x3c4   : > { %v1989_v42 = vsel %vm1922_vm10, %v1880_v28, 0.0 }
 0x3c5   : > { %1981 = vadd.xlane.f32.xlu0 %v1980_v41  ;;  %v1003_v41 = vsel %vm939_vm1, %v5553_v29, %v3866_v39  ;;  %v980_v29 = vsel %vm916_vm3, %v5308_v1, %v3868_v8  ;;  %v3870_v1 = vld [vmem:[%s4151_s9 + $0x128] sm:$0xff]  ;;  %v7187_v39 = vld [vmem:[#allocation43_spill] sm:$0xff] }
 0x3c6   : > { %2002 = vadd.xlane.f32.xlu2 %v2001_v25 }
 0x3c7   : > { %v783_v4 = vpop.permute.xlu1 %782 }
 0x3c8   : > { %vm923_vm11 = vcmp.eq.s32.totalorder %v783_v4, 1  ;;  %v1899_v4 = vmul.f32 %v5717_v10, %v1003_v41 }
 0x3c9   : > { %v987_v5 = vsel %vm923_vm11, %v7170_v47, %v3860_v31  ;;  %v7176_v47 = vld [vmem:[#allocation115_spill] sm:$0xff] }
 0x3ca   : > { %v1883_v20 = vmul.f32 %v5561_v3, %v987_v5  ;;  %v5937_v19 = vpop.permute.xlu2 %857  ;;  %v2046_v34 = vsel %vm1922_vm10, %v1899_v4, 0.0  ;;  %vm919_vm6 = vcmp.eq.s32.totalorder %v7176_v47, 1  ;;  %v7190_v4 = vld [vmem:[#allocation65_spill] sm:$0xff] }
 0x3cb   : > { %vm948_vm11 = vcmp.eq.s32.totalorder %v5937_v19, 1 }
 0x3cc   : > { %v1998_v17 = vsel %vm1922_vm10, %v1883_v20, 0.0 }
 0x3cd   : > { %1990 = vadd.xlane.f32.xlu0 %v1989_v42  ;;  %v3869_v42 = vld [vmem:[%s4151_s9 + $0x160] sm:$0xff] }
 0x3ce   : > { %2011 = vadd.xlane.f32.xlu2 %v2010_v51  ;;  %v1876_v51 = vmul.f32 %v5659_v36, %v980_v29  ;;  %v1006_v31 = vsel %vm942_vm4, %v5567_v38, %v3869_v42  ;;  %v983_v38 = vsel %vm919_vm6, %v5325_v7, %v3871_v30  ;;  %v3873_v7 = vld [vmem:[%s4151_s9 + $0x140] sm:$0xff] }
 0x3cf   : > { %v792_v40 = vpop.permute.xlu1 %791 }
 0x3d0   : > { %vm926_vm13 = vcmp.eq.s32.totalorder %v792_v40, 1  ;;  %v1977_v37 = vsel %vm1922_vm10, %v1876_v51, 0.0  ;;  %v1902_v40 = vmul.f32 %v5726_v27, %v1006_v31  ;;  %v7191_v51 = vld [vmem:[#allocation79_spill] sm:$0xff]  ;;  %v3879_v31 = vld [vmem:[%s4151_s9 + $0x170] sm:$0xff] }
 0x3d1   : > { %v990_v48 = vsel %vm926_vm13, %v7171_v44, %v3862_v6  ;;  %v3872_v6 = vld [vmem:[%s4151_s9 + $0x178] sm:$0xff]  ;;  %v7179_v44 = vld [vmem:[#allocation75_spill] sm:$0xff] }
 0x3d2   : > { %v1886_v26 = vmul.f32 %v5581_v12, %v990_v48  ;;  %v3865_v12 = vld [vmem:[%s4151_s9 + $0x50] sm:$0xff]  ;;  %v5953_v43 = vpop.permute.xlu2 %866  ;;  %v1009_v48 = vsel %vm945_vm7, %v7179_v44, %v3872_v6  ;;  %v7198_v6 = vld [vmem:[#allocation123_spill] sm:$0xff] }
 0x3d3   : > { %v972_v2 = vsel %vm908_vm0, %v7173_v23, %v3865_v12  ;;  %vm951_vm14 = vcmp.eq.s32.totalorder %v5953_v43, 1  ;;  %vm931_vm3 = vcmp.eq.s32.totalorder %v7198_v6, 1  ;;  %v3881_v44 = vld [vmem:[%s4151_s9 + $0x1c0] sm:$0xff] }
 0x3d4   : > { %v2007_v62 = vsel %vm1922_vm10, %v1886_v26, 0.0  ;;  %v1868_v57 = vmul.f32 %v5460_v21, %v972_v2  ;;  %v3875_v2 = vld [vmem:[%s4151_s9 + $0x190] sm:$0xff] }
 0x3d5   : > { %1999 = vadd.xlane.f32.xlu0 %v1998_v17  ;;  %v2055_v17 = vsel %vm1922_vm10, %v1902_v40, 0.0  ;;  %v7195_v40 = vld [vmem:[#allocation70_spill] sm:$0xff] }
 0x3d6   : > { %2020 = vadd.xlane.f32.xlu2 %v2019_v50  ;;  %v1953_v32 = vsel %vm1922_vm10, %v1868_v57, 0.0  ;;  %v7178_v50 = vld [vmem:[#allocation125_spill] sm:$0xff] }
 0x3d7   : > { %v801_v3 = vpop.permute.xlu1 %800  ;;  %v1879_v9 = vmul.f32 %v7178_v50, %v983_v38  ;;  %v7196_v38 = vld [vmem:[#allocation83_spill] sm:$0xff]  ;;  %v7197_v50 = vld [vmem:[#allocation113_spill] sm:$0xff] }
 0x3d8   : > { %vm929_vm15 = vcmp.eq.s32.totalorder %v801_v3, 1  ;;  %v7180_v3 = vld [vmem:[#allocation116_spill] sm:$0xff] }
 0x3d9   : > { %v993_v15 = vsel %vm929_vm15, %v7172_v16, %v3864_v0  ;;  %vm922_vm9 = vcmp.eq.s32.totalorder %v7180_v3, 1  ;;  %v1986_v54 = vsel %vm1922_vm10, %v1879_v9, 0.0  ;;  %v7183_v0 = vld [vmem:[#allocation93_spill] sm:$0xff] }
 0x3da   : > { %v1889_v25 = vmul.f32 %v5594_v46, %v993_v15  ;;  %v5973_v14 = vpop.permute.xlu2 %875  ;;  %v7184_v15 = vld [vmem:[#allocation85_spill] sm:$0xff] }
 0x3db   : > { %vm954_vm1 = vcmp.eq.s32.totalorder %v5973_v14, 1  ;;  %v3883_v14 = vld [vmem:[%s4151_s9 + $0x108] sm:$0xff] }
 0x3dc   : > { %v2016_v13 = vsel %vm1922_vm10, %v1889_v25, 0.0 }
 0x3dd   : > { %2008 = vadd.xlane.f32.xlu0 %v2007_v62  ;;  %v986_v62 = vsel %vm922_vm9, %v7182_v53, %v3874_v52 }
 0x3de   : > { %2029 = vadd.xlane.f32.xlu2 %v2028_v61  ;;  %v1905_v61 = vmul.f32 %v5739_v58, %v1009_v48  ;;  %v1882_v12 = vmul.f32 %v7184_v15, %v986_v62  ;;  %v7186_v58 = vld [vmem:[#allocation118_spill] sm:$0xff]  ;;  %v7199_v48 = vld [vmem:[#allocation91_spill] sm:$0xff] }
 0x3df   : > { %v810_v24 = vpop.permute.xlu1 %809  ;;  %vm925_vm13 = vcmp.eq.s32.totalorder %v7186_v58, 1  ;;  %v7202_v62 = vld [vmem:[#allocation138_spill] sm:$0xff] }
 0x3e0   : > { %vm932_vm2 = vcmp.eq.s32.totalorder %v810_v24, 1  ;;  %v2064_v23 = vsel %vm1922_vm10, %v1905_v61, 0.0  ;;  %v7185_v24 = vld [vmem:[#allocation89_spill] sm:$0xff]  ;;  %v1995_v19 = vsel %vm1922_vm10, %v1882_v12, 0.0 }
 0x3e1   : > { %v996_v46 = vsel %vm932_vm2, %v7175_v33, %v3867_v18  ;;  %v1012_v63 = vsel %vm948_vm11, %v7185_v24, %v3875_v2  ;;  %v3877_v18 = vld [vmem:[%s4151_s9 + $0xd8] sm:$0xff]  ;;  %v7188_v33 = vld [vmem:[#allocation64_spill] sm:$0xff]  ;;  %v7201_v61 = vld [vmem:[#allocation33_spill] sm:$0xff] }
 0x3e2   : > { %v1892_v28 = vmul.f32 %v5612_v49, %v996_v46  ;;  %v7177_v49 = vld [vmem:[#allocation137_spill] sm:$0xff]  ;;  %v5989_v59 = vpop.permute.xlu2 %884  ;;  %v1908_v56 = vmul.f32 %v5751_v60, %v1012_v63  ;;  %v989_v46 = vsel %vm925_vm13, %v7188_v33, %v3877_v18  ;;  %v995_v52 = vsel %vm931_vm3, %v7201_v61, %v3883_v14 }
 0x3e3   : > { %v1885_v8 = vmul.f32 %v7190_v4, %v989_v46  ;;  %v7192_v60 = vld [vmem:[#allocation121_spill] sm:$0xff]  ;;  %vm957_vm4 = vcmp.eq.s32.totalorder %v5989_v59, 1  ;;  %v7206_v46 = vld [vmem:[#allocation126_spill] sm:$0xff]  ;;  %v3885_v59 = vld [vmem:[%s4151_s9 + $0x1a0] sm:$0xff] }
 0x3e4   : > { %v2025_v10 = vsel %vm1922_vm10, %v1892_v28, 0.0  ;;  %v2073_v29 = vsel %vm1922_vm10, %v1908_v56, 0.0  ;;  %v3878_v28 = vld [vmem:[%s4151_s9 + $0x1a8] sm:$0xff]  ;;  %vm928_vm0 = vcmp.eq.s32.totalorder %v7192_v60, 1  ;;  %v7204_v24 = vld [vmem:[#allocation101_spill] sm:$0xff]  ;;  %vm934_vm6 = vcmp.eq.s32.totalorder %v7206_v46, 1 }
 0x3e5   : > { %2017 = vadd.xlane.f32.xlu0 %v2016_v13  ;;  %v1891_v63 = vmul.f32 %v7204_v24, %v995_v52 }
 0x3e6   : > { %2038 = vadd.xlane.f32.xlu2 %v2037_v22  ;;  %v3876_v22 = vld [vmem:[%s4151_s9 + $0x158] sm:$0xff] }
 0x3e7   : > { %v819_v21 = vpop.permute.xlu1 %818 }
 0x3e8   : > { %vm935_vm5 = vcmp.eq.s32.totalorder %v819_v21, 1 }
 0x3e9   : > { %1954 = vadd.xlane.f32.xlu1 %v1953_v32  ;;  %v999_v36 = vsel %vm935_vm5, %v7177_v49, %v3870_v1  ;;  %v7189_v32 = vld [vmem:[#allocation61_spill] sm:$0xff]  ;;  %v2004_v1 = vsel %vm1922_vm10, %v1885_v8, 0.0  ;;  %v2022_v8 = vsel %vm1922_vm10, %v1891_v63, 0.0 }
 0x3ea   : > { %v1895_v20 = vmul.f32 %v5632_v45, %v999_v36  ;;  %v7181_v45 = vld [vmem:[#allocation77_spill] sm:$0xff]  ;;  %v6010_v57 = vpop.permute.xlu2 %893  ;;  %v7194_v36 = vld [vmem:[#allocation131_spill] sm:$0xff] }
 0x3ec   : > { %v2034_v27 = vsel %vm1922_vm10, %v1895_v20, 0.0 }
 0x3ed   : > { %2026 = vadd.xlane.f32.xlu0 %v2025_v10  ;;  %v7193_v10 = vld [vmem:[#allocation48_spill] sm:$0xff] }
 0x3ee   : > { %2047 = vadd.xlane.f32.xlu2 %v2046_v34  ;;  %v1015_v34 = vsel %vm951_vm14, %v7191_v51, %v3878_v28  ;;  %v7208_v28 = vld [vmem:[#allocation34_spill] sm:$0xff] }
 0x3ef   : > { %v828_v5 = vpop.permute.xlu1 %827 }
 0x3f0   : > { %vm938_vm8 = vcmp.eq.s32.totalorder %v828_v5, 1  ;;  %v3880_v5 = vld [vmem:[%s4151_s9 + $0xf0] sm:$0xff] }
 0x3f1   : > { %1978 = vadd.xlane.f32.xlu1 %v1977_v37  ;;  %v1002_v35 = vsel %vm938_vm8, %v7181_v45, %v3873_v7  ;;  %v1911_v37 = vmul.f32 %v7194_v36, %v1015_v34  ;;  %v992_v30 = vsel %vm928_vm0, %v7195_v40, %v3880_v5  ;;  %v3882_v7 = vld [vmem:[%s4151_s9 + $0x188] sm:$0xff]  ;;  %v7200_v45 = vld [vmem:[#allocation55_spill] sm:$0xff]  ;;  %vm960_vm8 = vcmp.eq.s32.totalorder %v6010_v57, 1  ;;  %v1949_v36 = vpop.xlane.xlu0 %1948  ;;  %v7212_v5 = vld [vmem:[#allocation25_spill] sm:$0xff] }
 0x3f2   : > { %v1898_v16 = vmul.f32 %v7183_v0, %v1002_v35  ;;  %v6029_v49 = vpop.permute.xlu2 %1790  ;;  %v1888_v9 = vmul.f32 %v7197_v50, %v992_v30  ;;  %v3886_v34 = vld [vmem:[%s4151_s9 + $0x120] sm:$0xff]  ;;  %vm937_vm9 = vcmp.eq.s32.totalorder %v7212_v5, 1  ;;  %v3887_v40 = vld [vmem:[%s4151_s9 + $0x1b8] sm:$0xff]  ;;  %v7213_v30 = vld [vmem:[#allocation72_spill] sm:$0xff]  ;;  %v2243_v6 = vperm.slane %v1949_v36, 0 }
 0x3f3   : > { %v3888_v50 = vld [vmem:[%s4151_s9 + $0x1f0] sm:$0xff]  ;;  %v2245_v61 = vperm.slane %v1949_v36, 2  ;;  %v2246_v52 = vperm.slane %v1949_v36, 3  ;;  %v2250_v63 = vperm.slane %v1949_v36, 7 }
 0x3f4   : > { %v2043_v25 = vsel %vm1922_vm10, %v1898_v16, 0.0 }
 0x3f5   : > { %2035 = vadd.xlane.f32.xlu0 %v2034_v27  ;;  %v1018_v27 = vsel %vm954_vm1, %v7199_v48, %v3881_v44  ;;  %v3889_v48 = vld [vmem:[%s4151_s9 + $0x138] sm:$0xff] }
 0x3f6   : > { %2056 = vadd.xlane.f32.xlu2 %v2055_v17  ;;  %v2082_v17 = vsel %vm1922_vm10, %v1911_v37, 0.0  ;;  %v1914_v0 = vmul.f32 %v7202_v62, %v1018_v27  ;;  %v7215_v27 = vld [vmem:[#allocation54_spill] sm:$0xff]  ;;  %v2248_v62 = vperm.slane %v1949_v36, 5 }
 0x3f7   : > { %v837_v26 = vpop.permute.xlu1 %836 }
 0x3f8   : > { %vm941_vm12 = vcmp.eq.s32.totalorder %v837_v26, 1 }
 0x3f9   : > { %1987 = vadd.xlane.f32.xlu1 %v1986_v54  ;;  %v1005_v41 = vsel %vm941_vm12, %v7187_v39, %v3876_v22  ;;  %v2013_v54 = vsel %vm1922_vm10, %v1888_v9, 0.0  ;;  %v7214_v9 = vld [vmem:[#allocation129_spill] sm:$0xff] }
 0x3fa   : > { %v1901_v21 = vmul.f32 %v7189_v32, %v1005_v41  ;;  %v2091_v41 = vsel %vm1922_vm10, %v1914_v0, 0.0  ;;  %v7207_v32 = vld [vmem:[#allocation38_spill] sm:$0xff] }
 0x3fc   : > { %v2052_v42 = vsel %vm1922_vm10, %v1901_v21, 0.0 }
 0x3fd   : > { %2044 = vadd.xlane.f32.xlu0 %v2043_v25  ;;  %v6050_v25 = vld [vmem:[#allocation1] sm:$0xff] }
 0x3fe   : > { %2065 = vadd.xlane.f32.xlu2 %v2064_v23  ;;  %v7203_v23 = vld [vmem:[#allocation96_spill] sm:$0xff] }
 0x3ff   : > { %v846_v13 = vpop.permute.xlu1 %845 }
 0x400   : > { %vm944_vm15 = vcmp.eq.s32.totalorder %v846_v13, 1  ;;  %v7205_v13 = vld [vmem:[#allocation81_spill] sm:$0xff] }
 0x401   : > { %1996 = vadd.xlane.f32.xlu1 %v1995_v19  ;;  %v1008_v47 = vsel %vm944_vm15, %v7193_v10, %v3879_v31  ;;  %v3884_v19 = vld [vmem:[%s4151_s9 + $0x1d8] sm:$0xff]  ;;  %v7210_v31 = vld [vmem:[#allocation132_spill] sm:$0xff] }
 0x402   : > { %v1904_v20 = vmul.f32 %v7196_v38, %v1008_v47  ;;  %v1021_v56 = vsel %vm957_vm4, %v7205_v13, %v3884_v19  ;;  %v7211_v47 = vld [vmem:[#allocation88_spill] sm:$0xff]  ;;  %v7221_v19 = vld [vmem:[#allocation86_spill] sm:$0xff] }
 0x403   : > { %v1917_v51 = vmul.f32 %v7208_v28, %v1021_v56  ;;  %v7222_v56 = vld [vmem:[#allocation47_spill] sm:$0xff] }
 0x404   : > { %v2061_v3 = vsel %vm1922_vm10, %v1904_v20, 0.0 }
 0x405   : > { %2053 = vadd.xlane.f32.xlu0 %v2052_v42  ;;  %v7209_v42 = vld [vmem:[#allocation76_spill] sm:$0xff] }
 0x406   : > { %2074 = vadd.xlane.f32.xlu2 %v2073_v29  ;;  %v998_v60 = vsel %vm934_vm6, %v7209_v42, %v3886_v34  ;;  %v3893_v34 = vld [vmem:[%s4151_s9 + $0x168] sm:$0xff]  ;;  %vm3479_vm6 = vcmask 261312  }
 0x407   : > { %v855_v43 = vpop.permute.xlu1 %854  ;;  %v7225_v42 = vld [vmem:[#allocation60_spill] sm:$0xff] }
 0x408   : > { %vm947_vm2 = vcmp.eq.s32.totalorder %v855_v43, 1  ;;  %v2100_v43 = vsel %vm1922_vm10, %v1917_v51, 0.0 }
 0x409   : > { %2005 = vadd.xlane.f32.xlu1 %v2004_v1  ;;  %v1011_v35 = vsel %vm947_vm2, %v7200_v45, %v3882_v7  ;;  %v1894_v1 = vmul.f32 %v7211_v47, %v998_v60  ;;  %v2244_v7 = vperm.slane %v1949_v36, 1 }
 0x40a   : > { %v1907_v2 = vmul.f32 %v7203_v23, %v1011_v35  ;;  %v7216_v35 = vld [vmem:[#allocation98_spill] sm:$0xff] }
 0x40b   : > { %v2031_v20 = vsel %vm1922_vm10, %v1894_v1, 0.0  ;;  %v7219_v23 = vld [vmem:[#allocation42_spill] sm:$0xff] }
 0x40c   : > { %v2070_v33 = vsel %vm1922_vm10, %v1907_v2, 0.0  ;;  %v7227_v1 = vld [vmem:[#allocation90_spill] sm:$0xff] }
 0x40d   : > { %2062 = vadd.xlane.f32.xlu0 %v2061_v3  ;;  %v1001_v3 = vsel %vm937_vm9, %v7215_v27, %v3889_v48  ;;  %v7231_v48 = vld [vmem:[#allocation102_spill] sm:$0xff]  ;;  %v7232_v27 = vld [vmem:[#allocation133_spill] sm:$0xff]  ;;  %vm3491_vm9 = vcmask 458112  }
 0x40e   : > { %2083 = vadd.xlane.f32.xlu2 %v2082_v17  ;;  %v1024_v17 = vsel %vm960_vm8, %v7214_v9, %v3888_v50  ;;  %v3894_v9 = vld [vmem:[%s4151_s9 + $0x180] sm:$0xff]  ;;  %vm949_vm0 = vcmp.eq.s32.totalorder %v7232_v27, 1  ;;  %vm3487_vm8 = vcmask 392512  }
 0x40f   : > { %v1920_v44 = vmul.f32 %v6029_v49, %v1024_v17  ;;  %v7229_v17 = vld [vmem:[#allocation82_spill] sm:$0xff] }
 0x411   : > { %2014 = vadd.xlane.f32.xlu1 %v2013_v54  ;;  %v864_v26 = vpop.permute.xlu1 %863  ;;  %v1946_v53 = vpop.xlane.xlu2 %1945  ;;  %v2109_v49 = vsel %vm1922_vm10, %v1920_v44, 0.0 }
 0x412   : > { %v2235_v16 = vperm.slane %v1946_v53, 0  ;;  %v2236_v15 = vperm.slane %v1946_v53, 1  ;;  %v2237_v12 = vperm.slane %v1946_v53, 2  ;;  %v2238_v58 = vperm.slane %v1946_v53, 3 }
 0x413   : > { %vm950_vm5 = vcmp.eq.s32.totalorder %v864_v26, 1  ;;  %v2239_v22 = vperm.slane %v1946_v53, 4  ;;  %v2240_v39 = vperm.slane %v1946_v53, 5  ;;  %v2241_v18 = vperm.slane %v1946_v53, 6  ;;  %v7217_v26 = vld [vmem:[#allocation104_spill] sm:$0xff] }
 0x414   : > { %2761 = vst [vmem:[#allocation1] ss:$9 sm:$0xff] %v2235_v16  ;;  %v1014_v21 = vsel %vm950_vm5, %v7207_v32, %v3885_v59  ;;  %v2242_v4 = vperm.slane %v1946_v53, 7  ;;  %v1897_v14 = vmul.f32 %v7217_v26, %v1001_v3  ;;  %v2247_v53 = vperm.slane %v1949_v36, 4  ;;  %v7218_v16 = vld [vmem:[#allocation53_spill] sm:$0xff]  ;;  %v7223_v59 = vld [vmem:[#allocation59_spill] sm:$0xff] }
 0x415   : > { %2762 = vst [vmem:[#allocation1 + $0x1] ss:$9 sm:$0xff] %v2236_v15  ;;  %2071 = vadd.xlane.f32.xlu0 %v2070_v33  ;;  %v1910_v10 = vmul.f32 %v7210_v31, %v1014_v21  ;;  %vm940_vm12 = vcmp.eq.s32.totalorder %v7218_v16, 1  ;;  %v2249_v15 = vperm.slane %v1949_v36, 6  ;;  %v1952_v33 = vpop.xlane.xlu0 %1951  ;;  %vm943_vm14 = vcmp.eq.s32.totalorder %v7223_v59, 1  ;;  %v3892_v32 = vld [vmem:[%s4151_s9 + $0x1e8] sm:$0xff] }
 0x416   : > { %2763 = vst [vmem:[#allocation1 + $0x2] ss:$9 sm:$0xff] %v2237_v12  ;;  %2092 = vadd.xlane.f32.xlu2 %v2091_v41  ;;  %v3890_v12 = vld [vmem:[%s4151_s9 + $0x1d0] sm:$0xff]  ;;  %v2040_v24 = vsel %vm1922_vm10, %v1897_v14, 0.0  ;;  %v7224_v21 = vld [vmem:[#allocation50_spill] sm:$0xff]  ;;  %v2252_v28 = vperm.slane %v1952_v33, 1  ;;  %v1007_v60 = vsel %vm943_vm14, %v7225_v42, %v3893_v34 }
 0x417   : > { %2764 = vst [vmem:[#allocation1 + $0x3] ss:$9 sm:$0xff] %v2238_v58  ;;  %v2079_v37 = vsel %vm1922_vm10, %v1910_v10, 0.0  ;;  %v2253_v31 = vperm.slane %v1952_v33, 2  ;;  %v7226_v10 = vld [vmem:[#allocation120_spill] sm:$0xff]  ;;  %v2254_v36 = vperm.slane %v1952_v33, 3 }
 0x418   : > { %2765 = vst [vmem:[#allocation1 + $0x4] ss:$9 sm:$0xff] %v2239_v22  ;;  %v3891_v22 = vld [vmem:[%s4151_s9 + $0x150] sm:$0xff]  ;;  %v2256_v5 = vperm.slane %v1952_v33, 5  ;;  %v7234_v26 = vld [vmem:[#allocation92_spill] sm:$0xff]  ;;  %v7238_v16 = vld [vmem:[#allocation94_spill] sm:$0xff] }
 0x419   : > { %2023 = vadd.xlane.f32.xlu1 %v2022_v8  ;;  %v873_v29 = vpop.permute.xlu1 %872  ;;  %2766 = vst [vmem:[#allocation1 + $0x5] ss:$9 sm:$0xff] %v2240_v39  ;;  %v7220_v39 = vld [vmem:[#allocation80_spill] sm:$0xff]  ;;  %vm3471_vm5 = vcmask 130112   ;;  %vm3507_vm14 = vcmask 720512  }
 0x41a   : > { %2767 = vst [vmem:[#allocation1 + $0x6] ss:$9 sm:$0xff] %v2241_v18  ;;  %vm953_vm7 = vcmp.eq.s32.totalorder %v873_v29, 1  ;;  %v1004_v41 = vsel %vm940_vm12, %v7220_v39, %v3891_v22  ;;  %v2251_v29 = vperm.slane %v1952_v33, 0  ;;  %v7242_v22 = vld [vmem:[#allocation95_spill] sm:$0xff]  ;;  %vm3499_vm12 = vcmask 589312  }
 0x41b   : > { %2768 = vst [vmem:[#allocation1 + $0x7] ss:$9 sm:$0xff] %v2242_v4  ;;  %v1017_v38 = vsel %vm953_vm7, %v7213_v30, %v3887_v40  ;;  %v1900_v18 = vmul.f32 %v7222_v56, %v1004_v41  ;;  %v2257_v40 = vperm.slane %v1952_v33, 6  ;;  %vm3483_vm7 = vcmask 326912  }
 0x41c   : > { %v1913_v54 = vmul.f32 %v7216_v35, %v1017_v38  ;;  %v7228_v38 = vld [vmem:[#allocation67_spill] sm:$0xff]  ;;  %v7233_v35 = vld [vmem:[#allocation66_spill] sm:$0xff] }
 0x41d   : > { %2080 = vadd.xlane.f32.xlu0 %v2079_v37  ;;  %v2049_v8 = vsel %vm1922_vm10, %v1900_v18, 0.0  ;;  %v2255_v37 = vperm.slane %v1952_v33, 4  ;;  %vm946_vm15 = vcmp.eq.s32.totalorder %v7228_v38, 1  ;;  %v7245_v18 = vld [vmem:[#allocation87_spill] sm:$0xff] }
 0x41e   : > { %2101 = vadd.xlane.f32.xlu2 %v2100_v43  ;;  %v2088_v0 = vsel %vm1922_vm10, %v1913_v54, 0.0  ;;  %v1903_v43 = vmul.f32 %v7227_v1, %v1007_v60 }
 0x420   : > { %v2058_v50 = vsel %vm1922_vm10, %v1903_v43, 0.0 }
 0x421   : > { %2032 = vadd.xlane.f32.xlu1 %v2031_v20  ;;  %v882_v57 = vpop.permute.xlu1 %881  ;;  %v2258_v20 = vperm.slane %v1952_v33, 7 }
 0x422   : > { %v6078_v45 = vld [vmem:[#allocation1] sm:$0xff]  ;;  %vm956_vm11 = vcmp.eq.s32.totalorder %v882_v57, 1  ;;  %v1010_v57 = vsel %vm946_vm15, %v7229_v17, %v3894_v9  ;;  %vm3511_vm15 = vcmask 786112  }
 0x423   : > { %2770 = vst [vmem:[#allocation1] ss:$9 sm:$0xff] %v2243_v6  ;;  %v1020_v2 = vsel %vm956_vm11, %v7219_v23, %v3890_v12  ;;  %v7230_v6 = vld [vmem:[#allocation108_spill] sm:$0xff]  ;;  %vm3495_vm11 = vcmask 523712  }
 0x424   : > { %2771 = vst [vmem:[#allocation1 + $0x1] ss:$9 sm:$0xff] %v2244_v7  ;;  %v1916_v13 = vmul.f32 %v7221_v19, %v1020_v2  ;;  %v1906_v44 = vmul.f32 %v7230_v6, %v1010_v57  ;;  %v3895_v7 = vld [vmem:[%s4151_s9 + $0x198] sm:$0xff]  ;;  %v7239_v12 = vld [vmem:[#allocation68_spill] sm:$0xff] }
 0x425   : > { %2772 = vst [vmem:[#allocation1 + $0x2] ss:$9 sm:$0xff] %v2245_v61  ;;  %2089 = vadd.xlane.f32.xlu0 %v2088_v0  ;;  %v1013_v54 = vsel %vm949_vm0, %v7233_v35, %v3895_v7  ;;  %v7235_v61 = vld [vmem:[#allocation117_spill] sm:$0xff]  ;;  %v7240_v23 = vld [vmem:[#allocation44_spill] sm:$0xff]  ;;  %v7243_v19 = vld [vmem:[#allocation74_spill] sm:$0xff]  ;;  %vm3515_vm0 = vcmask 851712  }
 0x426   : > { %2773 = vst [vmem:[#allocation1 + $0x3] ss:$9 sm:$0xff] %v2246_v52  ;;  %2110 = vadd.xlane.f32.xlu2 %v2109_v49  ;;  %v2097_v46 = vsel %vm1922_vm10, %v1916_v13, 0.0  ;;  %v2067_v3 = vsel %vm1922_vm10, %v1906_v44, 0.0  ;;  %v1909_v14 = vmul.f32 %v7234_v26, %v1013_v54  ;;  %v7236_v52 = vld [vmem:[#allocation30_spill] sm:$0xff]  ;;  %v3896_v49 = vld [vmem:[%s4151_s9 + $0x1b0] sm:$0xff] }
 0x427   : > { %2774 = vst [vmem:[#allocation1 + $0x4] ss:$9 sm:$0xff] %v2247_v53  ;;  %vm952_vm1 = vcmp.eq.s32.totalorder %v7236_v52, 1  ;;  %vm955_vm2 = vcmp.eq.s32.totalorder %v7240_v23, 1  ;;  %v7244_v13 = vld [vmem:[#allocation62_spill] sm:$0xff] }
 0x428   : > { %2775 = vst [vmem:[#allocation1 + $0x5] ss:$9 sm:$0xff] %v2248_v62  ;;  %v2076_v53 = vsel %vm1922_vm10, %v1909_v14, 0.0  ;;  %v7237_v62 = vld [vmem:[#allocation84_spill] sm:$0xff]  ;;  %vm958_vm3 = vcmp.eq.s32.totalorder %v7244_v13, 1 }
 0x429   : > { %2041 = vadd.xlane.f32.xlu1 %v2040_v24  ;;  %2776 = vst [vmem:[#allocation1 + $0x6] ss:$9 sm:$0xff] %v2249_v15  ;;  %v891_v58 = vpop.permute.xlu1 %890  ;;  %v1016_v0 = vsel %vm952_vm1, %v7237_v62, %v3896_v49  ;;  %v3897_v24 = vld [vmem:[%s4151_s9 + $0x1c8] sm:$0xff]  ;;  %vm3519_vm1 = vcmask 917312  }
 0x42a   : > { %2777 = vst [vmem:[#allocation1 + $0x7] ss:$9 sm:$0xff] %v2250_v63  ;;  %vm959_vm13 = vcmp.eq.s32.totalorder %v891_v58, 1  ;;  %v1912_v15 = vmul.f32 %v7238_v16, %v1016_v0  ;;  %v7241_v63 = vld [vmem:[#allocation71_spill] sm:$0xff] }
 0x42b   : > { %v1023_v4 = vsel %vm959_vm13, %v7224_v21, %v3892_v32  ;;  %v1019_v58 = vsel %vm955_vm2, %v7241_v63, %v3897_v24  ;;  %vm3503_vm13 = vcmask 654912   ;;  %vm3523_vm2 = vcmask 982912  }
 0x42c   : > { %v1919_v47 = vmul.f32 %v7226_v10, %v1023_v4  ;;  %v2085_v2 = vsel %vm1922_vm10, %v1912_v15, 0.0  ;;  %v1915_v39 = vmul.f32 %v7242_v22, %v1019_v58  ;;  %v1970_v22 = vpop.xlane.xlu2 %1969 }
 0x42d   : > { %2098 = vadd.xlane.f32.xlu0 %v2097_v46  ;;  %v7246_v46 = vld [vmem:[#allocation97_spill] sm:$0xff] }
 0x42e   : > { %v2106_v30 = vsel %vm1922_vm10, %v1919_v47, 0.0  ;;  %v2094_v56 = vsel %vm1922_vm10, %v1915_v39, 0.0  ;;  %v2299_v39 = vperm.slane %v1970_v22, 0 }
 0x431   : > { %2050 = vadd.xlane.f32.xlu1 %v2049_v8  ;;  %v2778_v51 = vld [vmem:[#allocation1] sm:$0xff]  ;;  %v6126_v41 = vpop.permute.xlu1 %1792 }
 0x432   : > { %2779 = vst [vmem:[#allocation1] ss:$9 sm:$0xff] %v2251_v29 }
 0x433   : > { %2780 = vst [vmem:[#allocation1 + $0x1] ss:$9 sm:$0xff] %v2252_v28 }
 0x434   : > { %2781 = vst [vmem:[#allocation1 + $0x2] ss:$9 sm:$0xff] %v2253_v31 }
 0x435   : > { %2782 = vst [vmem:[#allocation1 + $0x3] ss:$9 sm:$0xff] %v2254_v36  ;;  %2107 = vadd.xlane.f32.xlu0 %v2106_v30 }
 0x436   : > { %2783 = vst [vmem:[#allocation1 + $0x4] ss:$9 sm:$0xff] %v2255_v37 }
 0x437   : > { %2784 = vst [vmem:[#allocation1 + $0x5] ss:$9 sm:$0xff] %v2256_v5 }
 0x438   : > { %2785 = vst [vmem:[#allocation1 + $0x6] ss:$9 sm:$0xff] %v2257_v40 }
 0x439   : > { %2059 = vadd.xlane.f32.xlu1 %v2058_v50  ;;  %2786 = vst [vmem:[#allocation1 + $0x7] ss:$9 sm:$0xff] %v2258_v20 }
 0x43e   : > { %3278 = vperm.xlu2 %3832, %v7231_v48  }
 0x440   : > { %v6135_v29 = vld [vmem:[#allocation1] sm:$0xff] }
 0x441   : > { %2068 = vadd.xlane.f32.xlu1 %v2067_v3 }
 0x446   : > { %3284 = vperm.xlu2 %3832, %v7235_v61  }
 0x449   : > { %2077 = vadd.xlane.f32.xlu1 %v2076_v53  ;;  %896 = vperm.xlu0 %3831, %v7239_v12  }
 0x44e   : > { %3290 = vperm.xlu2 %3832, %v5863_v11   ;;  %v3898_v11 = vld [vmem:[%s4151_s9 + $0x1e0] sm:$0xff] }
 0x44f   : > { %v1022_v33 = vsel %vm958_vm3, %v7245_v18, %v3898_v11  ;;  %v2302_v11 = vperm.slane %v1970_v22, 3  ;;  %v2303_v18 = vperm.slane %v1970_v22, 4  ;;  %vm3527_vm3 = vcmask 1048512  }
 0x450   : > { %v1918_v59 = vmul.f32 %v7246_v46, %v1022_v33  ;;  %v2304_v33 = vperm.slane %v1970_v22, 5  ;;  %v2305_v46 = vperm.slane %v1970_v22, 6 }
 0x451   : > { %2086 = vadd.xlane.f32.xlu1 %v2085_v2  ;;  %3275 = vperm.xlu0 %3831, %v7243_v19   ;;  %v2300_v19 = vperm.slane %v1970_v22, 1 }
 0x456   : > { %3299 = vperm.xlu2 %3832, %v2778_v51   ;;  %v2103_v51 = vsel %vm1922_vm10, %v1918_v59, 0.0  ;;  %v2306_v59 = vperm.slane %v1970_v22, 7 }
 0x459   : > { %2095 = vadd.xlane.f32.xlu1 %v2094_v56  ;;  %3296 = vperm.xlu0 %3831, %v6078_v45   ;;  %v1958_v45 = vpop.xlane.xlu0 %1957  ;;  %v2301_v56 = vperm.slane %v1970_v22, 2 }
 0x45a   : > { %v2267_v10 = vperm.slane %v1958_v45, 0  ;;  %v2268_v47 = vperm.slane %v1958_v45, 1  ;;  %v2269_v43 = vperm.slane %v1958_v45, 2  ;;  %v2270_v36 = vperm.slane %v1958_v45, 3 }
 0x45b   : > { %v2271_v37 = vperm.slane %v1958_v45, 4  ;;  %v2272_v5 = vperm.slane %v1958_v45, 5  ;;  %v2273_v40 = vperm.slane %v1958_v45, 6  ;;  %v2274_v30 = vperm.slane %v1958_v45, 7  ;;  %v1976_v45 = vpop.xlane.xlu2 %1975 }
 0x45c   : > { %v1955_v32 = vpop.xlane.xlu1 %1954 }
 0x45d   : > { %v2259_v21 = vperm.slane %v1955_v32, 0  ;;  %v2260_v4 = vperm.slane %v1955_v32, 1  ;;  %v2261_v8 = vperm.slane %v1955_v32, 2  ;;  %v2262_v28 = vperm.slane %v1955_v32, 3 }
 0x45e   : > { %v2263_v34 = vperm.slane %v1955_v32, 4  ;;  %v2264_v42 = vperm.slane %v1955_v32, 5  ;;  %v2265_v60 = vperm.slane %v1955_v32, 6  ;;  %v2266_v31 = vperm.slane %v1955_v32, 7 }
 0x45f   : > { %2788 = vst [vmem:[#allocation1] ss:$9 sm:$0xff] %v2259_v21 }
 0x460   : > { %2789 = vst [vmem:[#allocation1 + $0x1] ss:$9 sm:$0xff] %v2260_v4 }
 0x461   : > { %2104 = vadd.xlane.f32.xlu1 %v2103_v51  ;;  %2790 = vst [vmem:[#allocation1 + $0x2] ss:$9 sm:$0xff] %v2261_v8  ;;  %v1961_v38 = vpop.xlane.xlu0 %1960 }
 0x462   : > { %2791 = vst [vmem:[#allocation1 + $0x3] ss:$9 sm:$0xff] %v2262_v28  ;;  %v2275_v20 = vperm.slane %v1961_v38, 0  ;;  %v2276_v50 = vperm.slane %v1961_v38, 1  ;;  %v2277_v17 = vperm.slane %v1961_v38, 2  ;;  %v2278_v57 = vperm.slane %v1961_v38, 3 }
 0x463   : > { %2792 = vst [vmem:[#allocation1 + $0x4] ss:$9 sm:$0xff] %v2263_v34  ;;  %v2279_v6 = vperm.slane %v1961_v38, 4  ;;  %v2280_v44 = vperm.slane %v1961_v38, 5  ;;  %v2281_v48 = vperm.slane %v1961_v38, 6  ;;  %v2282_v27 = vperm.slane %v1961_v38, 7 }
 0x464   : > { %2793 = vst [vmem:[#allocation1 + $0x5] ss:$9 sm:$0xff] %v2264_v42  ;;  %v1979_v38 = vpop.xlane.xlu1 %1978 }
 0x465   : > { %2794 = vst [vmem:[#allocation1 + $0x6] ss:$9 sm:$0xff] %v2265_v60 }
 0x466   : > { %2795 = vst [vmem:[#allocation1 + $0x7] ss:$9 sm:$0xff] %v2266_v31 }
 0x469   : > { %v1964_v3 = vpop.xlane.xlu0 %1963 }
 0x46a   : > { %v2283_v7 = vperm.slane %v1964_v3, 0  ;;  %v2284_v35 = vperm.slane %v1964_v3, 1  ;;  %v2285_v26 = vperm.slane %v1964_v3, 2  ;;  %v2286_v14 = vperm.slane %v1964_v3, 3 }
 0x46b   : > { %v2287_v61 = vperm.slane %v1964_v3, 4  ;;  %v2288_v52 = vperm.slane %v1964_v3, 5  ;;  %v2289_v53 = vperm.slane %v1964_v3, 6  ;;  %v2290_v49 = vperm.slane %v1964_v3, 7 }
 0x46d   : > { %v2796_v1 = vld [vmem:[#allocation1] sm:$0xff] }
 0x46e   : > { %2797 = vst [vmem:[#allocation1] ss:$9 sm:$0xff] %v2267_v10  ;;  %3305 = vperm.xlu0 %3831, %v2796_v1   ;;  %v2315_v10 = vperm.slane %v1976_v45, 0 }
 0x46f   : > { %2798 = vst [vmem:[#allocation1 + $0x1] ss:$9 sm:$0xff] %v2268_v47  ;;  %v2316_v47 = vperm.slane %v1976_v45, 1 }
 0x470   : > { %2799 = vst [vmem:[#allocation1 + $0x2] ss:$9 sm:$0xff] %v2269_v43  ;;  %v2317_v43 = vperm.slane %v1976_v45, 2 }
 0x471   : > { %2800 = vst [vmem:[#allocation1 + $0x3] ss:$9 sm:$0xff] %v2270_v36  ;;  %v1967_v62 = vpop.xlane.xlu0 %1966  ;;  %v2318_v36 = vperm.slane %v1976_v45, 3 }
 0x472   : > { %2801 = vst [vmem:[#allocation1 + $0x4] ss:$9 sm:$0xff] %v2271_v37  ;;  %v2291_v0 = vperm.slane %v1967_v62, 0  ;;  %v2292_v16 = vperm.slane %v1967_v62, 1  ;;  %v2293_v12 = vperm.slane %v1967_v62, 2  ;;  %v2294_v23 = vperm.slane %v1967_v62, 3 }
 0x473   : > { %2802 = vst [vmem:[#allocation1 + $0x5] ss:$9 sm:$0xff] %v2272_v5  ;;  %v2295_v2 = vperm.slane %v1967_v62, 4  ;;  %v2296_v24 = vperm.slane %v1967_v62, 5  ;;  %v2297_v63 = vperm.slane %v1967_v62, 6  ;;  %v2298_v58 = vperm.slane %v1967_v62, 7 }
 0x474   : > { %2803 = vst [vmem:[#allocation1 + $0x6] ss:$9 sm:$0xff] %v2273_v40  ;;  %v2319_v37 = vperm.slane %v1976_v45, 4  ;;  %v2320_v5 = vperm.slane %v1976_v45, 5  ;;  %v2321_v40 = vperm.slane %v1976_v45, 6 }
 0x475   : > { %2804 = vst [vmem:[#allocation1 + $0x7] ss:$9 sm:$0xff] %v2274_v30  ;;  %v2322_v30 = vperm.slane %v1976_v45, 7 }
 0x479   : > { %v1973_v32 = vpop.xlane.xlu0 %1972 }
 0x47a   : > { %v2307_v21 = vperm.slane %v1973_v32, 0  ;;  %v2308_v4 = vperm.slane %v1973_v32, 1  ;;  %v2309_v28 = vperm.slane %v1973_v32, 2  ;;  %v2310_v51 = vperm.slane %v1973_v32, 3 }
 0x47b   : > { %v2311_v34 = vperm.slane %v1973_v32, 4  ;;  %v2312_v42 = vperm.slane %v1973_v32, 5  ;;  %v2313_v60 = vperm.slane %v1973_v32, 6  ;;  %v2314_v31 = vperm.slane %v1973_v32, 7 }
 0x47c   : > { %v2805_v9 = vld [vmem:[#allocation1] sm:$0xff] }
 0x47d   : > { %2806 = vst [vmem:[#allocation1] ss:$9 sm:$0xff] %v2275_v20  ;;  %3308 = vperm.xlu2 %3832, %v2805_v9   ;;  %v2323_v20 = vperm.slane %v1979_v38, 0 }
 0x47e   : > { %2807 = vst [vmem:[#allocation1 + $0x1] ss:$9 sm:$0xff] %v2276_v50  ;;  %v2324_v50 = vperm.slane %v1979_v38, 1 }
 0x47f   : > { %2808 = vst [vmem:[#allocation1 + $0x2] ss:$9 sm:$0xff] %v2277_v17  ;;  %v2325_v17 = vperm.slane %v1979_v38, 2 }
 0x480   : > { %2809 = vst [vmem:[#allocation1 + $0x3] ss:$9 sm:$0xff] %v2278_v57  ;;  %v2326_v57 = vperm.slane %v1979_v38, 3 }
 0x481   : > { %2810 = vst [vmem:[#allocation1 + $0x4] ss:$9 sm:$0xff] %v2279_v6  ;;  %v2327_v6 = vperm.slane %v1979_v38, 4  ;;  %v1982_v3 = vpop.xlane.xlu0 %1981 }
 0x482   : > { %2811 = vst [vmem:[#allocation1 + $0x5] ss:$9 sm:$0xff] %v2280_v44  ;;  %v2328_v44 = vperm.slane %v1979_v38, 5  ;;  %v2338_v62 = vperm.slane %v1982_v3, 7 }
 0x483   : > { %2812 = vst [vmem:[#allocation1 + $0x6] ss:$9 sm:$0xff] %v2281_v48  ;;  %v2329_v48 = vperm.slane %v1979_v38, 6 }
 0x484   : > { %2813 = vst [vmem:[#allocation1 + $0x7] ss:$9 sm:$0xff] %v2282_v27  ;;  %v2330_v27 = vperm.slane %v1979_v38, 7 }
 0x48b   : > { %v6138_v54 = vld [vmem:[#allocation1] sm:$0xff] }
 0x48c   : > { %2815 = vst [vmem:[#allocation1] ss:$9 sm:$0xff] %v2283_v7  ;;  %v2331_v7 = vperm.slane %v1982_v3, 0 }
 0x48d   : > { %2816 = vst [vmem:[#allocation1 + $0x1] ss:$9 sm:$0xff] %v2284_v35  ;;  %v2332_v35 = vperm.slane %v1982_v3, 1 }
 0x48e   : > { %2817 = vst [vmem:[#allocation1 + $0x2] ss:$9 sm:$0xff] %v2285_v26 }
 0x48f   : > { %2818 = vst [vmem:[#allocation1 + $0x3] ss:$9 sm:$0xff] %v2286_v14  ;;  %v2333_v14 = vperm.slane %v1982_v3, 2 }
 0x490   : > { %2819 = vst [vmem:[#allocation1 + $0x4] ss:$9 sm:$0xff] %v2287_v61  ;;  %v2334_v61 = vperm.slane %v1982_v3, 3 }
 0x491   : > { %2820 = vst [vmem:[#allocation1 + $0x5] ss:$9 sm:$0xff] %v2288_v52  ;;  %v2335_v52 = vperm.slane %v1982_v3, 4 }
 0x492   : > { %2821 = vst [vmem:[#allocation1 + $0x6] ss:$9 sm:$0xff] %v2289_v53  ;;  %v2336_v53 = vperm.slane %v1982_v3, 5 }
 0x493   : > { %2822 = vst [vmem:[#allocation1 + $0x7] ss:$9 sm:$0xff] %v2290_v49  ;;  %v2337_v49 = vperm.slane %v1982_v3, 6 }
 0x49a   : > { %v2823_v15 = vld [vmem:[#allocation1] sm:$0xff] }
 0x49b   : > { %2824 = vst [vmem:[#allocation1] ss:$9 sm:$0xff] %v2291_v0  ;;  %3314 = vperm.xlu0 %3831, %v2823_v15   ;;  %v1985_v0 = vpop.xlane.xlu2 %1984 }
 0x49c   : > { %2825 = vst [vmem:[#allocation1 + $0x1] ss:$9 sm:$0xff] %v2292_v16  ;;  %v2339_v16 = vperm.slane %v1985_v0, 0  ;;  %v2340_v15 = vperm.slane %v1985_v0, 1  ;;  %v2346_v22 = vperm.slane %v1985_v0, 7 }
 0x49d   : > { %2826 = vst [vmem:[#allocation1 + $0x2] ss:$9 sm:$0xff] %v2293_v12 }
 0x49e   : > { %2827 = vst [vmem:[#allocation1 + $0x3] ss:$9 sm:$0xff] %v2294_v23  ;;  %v2341_v23 = vperm.slane %v1985_v0, 2 }
 0x49f   : > { %2828 = vst [vmem:[#allocation1 + $0x4] ss:$9 sm:$0xff] %v2295_v2  ;;  %v2342_v2 = vperm.slane %v1985_v0, 3 }
 0x4a0   : > { %2829 = vst [vmem:[#allocation1 + $0x5] ss:$9 sm:$0xff] %v2296_v24  ;;  %v2343_v24 = vperm.slane %v1985_v0, 4 }
 0x4a1   : > { %2830 = vst [vmem:[#allocation1 + $0x6] ss:$9 sm:$0xff] %v2297_v63  ;;  %v2344_v63 = vperm.slane %v1985_v0, 5 }
 0x4a2   : > { %2831 = vst [vmem:[#allocation1 + $0x7] ss:$9 sm:$0xff] %v2298_v58  ;;  %v2345_v58 = vperm.slane %v1985_v0, 6 }
 0x4a9   : > { %v2832_v13 = vld [vmem:[#allocation1] sm:$0xff] }
 0x4aa   : > { %2833 = vst [vmem:[#allocation1] ss:$9 sm:$0xff] %v2299_v39  ;;  %3317 = vperm.xlu2 %3832, %v2832_v13   ;;  %v1988_v39 = vpop.xlane.xlu1 %1987 }
 0x4ab   : > { %2834 = vst [vmem:[#allocation1 + $0x1] ss:$9 sm:$0xff] %v2300_v19  ;;  %v2347_v19 = vperm.slane %v1988_v39, 0  ;;  %v2348_v13 = vperm.slane %v1988_v39, 1  ;;  %v2354_v32 = vperm.slane %v1988_v39, 7 }
 0x4ac   : > { %2835 = vst [vmem:[#allocation1 + $0x2] ss:$9 sm:$0xff] %v2301_v56 }
 0x4ad   : > { %2836 = vst [vmem:[#allocation1 + $0x3] ss:$9 sm:$0xff] %v2302_v11  ;;  %v2349_v11 = vperm.slane %v1988_v39, 2 }
 0x4ae   : > { %2837 = vst [vmem:[#allocation1 + $0x4] ss:$9 sm:$0xff] %v2303_v18  ;;  %v2350_v18 = vperm.slane %v1988_v39, 3 }
 0x4af   : > { %2838 = vst [vmem:[#allocation1 + $0x5] ss:$9 sm:$0xff] %v2304_v33  ;;  %v2351_v33 = vperm.slane %v1988_v39, 4 }
 0x4b0   : > { %2839 = vst [vmem:[#allocation1 + $0x6] ss:$9 sm:$0xff] %v2305_v46  ;;  %v2352_v46 = vperm.slane %v1988_v39, 5 }
 0x4b1   : > { %2840 = vst [vmem:[#allocation1 + $0x7] ss:$9 sm:$0xff] %v2306_v59  ;;  %v2353_v59 = vperm.slane %v1988_v39, 6 }
 0x4b8   : > { %v6140_v8 = vld [vmem:[#allocation1] sm:$0xff] }
 0x4b9   : > { %2842 = vst [vmem:[#allocation1] ss:$9 sm:$0xff] %v2307_v21  ;;  %v1991_v21 = vpop.xlane.xlu0 %1990 }
 0x4ba   : > { %2843 = vst [vmem:[#allocation1 + $0x1] ss:$9 sm:$0xff] %v2308_v4  ;;  %v2355_v4 = vperm.slane %v1991_v21, 0  ;;  %v2361_v45 = vperm.slane %v1991_v21, 6 }
 0x4bb   : > { %2844 = vst [vmem:[#allocation1 + $0x2] ss:$9 sm:$0xff] %v2309_v28  ;;  %v2356_v28 = vperm.slane %v1991_v21, 1 }
 0x4bc   : > { %2845 = vst [vmem:[#allocation1 + $0x3] ss:$9 sm:$0xff] %v2310_v51 }
 0x4bd   : > { %2846 = vst [vmem:[#allocation1 + $0x4] ss:$9 sm:$0xff] %v2311_v34  ;;  %v2357_v34 = vperm.slane %v1991_v21, 2 }
 0x4be   : > { %2847 = vst [vmem:[#allocation1 + $0x5] ss:$9 sm:$0xff] %v2312_v42  ;;  %v2358_v42 = vperm.slane %v1991_v21, 3 }
 0x4bf   : > { %2848 = vst [vmem:[#allocation1 + $0x6] ss:$9 sm:$0xff] %v2313_v60  ;;  %v2359_v60 = vperm.slane %v1991_v21, 4 }
 0x4c0   : > { %2849 = vst [vmem:[#allocation1 + $0x7] ss:$9 sm:$0xff] %v2314_v31  ;;  %v2360_v31 = vperm.slane %v1991_v21, 5 }
 0x4c7   : > { %v2850_v1 = vld [vmem:[#allocation1] sm:$0xff] }
 0x4c8   : > { %2851 = vst [vmem:[#allocation1] ss:$9 sm:$0xff] %v2315_v10  ;;  %3323 = vperm.xlu0 %3831, %v2850_v1   ;;  %v2362_v10 = vperm.slane %v1991_v21, 7 }
 0x4c9   : > { %2852 = vst [vmem:[#allocation1 + $0x1] ss:$9 sm:$0xff] %v2316_v47  ;;  %v1994_v47 = vpop.xlane.xlu2 %1993 }
 0x4ca   : > { %2853 = vst [vmem:[#allocation1 + $0x2] ss:$9 sm:$0xff] %v2317_v43  ;;  %v2363_v1 = vperm.slane %v1994_v47, 0  ;;  %v2364_v43 = vperm.slane %v1994_v47, 1  ;;  %v2369_v38 = vperm.slane %v1994_v47, 6 }
 0x4cb   : > { %2854 = vst [vmem:[#allocation1 + $0x3] ss:$9 sm:$0xff] %v2318_v36 }
 0x4cc   : > { %2855 = vst [vmem:[#allocation1 + $0x4] ss:$9 sm:$0xff] %v2319_v37  ;;  %v2365_v37 = vperm.slane %v1994_v47, 2 }
 0x4cd   : > { %2856 = vst [vmem:[#allocation1 + $0x5] ss:$9 sm:$0xff] %v2320_v5  ;;  %v2366_v5 = vperm.slane %v1994_v47, 3 }
 0x4ce   : > { %2857 = vst [vmem:[#allocation1 + $0x6] ss:$9 sm:$0xff] %v2321_v40  ;;  %v2367_v40 = vperm.slane %v1994_v47, 4 }
 0x4cf   : > { %2858 = vst [vmem:[#allocation1 + $0x7] ss:$9 sm:$0xff] %v2322_v30  ;;  %v2368_v30 = vperm.slane %v1994_v47, 5 }
 0x4d6   : > { %v2859_v9 = vld [vmem:[#allocation1] sm:$0xff] }
 0x4d7   : > { %2860 = vst [vmem:[#allocation1] ss:$9 sm:$0xff] %v2323_v20  ;;  %3326 = vperm.xlu2 %3832, %v2859_v9   ;;  %v2370_v20 = vperm.slane %v1994_v47, 7 }
 0x4d8   : > { %2861 = vst [vmem:[#allocation1 + $0x1] ss:$9 sm:$0xff] %v2324_v50  ;;  %v1997_v50 = vpop.xlane.xlu1 %1996 }
 0x4d9   : > { %2862 = vst [vmem:[#allocation1 + $0x2] ss:$9 sm:$0xff] %v2325_v17  ;;  %v2371_v9 = vperm.slane %v1997_v50, 0  ;;  %v2372_v17 = vperm.slane %v1997_v50, 1  ;;  %v2377_v3 = vperm.slane %v1997_v50, 6 }
 0x4da   : > { %2863 = vst [vmem:[#allocation1 + $0x3] ss:$9 sm:$0xff] %v2326_v57 }
 0x4db   : > { %2864 = vst [vmem:[#allocation1 + $0x4] ss:$9 sm:$0xff] %v2327_v6  ;;  %v2373_v6 = vperm.slane %v1997_v50, 2 }
 0x4dc   : > { %2865 = vst [vmem:[#allocation1 + $0x5] ss:$9 sm:$0xff] %v2328_v44  ;;  %v2374_v44 = vperm.slane %v1997_v50, 3 }
 0x4dd   : > { %2866 = vst [vmem:[#allocation1 + $0x6] ss:$9 sm:$0xff] %v2329_v48  ;;  %v2375_v48 = vperm.slane %v1997_v50, 4 }
 0x4de   : > { %2867 = vst [vmem:[#allocation1 + $0x7] ss:$9 sm:$0xff] %v2330_v27  ;;  %v2376_v27 = vperm.slane %v1997_v50, 5 }
 0x4e5   : > { %v6142_v26 = vld [vmem:[#allocation1] sm:$0xff] }
 0x4e6   : > { %2869 = vst [vmem:[#allocation1] ss:$9 sm:$0xff] %v2331_v7  ;;  %v2378_v7 = vperm.slane %v1997_v50, 7 }
 0x4e7   : > { %2870 = vst [vmem:[#allocation1 + $0x1] ss:$9 sm:$0xff] %v2332_v35  ;;  %v2000_v35 = vpop.xlane.xlu0 %1999 }
 0x4e8   : > { %2871 = vst [vmem:[#allocation1 + $0x2] ss:$9 sm:$0xff] %v2333_v14  ;;  %v2379_v14 = vperm.slane %v2000_v35, 0  ;;  %v2384_v0 = vperm.slane %v2000_v35, 5 }
 0x4e9   : > { %2872 = vst [vmem:[#allocation1 + $0x3] ss:$9 sm:$0xff] %v2334_v61  ;;  %v2380_v61 = vperm.slane %v2000_v35, 1 }
 0x4ea   : > { %2873 = vst [vmem:[#allocation1 + $0x4] ss:$9 sm:$0xff] %v2335_v52 }
 0x4eb   : > { %2874 = vst [vmem:[#allocation1 + $0x5] ss:$9 sm:$0xff] %v2336_v53  ;;  %v2381_v53 = vperm.slane %v2000_v35, 2 }
 0x4ec   : > { %2875 = vst [vmem:[#allocation1 + $0x6] ss:$9 sm:$0xff] %v2337_v49  ;;  %v2382_v49 = vperm.slane %v2000_v35, 3 }
 0x4ed   : > { %2876 = vst [vmem:[#allocation1 + $0x7] ss:$9 sm:$0xff] %v2338_v62  ;;  %v2383_v62 = vperm.slane %v2000_v35, 4 }
 0x4f4   : > { %v2877_v12 = vld [vmem:[#allocation1] sm:$0xff] }
 0x4f5   : > { %2878 = vst [vmem:[#allocation1] ss:$9 sm:$0xff] %v2339_v16  ;;  %3332 = vperm.xlu0 %3831, %v2877_v12   ;;  %v2385_v16 = vperm.slane %v2000_v35, 6  ;;  %v2003_v12 = vpop.xlane.xlu2 %2002 }
 0x4f6   : > { %2879 = vst [vmem:[#allocation1 + $0x1] ss:$9 sm:$0xff] %v2340_v15  ;;  %v2386_v15 = vperm.slane %v2000_v35, 7  ;;  %v2392_v39 = vperm.slane %v2003_v12, 5 }
 0x4f7   : > { %2880 = vst [vmem:[#allocation1 + $0x2] ss:$9 sm:$0xff] %v2341_v23  ;;  %v2387_v23 = vperm.slane %v2003_v12, 0 }
 0x4f8   : > { %2881 = vst [vmem:[#allocation1 + $0x3] ss:$9 sm:$0xff] %v2342_v2  ;;  %v2388_v2 = vperm.slane %v2003_v12, 1 }
 0x4f9   : > { %2882 = vst [vmem:[#allocation1 + $0x4] ss:$9 sm:$0xff] %v2343_v24 }
 0x4fa   : > { %2883 = vst [vmem:[#allocation1 + $0x5] ss:$9 sm:$0xff] %v2344_v63  ;;  %v2389_v63 = vperm.slane %v2003_v12, 2 }
 0x4fb   : > { %2884 = vst [vmem:[#allocation1 + $0x6] ss:$9 sm:$0xff] %v2345_v58  ;;  %v2390_v58 = vperm.slane %v2003_v12, 3 }
 0x4fc   : > { %2885 = vst [vmem:[#allocation1 + $0x7] ss:$9 sm:$0xff] %v2346_v22  ;;  %v2391_v22 = vperm.slane %v2003_v12, 4 }
 0x503   : > { %v2886_v56 = vld [vmem:[#allocation1] sm:$0xff] }
 0x504   : > { %2887 = vst [vmem:[#allocation1] ss:$9 sm:$0xff] %v2347_v19  ;;  %3335 = vperm.xlu2 %3832, %v2886_v56   ;;  %v2393_v19 = vperm.slane %v2003_v12, 6  ;;  %v2009_v56 = vpop.xlane.xlu0 %2008 }
 0x505   : > { %2888 = vst [vmem:[#allocation1 + $0x1] ss:$9 sm:$0xff] %v2348_v13  ;;  %v2394_v13 = vperm.slane %v2003_v12, 7  ;;  %v2404_v47 = vperm.slane %v2009_v56, 1 }
 0x506   : > { %2889 = vst [vmem:[#allocation1 + $0x2] ss:$9 sm:$0xff] %v2349_v11  ;;  %v2012_v11 = vpop.xlane.xlu2 %2011 }
 0x507   : > { %2890 = vst [vmem:[#allocation1 + $0x3] ss:$9 sm:$0xff] %v2350_v18  ;;  %v2006_v18 = vpop.xlane.xlu1 %2005  ;;  %v2418_v35 = vperm.slane %v2012_v11, 7 }
 0x508   : > { %2891 = vst [vmem:[#allocation1 + $0x4] ss:$9 sm:$0xff] %v2351_v33  ;;  %v2395_v33 = vperm.slane %v2006_v18, 0  ;;  %v2397_v21 = vperm.slane %v2006_v18, 2 }
 0x509   : > { %2892 = vst [vmem:[#allocation1 + $0x5] ss:$9 sm:$0xff] %v2352_v46  ;;  %v2396_v46 = vperm.slane %v2006_v18, 1 }
 0x50a   : > { %2893 = vst [vmem:[#allocation1 + $0x6] ss:$9 sm:$0xff] %v2353_v59 }
 0x50b   : > { %2894 = vst [vmem:[#allocation1 + $0x7] ss:$9 sm:$0xff] %v2354_v32 }
 0x50c   : > { %v6148_v32 = vpop.xlane.xlu0 %2017 }
 0x512   : > { %v6144_v51 = vld [vmem:[#allocation1] sm:$0xff] }
 0x513   : > { %2896 = vst [vmem:[#allocation1] ss:$9 sm:$0xff] %v2355_v4  ;;  %v2398_v4 = vperm.slane %v2006_v18, 3 }
 0x514   : > { %2897 = vst [vmem:[#allocation1 + $0x1] ss:$9 sm:$0xff] %v2356_v28  ;;  %v2399_v28 = vperm.slane %v2006_v18, 4 }
 0x515   : > { %2898 = vst [vmem:[#allocation1 + $0x2] ss:$9 sm:$0xff] %v2357_v34  ;;  %v2400_v34 = vperm.slane %v2006_v18, 5 }
 0x516   : > { %2899 = vst [vmem:[#allocation1 + $0x3] ss:$9 sm:$0xff] %v2358_v42  ;;  %v2401_v42 = vperm.slane %v2006_v18, 6 }
 0x517   : > { %2900 = vst [vmem:[#allocation1 + $0x4] ss:$9 sm:$0xff] %v2359_v60  ;;  %v6150_v60 = vpop.xlane.xlu2 %2020 }
 0x518   : > { %2901 = vst [vmem:[#allocation1 + $0x5] ss:$9 sm:$0xff] %v2360_v31  ;;  %v2402_v31 = vperm.slane %v2006_v18, 7  ;;  %v2430_v18 = vperm.slane %v6148_v32, 3 }
 0x519   : > { %2902 = vst [vmem:[#allocation1 + $0x6] ss:$9 sm:$0xff] %v2361_v45  ;;  %v6152_v45 = vpop.xlane.xlu0 %2026 }
 0x51a   : > { %2903 = vst [vmem:[#allocation1 + $0x7] ss:$9 sm:$0xff] %v2362_v10  ;;  %v2403_v10 = vperm.slane %v2009_v56, 0 }
 0x521   : > { %v2904_v36 = vld [vmem:[#allocation1] sm:$0xff] }
 0x522   : > { %2905 = vst [vmem:[#allocation1] ss:$9 sm:$0xff] %v2363_v1  ;;  %3341 = vperm.xlu0 %3831, %v2904_v36   ;;  %v2405_v36 = vperm.slane %v2009_v56, 2 }
 0x523   : > { %2906 = vst [vmem:[#allocation1 + $0x1] ss:$9 sm:$0xff] %v2364_v43  ;;  %v6156_v43 = vpop.xlane.xlu2 %2029 }
 0x524   : > { %2907 = vst [vmem:[#allocation1 + $0x2] ss:$9 sm:$0xff] %v2365_v37  ;;  %v2406_v37 = vperm.slane %v2009_v56, 3 }
 0x525   : > { %2908 = vst [vmem:[#allocation1 + $0x3] ss:$9 sm:$0xff] %v2366_v5  ;;  %v2407_v5 = vperm.slane %v2009_v56, 4 }
 0x526   : > { %2909 = vst [vmem:[#allocation1 + $0x4] ss:$9 sm:$0xff] %v2367_v40  ;;  %v2408_v40 = vperm.slane %v2009_v56, 5 }
 0x527   : > { %2910 = vst [vmem:[#allocation1 + $0x5] ss:$9 sm:$0xff] %v2368_v30  ;;  %v2409_v30 = vperm.slane %v2009_v56, 6 }
 0x528   : > { %2911 = vst [vmem:[#allocation1 + $0x6] ss:$9 sm:$0xff] %v2369_v38  ;;  %v2410_v38 = vperm.slane %v2009_v56, 7  ;;  %v2429_v56 = vperm.slane %v6148_v32, 2 }
 0x529   : > { %2912 = vst [vmem:[#allocation1 + $0x7] ss:$9 sm:$0xff] %v2370_v20  ;;  %v6158_v20 = vpop.xlane.xlu0 %2035 }
 0x52b   : > { %v6160_v50 = vpop.xlane.xlu2 %2038 }
 0x530   : > { %v2913_v57 = vld [vmem:[#allocation1] sm:$0xff] }
 0x531   : > { %2914 = vst [vmem:[#allocation1] ss:$9 sm:$0xff] %v2371_v9  ;;  %3344 = vperm.xlu2 %3832, %v2913_v57   ;;  %v2411_v9 = vperm.slane %v2012_v11, 0 }
 0x532   : > { %2915 = vst [vmem:[#allocation1 + $0x1] ss:$9 sm:$0xff] %v2372_v17  ;;  %v2412_v17 = vperm.slane %v2012_v11, 1 }
 0x533   : > { %2916 = vst [vmem:[#allocation1 + $0x2] ss:$9 sm:$0xff] %v2373_v6  ;;  %v2413_v6 = vperm.slane %v2012_v11, 2 }
 0x534   : > { %2917 = vst [vmem:[#allocation1 + $0x3] ss:$9 sm:$0xff] %v2374_v44  ;;  %v6162_v44 = vpop.xlane.xlu0 %2044 }
 0x535   : > { %2918 = vst [vmem:[#allocation1 + $0x4] ss:$9 sm:$0xff] %v2375_v48  ;;  %v2414_v48 = vperm.slane %v2012_v11, 3 }
 0x536   : > { %2919 = vst [vmem:[#allocation1 + $0x5] ss:$9 sm:$0xff] %v2376_v27  ;;  %v2415_v27 = vperm.slane %v2012_v11, 4 }
 0x537   : > { %2920 = vst [vmem:[#allocation1 + $0x6] ss:$9 sm:$0xff] %v2377_v3  ;;  %v2416_v3 = vperm.slane %v2012_v11, 5 }
 0x538   : > { %2921 = vst [vmem:[#allocation1 + $0x7] ss:$9 sm:$0xff] %v2378_v7  ;;  %v2417_v7 = vperm.slane %v2012_v11, 6 }
 0x53f   : > { %v6146_v52 = vld [vmem:[#allocation1] sm:$0xff] }
 0x540   : > { %2923 = vst [vmem:[#allocation1] ss:$9 sm:$0xff] %v2379_v14  ;;  %v6164_v14 = vpop.xlane.xlu2 %2047 }
 0x541   : > { %2924 = vst [vmem:[#allocation1 + $0x1] ss:$9 sm:$0xff] %v2380_v61  ;;  %v6166_v61 = vpop.xlane.xlu0 %2053 }
 0x542   : > { %2925 = vst [vmem:[#allocation1 + $0x2] ss:$9 sm:$0xff] %v2381_v53  ;;  %v2015_v53 = vpop.xlane.xlu1 %2014 }
 0x543   : > { %2926 = vst [vmem:[#allocation1 + $0x3] ss:$9 sm:$0xff] %v2382_v49  ;;  %v2419_v49 = vperm.slane %v2015_v53, 0  ;;  %v2422_v12 = vperm.slane %v2015_v53, 3 }
 0x544   : > { %2927 = vst [vmem:[#allocation1 + $0x4] ss:$9 sm:$0xff] %v2383_v62  ;;  %v2420_v62 = vperm.slane %v2015_v53, 1 }
 0x545   : > { %2928 = vst [vmem:[#allocation1 + $0x5] ss:$9 sm:$0xff] %v2384_v0 }
 0x546   : > { %2929 = vst [vmem:[#allocation1 + $0x6] ss:$9 sm:$0xff] %v2385_v16 }
 0x547   : > { %2930 = vst [vmem:[#allocation1 + $0x7] ss:$9 sm:$0xff] %v2386_v15  ;;  %v2421_v15 = vperm.slane %v2015_v53, 2 }
 0x548   : > { %v6168_v16 = vpop.xlane.xlu2 %2056 }
 0x54e   : > { %v2931_v24 = vld [vmem:[#allocation1] sm:$0xff] }
 0x54f   : > { %2932 = vst [vmem:[#allocation1] ss:$9 sm:$0xff] %v2387_v23  ;;  %3350 = vperm.xlu0 %3831, %v2931_v24   ;;  %v2423_v23 = vperm.slane %v2015_v53, 4  ;;  %v2425_v24 = vperm.slane %v2015_v53, 6 }
 0x550   : > { %2933 = vst [vmem:[#allocation1 + $0x1] ss:$9 sm:$0xff] %v2388_v2  ;;  %v2424_v2 = vperm.slane %v2015_v53, 5 }
 0x551   : > { %2934 = vst [vmem:[#allocation1 + $0x2] ss:$9 sm:$0xff] %v2389_v63  ;;  %v6170_v63 = vpop.xlane.xlu0 %2062 }
 0x552   : > { %2935 = vst [vmem:[#allocation1 + $0x3] ss:$9 sm:$0xff] %v2390_v58  ;;  %v2426_v58 = vperm.slane %v2015_v53, 7 }
 0x553   : > { %2936 = vst [vmem:[#allocation1 + $0x4] ss:$9 sm:$0xff] %v2391_v22  ;;  %v6172_v22 = vpop.xlane.xlu2 %2065 }
 0x554   : > { %2937 = vst [vmem:[#allocation1 + $0x5] ss:$9 sm:$0xff] %v2392_v39  ;;  %v2427_v39 = vperm.slane %v6148_v32, 0 }
 0x555   : > { %2938 = vst [vmem:[#allocation1 + $0x6] ss:$9 sm:$0xff] %v2393_v19  ;;  %v2428_v19 = vperm.slane %v6148_v32, 1 }
 0x556   : > { %2939 = vst [vmem:[#allocation1 + $0x7] ss:$9 sm:$0xff] %v2394_v13 }
 0x559   : > { %v6179_v11 = vpop.xlane.xlu0 %2071 }
 0x55d   : > { %v2940_v59 = vld [vmem:[#allocation1] sm:$0xff] }
 0x55e   : > { %2941 = vst [vmem:[#allocation1] ss:$9 sm:$0xff] %v2395_v33  ;;  %3353 = vperm.xlu2 %3832, %v2940_v59   ;;  %v2431_v33 = vperm.slane %v6148_v32, 4  ;;  %v2433_v59 = vperm.slane %v6148_v32, 6 }
 0x55f   : > { %2942 = vst [vmem:[#allocation1 + $0x1] ss:$9 sm:$0xff] %v2396_v46  ;;  %v2432_v46 = vperm.slane %v6148_v32, 5 }
 0x560   : > { %2943 = vst [vmem:[#allocation1 + $0x2] ss:$9 sm:$0xff] %v2397_v21  ;;  %v2434_v21 = vperm.slane %v6148_v32, 7  ;;  %v2438_v32 = vperm.slane %v6150_v60, 3 }
 0x561   : > { %2944 = vst [vmem:[#allocation1 + $0x3] ss:$9 sm:$0xff] %v2398_v4  ;;  %v6186_v4 = vpop.xlane.xlu2 %2074 }
 0x562   : > { %2945 = vst [vmem:[#allocation1 + $0x4] ss:$9 sm:$0xff] %v2399_v28  ;;  %v6188_v28 = vpop.xlane.xlu0 %2080 }
 0x563   : > { %2946 = vst [vmem:[#allocation1 + $0x5] ss:$9 sm:$0xff] %v2400_v34  ;;  %v2435_v34 = vperm.slane %v6150_v60, 0 }
 0x564   : > { %2947 = vst [vmem:[#allocation1 + $0x6] ss:$9 sm:$0xff] %v2401_v42  ;;  %v2436_v42 = vperm.slane %v6150_v60, 1 }
 0x565   : > { %2948 = vst [vmem:[#allocation1 + $0x7] ss:$9 sm:$0xff] %v2402_v31 }
 0x56c   : > { %v6154_v1 = vld [vmem:[#allocation1] sm:$0xff] }
 0x56d   : > { %2950 = vst [vmem:[#allocation1] ss:$9 sm:$0xff] %v2403_v10  ;;  %v2437_v10 = vperm.slane %v6150_v60, 2 }
 0x56e   : > { %2951 = vst [vmem:[#allocation1 + $0x1] ss:$9 sm:$0xff] %v2404_v47  ;;  %v6193_v47 = vpop.xlane.xlu2 %2083 }
 0x56f   : > { %2952 = vst [vmem:[#allocation1 + $0x2] ss:$9 sm:$0xff] %v2405_v36  ;;  %v2439_v36 = vperm.slane %v6150_v60, 4 }
 0x570   : > { %2953 = vst [vmem:[#allocation1 + $0x3] ss:$9 sm:$0xff] %v2406_v37  ;;  %v2440_v37 = vperm.slane %v6150_v60, 5 }
 0x571   : > { %2954 = vst [vmem:[#allocation1 + $0x4] ss:$9 sm:$0xff] %v2407_v5  ;;  %v2441_v5 = vperm.slane %v6150_v60, 6 }
 0x572   : > { %2955 = vst [vmem:[#allocation1 + $0x5] ss:$9 sm:$0xff] %v2408_v40  ;;  %v2442_v40 = vperm.slane %v6150_v60, 7 }
 0x573   : > { %2956 = vst [vmem:[#allocation1 + $0x6] ss:$9 sm:$0xff] %v2409_v30  ;;  %v6200_v30 = vpop.xlane.xlu0 %2089 }
 0x574   : > { %2957 = vst [vmem:[#allocation1 + $0x7] ss:$9 sm:$0xff] %v2410_v38 }
 0x576   : > { %v6202_v38 = vpop.xlane.xlu2 %2092 }
 0x57b   : > { %v2958_v57 = vld [vmem:[#allocation1] sm:$0xff] }
 0x57c   : > { %2959 = vst [vmem:[#allocation1] ss:$9 sm:$0xff] %v2411_v9  ;;  %3359 = vperm.xlu0 %3831, %v2958_v57   ;;  %v2024_v9 = vpop.xlane.xlu1 %2023 }
 0x57d   : > { %2960 = vst [vmem:[#allocation1 + $0x1] ss:$9 sm:$0xff] %v2412_v17  ;;  %v2443_v17 = vperm.slane %v2024_v9, 0  ;;  %v2444_v57 = vperm.slane %v2024_v9, 1  ;;  %v2448_v60 = vperm.slane %v2024_v9, 5  ;;  %v2450_v53 = vperm.slane %v2024_v9, 7 }
 0x57e   : > { %2961 = vst [vmem:[#allocation1 + $0x2] ss:$9 sm:$0xff] %v2413_v6 }
 0x57f   : > { %2962 = vst [vmem:[#allocation1 + $0x3] ss:$9 sm:$0xff] %v2414_v48  ;;  %v2445_v48 = vperm.slane %v2024_v9, 2 }
 0x580   : > { %2963 = vst [vmem:[#allocation1 + $0x4] ss:$9 sm:$0xff] %v2415_v27  ;;  %v6204_v27 = vpop.xlane.xlu0 %2098 }
 0x581   : > { %2964 = vst [vmem:[#allocation1 + $0x5] ss:$9 sm:$0xff] %v2416_v3  ;;  %v2446_v3 = vperm.slane %v2024_v9, 3 }
 0x582   : > { %2965 = vst [vmem:[#allocation1 + $0x6] ss:$9 sm:$0xff] %v2417_v7  ;;  %v2447_v7 = vperm.slane %v2024_v9, 4 }
 0x583   : > { %2966 = vst [vmem:[#allocation1 + $0x7] ss:$9 sm:$0xff] %v2418_v35  ;;  %v2449_v35 = vperm.slane %v2024_v9, 6  ;;  %v2462_v9 = vperm.slane %v6156_v43, 3 }
 0x58a   : > { %v2967_v0 = vld [vmem:[#allocation1] sm:$0xff] }
 0x58b   : > { %2968 = vst [vmem:[#allocation1] ss:$9 sm:$0xff] %v2419_v49  ;;  %3362 = vperm.xlu2 %3832, %v2967_v0   ;;  %v6206_v49 = vpop.xlane.xlu2 %2101  ;;  %v2451_v0 = vperm.slane %v6152_v45, 0 }
 0x58c   : > { %2969 = vst [vmem:[#allocation1 + $0x1] ss:$9 sm:$0xff] %v2420_v62  ;;  %v6208_v62 = vpop.xlane.xlu0 %2107 }
 0x58d   : > { %2970 = vst [vmem:[#allocation1 + $0x2] ss:$9 sm:$0xff] %v2421_v15  ;;  %v2452_v15 = vperm.slane %v6152_v45, 1 }
 0x58e   : > { %2971 = vst [vmem:[#allocation1 + $0x3] ss:$9 sm:$0xff] %v2422_v12 }
 0x58f   : > { %2972 = vst [vmem:[#allocation1 + $0x4] ss:$9 sm:$0xff] %v2423_v23  ;;  %v2453_v23 = vperm.slane %v6152_v45, 2 }
 0x590   : > { %2973 = vst [vmem:[#allocation1 + $0x5] ss:$9 sm:$0xff] %v2424_v2 }
 0x591   : > { %2974 = vst [vmem:[#allocation1 + $0x6] ss:$9 sm:$0xff] %v2425_v24  ;;  %v2454_v24 = vperm.slane %v6152_v45, 3 }
 0x592   : > { %2975 = vst [vmem:[#allocation1 + $0x7] ss:$9 sm:$0xff] %v2426_v58  ;;  %v3466_v58 = vlaneseq }
 0x593   : > { %v6215_v2 = vpop.xlane.xlu2 %2110 }
 0x599   : > { %v6176_v13 = vld [vmem:[#allocation1] sm:$0xff] }
 0x59a   : > { %2977 = vst [vmem:[#allocation1] ss:$9 sm:$0xff] %v2427_v39  ;;  %v2455_v39 = vperm.slane %v6152_v45, 4 }
 0x59b   : > { %2978 = vst [vmem:[#allocation1 + $0x1] ss:$9 sm:$0xff] %v2428_v19  ;;  %v2456_v19 = vperm.slane %v6152_v45, 5 }
 0x59c   : > { %2979 = vst [vmem:[#allocation1 + $0x2] ss:$9 sm:$0xff] %v2429_v56  ;;  %v897_v56 = vpop.permute.xlu0 %896 }
 0x59d   : > { %2980 = vst [vmem:[#allocation1 + $0x3] ss:$9 sm:$0xff] %v2430_v18  ;;  %v2457_v18 = vperm.slane %v6152_v45, 6  ;;  %vm961_vm4 = vcmp.eq.s32.totalorder %v897_v56, 1  ;;  %v7248_v56 = vld [vmem:[#allocation103_spill] sm:$0xff] }
 0x59e   : > { %2981 = vst [vmem:[#allocation1 + $0x4] ss:$9 sm:$0xff] %v2431_v33  ;;  %v2458_v33 = vperm.slane %v6152_v45, 7  ;;  %v2459_v45 = vperm.slane %v6156_v43, 0 }
 0x59f   : > { %2982 = vst [vmem:[#allocation1 + $0x5] ss:$9 sm:$0xff] %v2432_v46  ;;  %v6223_v46 = vand.u32 127, %v3466_v58 }
 0x5a0   : > { %2983 = vst [vmem:[#allocation1 + $0x6] ss:$9 sm:$0xff] %v2433_v59  ;;  %v3899_v59 = vld [vmem:[%s4151_s9 + $0x1f8] sm:$0xff]  ;;  %s3914_s9 = sshra.s32 %s3653_s7, 4  ;;  %s3915_s9 = int_to_ptr.hbm [resolvable:$true] %s3914_s9 }
 0x5a1   : > { %2984 = vst [vmem:[#allocation1 + $0x7] ss:$9 sm:$0xff] %v2434_v21  ;;  %v1025_v21 = vsel %vm961_vm4, %v5891_v55, %v3899_v59  ;;  %v2460_v55 = vperm.slane %v6156_v43, 1  ;;  %v2476_v59 = vperm.slane %v6158_v20, 1  ;;  %vm3625_vm4 = vcmask 1040384   ;;  %s3916_s10 = scalar_lea.hbm %s3915_s9, 4  ;;  %p3921_p0 = scmp.lt.s32.totalorder %s3915_s9, %s6743_s4 }
 0x5a2   : > { %p3917_p11 = scmp.ne.s32.totalorder %s3915_s9, %s3916_s10  ;;  %p3922_p1 = scmp.lt.s32.totalorder %s3920_s6, %s3916_s10 }
 0x5a4   : > { %p3918_p12 = pnand %p3917_p11, %p4030_p5  ;;  %p3923_p2 = por %p3922_p1, %p3921_p0 }
 0x5a6   : > { %p3919_p13 = pneg %p3918_p12 }
 0x5a8   : > { %v2985_v31 = vld [vmem:[#allocation1] sm:$0xff]  ;;  %p3924_p3 = pnand %p3923_p2, %p3919_p13 }
 0x5a9   : > { %2986 = vst [vmem:[#allocation1] ss:$9 sm:$0xff] %v2435_v34  ;;  %3368 = vperm.xlu0 %3831, %v2985_v31   ;;  %v1921_v34 = vmul.f32 %v6126_v41, %v1025_v21  ;;  %v6230_v31 = vadd.s32 4294967288, %v6223_v46  ;;  %v2461_v41 = vperm.slane %v6156_v43, 2 }
 0x5aa   : > { %2987 = vst [vmem:[#allocation1 + $0x1] ss:$9 sm:$0xff] %v2436_v42 }
 0x5ab   : > { %2988 = vst [vmem:[#allocation1 + $0x2] ss:$9 sm:$0xff] %v2437_v10  ;;  %v2112_v42 = vsel %vm1922_vm10, %v1921_v34, 0.0  ;;  %v3279_v10 = vpop.permute.xlu2 %3278  ;;  %v2477_v34 = vperm.slane %v6158_v20, 2  ;;  %vm3475_vm10 = vcmask 195712  }
 0x5ac   : > { %2989 = vst [vmem:[#allocation1 + $0x3] ss:$9 sm:$0xff] %v2438_v32  ;;  %2113 = vadd.xlane.f32.xlu1 %v2112_v42  ;;  %v3276_v32 = vpop.permute.xlu0 %3275  ;;  %v2478_v42 = vperm.slane %v6158_v20, 3 }
 0x5ad   : > { %2990 = vst [vmem:[#allocation1 + $0x4] ss:$9 sm:$0xff] %v2439_v36  ;;  %v3470_v36 = vperm.slane %v3279_v10, %v6230_v31  ;;  %v2479_v10 = vperm.slane %v6158_v20, 4 }
 0x5ae   : > { %2991 = vst [vmem:[#allocation1 + $0x5] ss:$9 sm:$0xff] %v2440_v37  ;;  %v3468_v37 = vperm.slane %v3276_v32, %v6223_v46  ;;  %v2480_v32 = vperm.slane %v6158_v20, 5 }
 0x5af   : > { %2992 = vst [vmem:[#allocation1 + $0x6] ss:$9 sm:$0xff] %v2441_v5 }
 0x5b0   : > { %2993 = vst [vmem:[#allocation1 + $0x7] ss:$9 sm:$0xff] %v2442_v40  ;;  %v6238_v40 = vsel %vm3471_vm5, %v3470_v36, %v3468_v37  ;;  %v2482_v36 = vperm.slane %v6158_v20, 7 }
 0x5b7   : > { %v2994_v6 = vld [vmem:[#allocation1] sm:$0xff] }
 0x5b8   : > { %2995 = vst [vmem:[#allocation1] ss:$9 sm:$0xff] %v2443_v17  ;;  %3371 = vperm.xlu2 %3832, %v2994_v6   ;;  %v2463_v17 = vperm.slane %v6156_v43, 4  ;;  %v2465_v6 = vperm.slane %v6156_v43, 6 }
 0x5b9   : > { %2996 = vst [vmem:[#allocation1 + $0x1] ss:$9 sm:$0xff] %v2444_v57  ;;  %v2464_v57 = vperm.slane %v6156_v43, 5 }
 0x5ba   : > { %2997 = vst [vmem:[#allocation1 + $0x2] ss:$9 sm:$0xff] %v2445_v48  ;;  %v2466_v48 = vperm.slane %v6156_v43, 7  ;;  %v7247_v43 = vld [vmem:[#allocation100_spill] sm:$0xff] }
 0x5bb   : > { %2998 = vst [vmem:[#allocation1 + $0x3] ss:$9 sm:$0xff] %v2446_v3  ;;  %v2033_v3 = vpop.xlane.xlu1 %2032 }
 0x5bc   : > { %2999 = vst [vmem:[#allocation1 + $0x4] ss:$9 sm:$0xff] %v2447_v7  ;;  %v2467_v7 = vperm.slane %v2033_v3, 0 }
 0x5bd   : > { %3000 = vst [vmem:[#allocation1 + $0x5] ss:$9 sm:$0xff] %v2448_v60  ;;  %v2468_v60 = vperm.slane %v2033_v3, 1 }
 0x5be   : > { %3001 = vst [vmem:[#allocation1 + $0x6] ss:$9 sm:$0xff] %v2449_v35 }
 0x5bf   : > { %3002 = vst [vmem:[#allocation1 + $0x7] ss:$9 sm:$0xff] %v2450_v53  ;;  %v2469_v53 = vperm.slane %v2033_v3, 2 }
 0x5c5   : > { %3281 = vperm.xlu1 %3833, %v7247_v43  }
 0x5c6   : > { %v6212_v12 = vld [vmem:[#allocation1] sm:$0xff] }
 0x5c7   : > { %3004 = vst [vmem:[#allocation1] ss:$9 sm:$0xff] %v2451_v0  ;;  %v2470_v0 = vperm.slane %v2033_v3, 3 }
 0x5c8   : > { %3005 = vst [vmem:[#allocation1 + $0x1] ss:$9 sm:$0xff] %v2452_v15  ;;  %v2471_v15 = vperm.slane %v2033_v3, 4 }
 0x5c9   : > { %3006 = vst [vmem:[#allocation1 + $0x2] ss:$9 sm:$0xff] %v2453_v23  ;;  %v2472_v23 = vperm.slane %v2033_v3, 5 }
 0x5ca   : > { %3007 = vst [vmem:[#allocation1 + $0x3] ss:$9 sm:$0xff] %v2454_v24  ;;  %v6245_v24 = vpop.permute.xlu2 %3284 }
 0x5cb   : > { %3008 = vst [vmem:[#allocation1 + $0x4] ss:$9 sm:$0xff] %v2455_v39  ;;  %v2473_v39 = vperm.slane %v2033_v3, 6 }
 0x5cc   : > { %3009 = vst [vmem:[#allocation1 + $0x5] ss:$9 sm:$0xff] %v2456_v19  ;;  %v2474_v19 = vperm.slane %v2033_v3, 7  ;;  %v2489_v3 = vperm.slane %v6160_v50, 6 }
 0x5cd   : > { %3010 = vst [vmem:[#allocation1 + $0x6] ss:$9 sm:$0xff] %v2457_v18  ;;  %3287 = vperm.xlu1 %3833, %v7248_v56   ;;  %v2475_v18 = vperm.slane %v6158_v20, 0 }
 0x5ce   : > { %3011 = vst [vmem:[#allocation1 + $0x7] ss:$9 sm:$0xff] %v2458_v33 }
 0x5d2   : > { %v6250_v33 = vpop.permute.xlu2 %3290 }
 0x5d5   : > { %v3012_v5 = vld [vmem:[#allocation1] sm:$0xff]  ;;  %3293 = vperm.xlu1 %3833, %v6050_v25  }
 0x5d6   : > { %3013 = vst [vmem:[#allocation1] ss:$9 sm:$0xff] %v2459_v45  ;;  %3377 = vperm.xlu0 %3831, %v3012_v5   ;;  %v2481_v45 = vperm.slane %v6158_v20, 6  ;;  %v2483_v5 = vperm.slane %v6160_v50, 0  ;;  %v2486_v20 = vperm.slane %v6160_v50, 3 }
 0x5d7   : > { %3014 = vst [vmem:[#allocation1 + $0x1] ss:$9 sm:$0xff] %v2460_v55  ;;  %v6264_v55 = vpop.permute.xlu0 %3296 }
 0x5d8   : > { %3015 = vst [vmem:[#allocation1 + $0x2] ss:$9 sm:$0xff] %v2461_v41  ;;  %v2484_v41 = vperm.slane %v6160_v50, 1 }
 0x5d9   : > { %3016 = vst [vmem:[#allocation1 + $0x3] ss:$9 sm:$0xff] %v2462_v9 }
 0x5da   : > { %3017 = vst [vmem:[#allocation1 + $0x4] ss:$9 sm:$0xff] %v2463_v17  ;;  %v6262_v37 = vpop.permute.xlu2 %3299  ;;  %v2485_v17 = vperm.slane %v6160_v50, 2 }
 0x5db   : > { %3018 = vst [vmem:[#allocation1 + $0x5] ss:$9 sm:$0xff] %v2464_v57  ;;  %v2487_v57 = vperm.slane %v6160_v50, 4 }
 0x5dc   : > { %3019 = vst [vmem:[#allocation1 + $0x6] ss:$9 sm:$0xff] %v2465_v6  ;;  %v2042_v6 = vpop.xlane.xlu1 %2041 }
 0x5dd   : > { %3020 = vst [vmem:[#allocation1 + $0x7] ss:$9 sm:$0xff] %v2466_v48  ;;  %3302 = vperm.xlu1 %3833, %v6135_v29   ;;  %v2488_v48 = vperm.slane %v6160_v50, 5  ;;  %v2495_v43 = vperm.slane %v2042_v6, 4  ;;  %v2497_v56 = vperm.slane %v2042_v6, 6 }
 0x5df   : > { %v6275_v29 = vpop.permute.xlu0 %3305 }
 0x5e2   : > { %v6271_v25 = vpop.permute.xlu2 %3308 }
 0x5e4   : > { %v3021_v35 = vld [vmem:[#allocation1] sm:$0xff] }
 0x5e5   : > { %3022 = vst [vmem:[#allocation1] ss:$9 sm:$0xff] %v2467_v7  ;;  %3380 = vperm.xlu2 %3832, %v3021_v35   ;;  %v2490_v7 = vperm.slane %v6160_v50, 7  ;;  %3311 = vperm.xlu1 %3833, %v6138_v54   ;;  %v2494_v50 = vperm.slane %v2042_v6, 3 }
 0x5e6   : > { %3023 = vst [vmem:[#allocation1 + $0x1] ss:$9 sm:$0xff] %v2468_v60 }
 0x5e7   : > { %3024 = vst [vmem:[#allocation1 + $0x2] ss:$9 sm:$0xff] %v2469_v53  ;;  %v6282_v35 = vpop.permute.xlu0 %3314  ;;  %v6284_v53 = vpop.xlane.xlu1 %2050 }
 0x5e8   : > { %3025 = vst [vmem:[#allocation1 + $0x3] ss:$9 sm:$0xff] %v2470_v0  ;;  %v2491_v0 = vperm.slane %v2042_v6, 0 }
 0x5e9   : > { %3026 = vst [vmem:[#allocation1 + $0x4] ss:$9 sm:$0xff] %v2471_v15  ;;  %v2492_v15 = vperm.slane %v2042_v6, 1 }
 0x5ea   : > { %3027 = vst [vmem:[#allocation1 + $0x5] ss:$9 sm:$0xff] %v2472_v23  ;;  %v6280_v60 = vpop.permute.xlu2 %3317 }
 0x5eb   : > { %3028 = vst [vmem:[#allocation1 + $0x6] ss:$9 sm:$0xff] %v2473_v39  ;;  %v2493_v39 = vperm.slane %v2042_v6, 2 }
 0x5ec   : > { %3029 = vst [vmem:[#allocation1 + $0x7] ss:$9 sm:$0xff] %v2474_v19  ;;  %v2496_v19 = vperm.slane %v2042_v6, 5 }
 0x5ed   : > { %3320 = vperm.xlu1 %3833, %v6140_v8  }
 0x5ef   : > { %v6289_v8 = vpop.xlane.xlu1 %2059 }
 0x5f2   : > { %v3327_v54 = vpop.permute.xlu2 %3326 }
 0x5f3   : > { %v6253_v21 = vld [vmem:[#allocation1] sm:$0xff] }
 0x5f4   : > { %3031 = vst [vmem:[#allocation1] ss:$9 sm:$0xff] %v2475_v18  ;;  %v3324_v18 = vpop.permute.xlu0 %3323 }
 0x5f5   : > { %3032 = vst [vmem:[#allocation1 + $0x1] ss:$9 sm:$0xff] %v2476_v59  ;;  %v2498_v59 = vperm.slane %v2042_v6, 7  ;;  %3329 = vperm.xlu1 %3833, %v6142_v26   ;;  %v2504_v26 = vperm.slane %v6162_v44, 5  ;;  %v2507_v6 = vperm.slane %v6164_v14, 0 }
 0x5f6   : > { %3033 = vst [vmem:[#allocation1 + $0x2] ss:$9 sm:$0xff] %v2477_v34  ;;  %v3530_v34 = vperm.slane %v3327_v54, %v6230_v31  ;;  %v2517_v54 = vperm.slane %v6284_v53, 2 }
 0x5f7   : > { %3034 = vst [vmem:[#allocation1 + $0x3] ss:$9 sm:$0xff] %v2478_v42  ;;  %v3529_v42 = vperm.slane %v3324_v18, %v6223_v46  ;;  %v2521_v18 = vperm.slane %v6284_v53, 6 }
 0x5f8   : > { %3035 = vst [vmem:[#allocation1 + $0x4] ss:$9 sm:$0xff] %v2479_v10 }
 0x5f9   : > { %3036 = vst [vmem:[#allocation1 + $0x5] ss:$9 sm:$0xff] %v2480_v32  ;;  %v6292_v10 = vsel %vm3471_vm5, %v3530_v34, %v3529_v42  ;;  %v2499_v32 = vperm.slane %v6162_v44, 0  ;;  %v2523_v42 = vperm.slane %v6166_v61, 0 }
 0x5fa   : > { %3037 = vst [vmem:[#allocation1 + $0x6] ss:$9 sm:$0xff] %v2481_v45  ;;  %v2500_v45 = vperm.slane %v6162_v44, 1 }
 0x5fb   : > { %3038 = vst [vmem:[#allocation1 + $0x7] ss:$9 sm:$0xff] %v2482_v36 }
 0x5fd   : > { %3338 = vperm.xlu1 %3833, %v6144_v51  }
 0x602   : > { %v3039_v9 = vld [vmem:[#allocation1] sm:$0xff] }
 0x603   : > { %3040 = vst [vmem:[#allocation1] ss:$9 sm:$0xff] %v2483_v5  ;;  %3386 = vperm.xlu0 %3831, %v3039_v9   ;;  %v2501_v5 = vperm.slane %v6162_v44, 2  ;;  %v2503_v9 = vperm.slane %v6162_v44, 4 }
 0x604   : > { %3041 = vst [vmem:[#allocation1 + $0x1] ss:$9 sm:$0xff] %v2484_v41  ;;  %v2502_v41 = vperm.slane %v6162_v44, 3 }
 0x605   : > { %3042 = vst [vmem:[#allocation1 + $0x2] ss:$9 sm:$0xff] %v2485_v17  ;;  %v6303_v17 = vpop.xlane.xlu1 %2068  ;;  %3347 = vperm.xlu1 %3833, %v6146_v52   ;;  %v2512_v52 = vperm.slane %v6164_v14, 5 }
 0x606   : > { %3043 = vst [vmem:[#allocation1 + $0x3] ss:$9 sm:$0xff] %v2486_v20  ;;  %v2505_v20 = vperm.slane %v6162_v44, 6 }
 0x607   : > { %3044 = vst [vmem:[#allocation1 + $0x4] ss:$9 sm:$0xff] %v2487_v57  ;;  %v2506_v57 = vperm.slane %v6162_v44, 7  ;;  %v2511_v44 = vperm.slane %v6164_v14, 4 }
 0x608   : > { %3045 = vst [vmem:[#allocation1 + $0x5] ss:$9 sm:$0xff] %v2488_v48  ;;  %v2508_v48 = vperm.slane %v6164_v14, 1 }
 0x609   : > { %3046 = vst [vmem:[#allocation1 + $0x6] ss:$9 sm:$0xff] %v2489_v3 }
 0x60a   : > { %3047 = vst [vmem:[#allocation1 + $0x7] ss:$9 sm:$0xff] %v2490_v7  ;;  %v2509_v7 = vperm.slane %v6164_v14, 2 }
 0x60d   : > { %v6309_v51 = vpop.xlane.xlu1 %2077  ;;  %3356 = vperm.xlu1 %3833, %v6154_v1   ;;  %v2515_v1 = vperm.slane %v6284_v53, 0 }
 0x611   : > { %v3048_v23 = vld [vmem:[#allocation1] sm:$0xff] }
 0x612   : > { %3049 = vst [vmem:[#allocation1] ss:$9 sm:$0xff] %v2491_v0  ;;  %3389 = vperm.xlu2 %3832, %v3048_v23   ;;  %v2510_v0 = vperm.slane %v6164_v14, 3  ;;  %v2514_v23 = vperm.slane %v6164_v14, 7 }
 0x613   : > { %3050 = vst [vmem:[#allocation1 + $0x1] ss:$9 sm:$0xff] %v2492_v15  ;;  %v2513_v15 = vperm.slane %v6164_v14, 6  ;;  %v2519_v14 = vperm.slane %v6284_v53, 4 }
 0x614   : > { %3051 = vst [vmem:[#allocation1 + $0x2] ss:$9 sm:$0xff] %v2493_v39 }
 0x615   : > { %3052 = vst [vmem:[#allocation1 + $0x3] ss:$9 sm:$0xff] %v2494_v50  ;;  %v6320_v39 = vpop.xlane.xlu1 %2086  ;;  %3365 = vperm.xlu1 %3833, %v6176_v13   ;;  %v2516_v50 = vperm.slane %v6284_v53, 1  ;;  %v2520_v13 = vperm.slane %v6284_v53, 5 }
 0x616   : > { %3053 = vst [vmem:[#allocation1 + $0x4] ss:$9 sm:$0xff] %v2495_v43 }
 0x617   : > { %3054 = vst [vmem:[#allocation1 + $0x5] ss:$9 sm:$0xff] %v2496_v19  ;;  %v2518_v19 = vperm.slane %v6284_v53, 3 }
 0x618   : > { %3055 = vst [vmem:[#allocation1 + $0x6] ss:$9 sm:$0xff] %v2497_v56 }
 0x619   : > { %3056 = vst [vmem:[#allocation1 + $0x7] ss:$9 sm:$0xff] %v2498_v59  ;;  %v2522_v59 = vperm.slane %v6284_v53, 7  ;;  %v2527_v53 = vperm.slane %v6166_v61, 4 }
 0x61d   : > { %v6328_v56 = vpop.xlane.xlu1 %2095  ;;  %3374 = vperm.xlu1 %3833, %v6212_v12  }
 0x620   : > { %v6297_v36 = vld [vmem:[#allocation1] sm:$0xff] }
 0x621   : > { %3058 = vst [vmem:[#allocation1] ss:$9 sm:$0xff] %v2499_v32  ;;  %v2524_v32 = vperm.slane %v6166_v61, 1 }
 0x622   : > { %3059 = vst [vmem:[#allocation1 + $0x1] ss:$9 sm:$0xff] %v2500_v45  ;;  %v2525_v45 = vperm.slane %v6166_v61, 2 }
 0x623   : > { %3060 = vst [vmem:[#allocation1 + $0x2] ss:$9 sm:$0xff] %v2501_v5  ;;  %v2526_v5 = vperm.slane %v6166_v61, 3 }
 0x624   : > { %3061 = vst [vmem:[#allocation1 + $0x3] ss:$9 sm:$0xff] %v2502_v41  ;;  %v2528_v41 = vperm.slane %v6166_v61, 5 }
 0x625   : > { %3062 = vst [vmem:[#allocation1 + $0x4] ss:$9 sm:$0xff] %v2503_v9  ;;  %3383 = vperm.xlu1 %3833, %v6253_v21   ;;  %v6335_v34 = vpop.xlane.xlu1 %2104  ;;  %v2529_v21 = vperm.slane %v6166_v61, 6  ;;  %v2530_v9 = vperm.slane %v6166_v61, 7 }
 0x626   : > { %3063 = vst [vmem:[#allocation1 + $0x5] ss:$9 sm:$0xff] %v2504_v26 }
 0x627   : > { %3064 = vst [vmem:[#allocation1 + $0x6] ss:$9 sm:$0xff] %v2505_v20  ;;  %v6349_v20 = vadd.s32 4294967272, %v6223_v46 }
 0x628   : > { %3065 = vst [vmem:[#allocation1 + $0x7] ss:$9 sm:$0xff] %v2506_v57  ;;  %v6352_v57 = vadd.s32 4294967280, %v6223_v46 }
 0x62d   : > { %3392 = vperm.xlu1 %3833, %v6297_v36   ;;  %v6346_v26 = vpop.xlane.xlu1 %2113 }
 0x62f   : > { %v3066_v3 = vld [vmem:[#allocation1] sm:$0xff] }
 0x630   : > { %3067 = vst [vmem:[#allocation1] ss:$9 sm:$0xff] %v2507_v6  ;;  %3395 = vperm.xlu0 %3831, %v3066_v3   ;;  %v2531_v6 = vperm.slane %v6168_v16, 0 }
 0x631   : > { %3068 = vst [vmem:[#allocation1 + $0x1] ss:$9 sm:$0xff] %v2508_v48  ;;  %v2532_v48 = vperm.slane %v6168_v16, 1 }
 0x632   : > { %3069 = vst [vmem:[#allocation1 + $0x2] ss:$9 sm:$0xff] %v2509_v7  ;;  %v2533_v7 = vperm.slane %v6168_v16, 2 }
 0x633   : > { %3070 = vst [vmem:[#allocation1 + $0x3] ss:$9 sm:$0xff] %v2510_v0  ;;  %v3478_v0 = vperm.slane %v6245_v24, %v6349_v20  ;;  %v6368_v24 = vadd.s32 4294967256, %v6223_v46 }
 0x634   : > { %3071 = vst [vmem:[#allocation1 + $0x4] ss:$9 sm:$0xff] %v2511_v44  ;;  %v2534_v44 = vperm.slane %v6168_v16, 3 }
 0x635   : > { %3072 = vst [vmem:[#allocation1 + $0x5] ss:$9 sm:$0xff] %v2512_v52 }
 0x636   : > { %3073 = vst [vmem:[#allocation1 + $0x6] ss:$9 sm:$0xff] %v2513_v15  ;;  %v2535_v15 = vperm.slane %v6168_v16, 4 }
 0x637   : > { %3074 = vst [vmem:[#allocation1 + $0x7] ss:$9 sm:$0xff] %v2514_v23  ;;  %v3282_v36 = vpop.permute.xlu1 %3281 }
 0x638   : > { %v3474_v61 = vperm.slane %v3282_v36, %v6352_v57 }
 0x63a   : > { %v3476_v52 = vsel %vm3475_vm10, %v3474_v61, %v6238_v40  ;;  %v6372_v40 = vadd.s32 4294967264, %v6223_v46  ;;  %v2545_v61 = vperm.slane %v6289_v8, 6 }
 0x63b   : > { %v3480_v23 = vsel %vm3479_vm6, %v3478_v0, %v3476_v52  ;;  %v6405_v0 = vadd.s32 4294967216, %v6223_v46 }
 0x63e   : > { %v3075_v43 = vld [vmem:[#allocation1] sm:$0xff] }
 0x63f   : > { %3076 = vst [vmem:[#allocation1] ss:$9 sm:$0xff] %v2515_v1  ;;  %3398 = vperm.xlu2 %3832, %v3075_v43   ;;  %v2536_v1 = vperm.slane %v6168_v16, 5  ;;  %v2538_v43 = vperm.slane %v6168_v16, 7 }
 0x640   : > { %3077 = vst [vmem:[#allocation1 + $0x1] ss:$9 sm:$0xff] %v2516_v50  ;;  %v2537_v50 = vperm.slane %v6168_v16, 6  ;;  %v6380_v16 = vadd.s32 4294967240, %v6223_v46 }
 0x641   : > { %3078 = vst [vmem:[#allocation1 + $0x2] ss:$9 sm:$0xff] %v2517_v54  ;;  %v3288_v54 = vpop.permute.xlu1 %3287 }
 0x642   : > { %3079 = vst [vmem:[#allocation1 + $0x3] ss:$9 sm:$0xff] %v2518_v19  ;;  %v3482_v19 = vperm.slane %v3288_v54, %v6372_v40  ;;  %v2547_v54 = vperm.slane %v6170_v63, 0 }
 0x643   : > { %3080 = vst [vmem:[#allocation1 + $0x4] ss:$9 sm:$0xff] %v2519_v14  ;;  %v3486_v14 = vperm.slane %v6250_v33, %v6368_v24 }
 0x644   : > { %3081 = vst [vmem:[#allocation1 + $0x5] ss:$9 sm:$0xff] %v2520_v13  ;;  %v3484_v13 = vsel %vm3483_vm7, %v3482_v19, %v3480_v23  ;;  %v3506_v23 = vperm.slane %v6275_v29, %v6405_v0  ;;  %v6423_v19 = vadd.s32 4294967192, %v6223_v46 }
 0x645   : > { %3082 = vst [vmem:[#allocation1 + $0x6] ss:$9 sm:$0xff] %v2521_v18  ;;  %v3488_v18 = vsel %vm3487_vm8, %v3486_v14, %v3484_v13  ;;  %v2548_v14 = vperm.slane %v6170_v63, 1  ;;  %v6427_v13 = vadd.s32 4294967184, %v6223_v46 }
 0x646   : > { %3083 = vst [vmem:[#allocation1 + $0x7] ss:$9 sm:$0xff] %v2522_v59  ;;  %v2539_v59 = vperm.slane %v6289_v8, 0 }
 0x64d   : > { %v3084_v12 = vld [vmem:[#allocation1] sm:$0xff] }
 0x64e   : > { %3085 = vst [vmem:[#allocation1] ss:$9 sm:$0xff] %v2523_v42  ;;  %3401 = vperm.xlu1 %3833, %v3084_v12   ;;  %v6384_v42 = vadd.s32 4294967232, %v6223_v46  ;;  %v2540_v12 = vperm.slane %v6289_v8, 1 }
 0x64f   : > { %3086 = vst [vmem:[#allocation1 + $0x1] ss:$9 sm:$0xff] %v2524_v32  ;;  %v6387_v32 = vadd.s32 4294967248, %v6223_v46 }
 0x650   : > { %3087 = vst [vmem:[#allocation1 + $0x2] ss:$9 sm:$0xff] %v2525_v45  ;;  %v3294_v45 = vpop.permute.xlu1 %3293 }
 0x651   : > { %3088 = vst [vmem:[#allocation1 + $0x3] ss:$9 sm:$0xff] %v2526_v5  ;;  %v2541_v5 = vperm.slane %v6289_v8, 2 }
 0x652   : > { %3089 = vst [vmem:[#allocation1 + $0x4] ss:$9 sm:$0xff] %v2527_v53  ;;  %v3490_v53 = vperm.slane %v3294_v45, %v6387_v32  ;;  %v2551_v45 = vperm.slane %v6170_v63, 4 }
 0x653   : > { %3090 = vst [vmem:[#allocation1 + $0x5] ss:$9 sm:$0xff] %v2528_v41  ;;  %v2542_v41 = vperm.slane %v6289_v8, 3 }
 0x654   : > { %3091 = vst [vmem:[#allocation1 + $0x6] ss:$9 sm:$0xff] %v2529_v21  ;;  %v3494_v21 = vperm.slane %v6264_v55, %v6380_v16  ;;  %v3492_v36 = vsel %vm3491_vm9, %v3490_v53, %v3488_v18  ;;  %v2549_v18 = vperm.slane %v6170_v63, 2  ;;  %v2552_v53 = vperm.slane %v6170_v63, 5 }
 0x655   : > { %3092 = vst [vmem:[#allocation1 + $0x7] ss:$9 sm:$0xff] %v2530_v9  ;;  %v2543_v9 = vperm.slane %v6289_v8, 4 }
 0x658   : > { %v3303_v52 = vpop.permute.xlu1 %3302 }
 0x65c   : > { %v3093_v3 = vld [vmem:[#allocation1] sm:$0xff] }
 0x65d   : > { %3094 = vst [vmem:[#allocation1] ss:$9 sm:$0xff] %v2531_v6  ;;  %3404 = vperm.xlu0 %3831, %v3093_v3   ;;  %v3498_v6 = vperm.slane %v6262_v37, %v6384_v42  ;;  %v3496_v3 = vsel %vm3495_vm11, %v3494_v21, %v3492_v36  ;;  %v6408_v37 = vadd.s32 4294967208, %v6223_v46  ;;  %v2554_v36 = vperm.slane %v6170_v63, 7 }
 0x65e   : > { %3095 = vst [vmem:[#allocation1 + $0x1] ss:$9 sm:$0xff] %v2532_v48  ;;  %v2544_v48 = vperm.slane %v6289_v8, 5 }
 0x65f   : > { %3096 = vst [vmem:[#allocation1 + $0x2] ss:$9 sm:$0xff] %v2533_v7  ;;  %v3500_v55 = vsel %vm3499_vm12, %v3498_v6, %v3496_v3  ;;  %v2546_v7 = vperm.slane %v6289_v8, 7  ;;  %v3510_v8 = vperm.slane %v6271_v25, %v6408_v37  ;;  %v6430_v25 = vadd.s32 4294967200, %v6223_v46 }
 0x660   : > { %3097 = vst [vmem:[#allocation1 + $0x3] ss:$9 sm:$0xff] %v2534_v44  ;;  %v6411_v44 = vadd.s32 4294967224, %v6223_v46 }
 0x661   : > { %3098 = vst [vmem:[#allocation1 + $0x4] ss:$9 sm:$0xff] %v2535_v15 }
 0x662   : > { %3099 = vst [vmem:[#allocation1 + $0x5] ss:$9 sm:$0xff] %v2536_v1  ;;  %v3502_v15 = vperm.slane %v3303_v52, %v6411_v44  ;;  %v2557_v52 = vperm.slane %v6172_v22, 2 }
 0x663   : > { %3100 = vst [vmem:[#allocation1 + $0x6] ss:$9 sm:$0xff] %v2537_v50 }
 0x664   : > { %3101 = vst [vmem:[#allocation1 + $0x7] ss:$9 sm:$0xff] %v2538_v43  ;;  %v3504_v1 = vsel %vm3503_vm13, %v3502_v15, %v3500_v55  ;;  %v2555_v55 = vperm.slane %v6172_v22, 0  ;;  %v3333_v15 = vpop.permute.xlu0 %3332 }
 0x665   : > { %v3508_v50 = vsel %vm3507_vm14, %v3506_v23, %v3504_v1  ;;  %v2558_v23 = vperm.slane %v6172_v22, 3 }
 0x666   : > { %v3512_v43 = vsel %vm3511_vm15, %v3510_v8, %v3508_v50  ;;  %v3336_v8 = vpop.permute.xlu2 %3335  ;;  %v2559_v50 = vperm.slane %v6172_v22, 4 }
 0x66b   : > { %v3102_v33 = vld [vmem:[#allocation1] sm:$0xff] }
 0x66c   : > { %3103 = vst [vmem:[#allocation1] ss:$9 sm:$0xff] %v2539_v59  ;;  %3407 = vperm.xlu2 %3832, %v3102_v33   ;;  %v3312_v59 = vpop.permute.xlu1 %3311 }
 0x66d   : > { %3104 = vst [vmem:[#allocation1 + $0x1] ss:$9 sm:$0xff] %v2540_v12  ;;  %v2550_v12 = vperm.slane %v6170_v63, 3  ;;  %v3514_v33 = vperm.slane %v3312_v59, %v6430_v25 }
 0x66e   : > { %3105 = vst [vmem:[#allocation1 + $0x2] ss:$9 sm:$0xff] %v2541_v5  ;;  %v3518_v5 = vperm.slane %v6282_v35, %v6423_v19 }
 0x66f   : > { %3106 = vst [vmem:[#allocation1 + $0x3] ss:$9 sm:$0xff] %v2542_v41  ;;  %v3522_v41 = vperm.slane %v6280_v60, %v6427_v13  ;;  %v3516_v21 = vsel %vm3515_vm0, %v3514_v33, %v3512_v43 }
 0x670   : > { %3107 = vst [vmem:[#allocation1 + $0x4] ss:$9 sm:$0xff] %v2543_v9  ;;  %v2553_v9 = vperm.slane %v6170_v63, 6  ;;  %v3520_v6 = vsel %vm3519_vm1, %v3518_v5, %v3516_v21  ;;  %v3342_v5 = vpop.permute.xlu0 %3341 }
 0x671   : > { %3108 = vst [vmem:[#allocation1 + $0x5] ss:$9 sm:$0xff] %v2544_v48  ;;  %v3524_v35 = vsel %vm3523_vm2, %v3522_v41, %v3520_v6  ;;  %v6447_v48 = vadd.s32 4294967176, %v6223_v46 }
 0x672   : > { %3109 = vst [vmem:[#allocation1 + $0x6] ss:$9 sm:$0xff] %v2545_v61 }
 0x673   : > { %3110 = vst [vmem:[#allocation1 + $0x7] ss:$9 sm:$0xff] %v2546_v7  ;;  %v2556_v7 = vperm.slane %v6172_v22, 1 }
 0x674   : > { %v3321_v60 = vpop.permute.xlu1 %3320 }
 0x675   : > { %v3526_v3 = vperm.slane %v3321_v60, %v6447_v48 }
 0x677   : > { %v6451_v61 = vsel %vm3527_vm3, %v3526_v3, %v3524_v35  ;;  %v2564_v35 = vperm.slane %v6303_v17, 1 }
 0x67a   : > { %v3111_v29 = vld [vmem:[#allocation1] sm:$0xff] }
 0x67b   : > { %3112 = vst [vmem:[#allocation1] ss:$9 sm:$0xff] %v2547_v54  ;;  %3410 = vperm.xlu1 %3833, %v3111_v29   ;;  %v2560_v54 = vperm.slane %v6172_v22, 5  ;;  %v2561_v29 = vperm.slane %v6172_v22, 6 }
 0x67c   : > { %3113 = vst [vmem:[#allocation1 + $0x1] ss:$9 sm:$0xff] %v2548_v14  ;;  %v3330_v1 = vpop.permute.xlu1 %3329  ;;  %v3534_v14 = vperm.slane %v3333_v15, %v6349_v20 }
 0x67d   : > { %3114 = vst [vmem:[#allocation1 + $0x2] ss:$9 sm:$0xff] %v2549_v18  ;;  %v3532_v43 = vperm.slane %v3330_v1, %v6352_v57  ;;  %v3536_v18 = vperm.slane %v3336_v8, %v6372_v40  ;;  %v2568_v8 = vperm.slane %v6303_v17, 5 }
 0x67e   : > { %3115 = vst [vmem:[#allocation1 + $0x3] ss:$9 sm:$0xff] %v2550_v12  ;;  %v2562_v12 = vperm.slane %v6172_v22, 7  ;;  %v2563_v22 = vperm.slane %v6303_v17, 0 }
 0x67f   : > { %3116 = vst [vmem:[#allocation1 + $0x4] ss:$9 sm:$0xff] %v2551_v45  ;;  %v3533_v59 = vsel %vm3475_vm10, %v3532_v43, %v6292_v10 }
 0x680   : > { %3117 = vst [vmem:[#allocation1 + $0x5] ss:$9 sm:$0xff] %v2552_v53  ;;  %v3535_v33 = vsel %vm3479_vm6, %v3534_v14, %v3533_v59  ;;  %v3345_v53 = vpop.permute.xlu2 %3344 }
 0x681   : > { %3118 = vst [vmem:[#allocation1 + $0x6] ss:$9 sm:$0xff] %v2553_v9  ;;  %v3537_v45 = vsel %vm3483_vm7, %v3536_v18, %v3535_v33  ;;  %v3540_v9 = vperm.slane %v3342_v5, %v6387_v32  ;;  %v3542_v6 = vperm.slane %v3345_v53, %v6380_v16 }
 0x682   : > { %3119 = vst [vmem:[#allocation1 + $0x7] ss:$9 sm:$0xff] %v2554_v36 }
 0x684   : > { %v3339_v41 = vpop.permute.xlu1 %3338 }
 0x685   : > { %v3538_v21 = vperm.slane %v3339_v41, %v6368_v24 }
 0x687   : > { %v3539_v10 = vsel %vm3487_vm8, %v3538_v21, %v3537_v45 }
 0x688   : > { %v3541_v36 = vsel %vm3491_vm9, %v3540_v9, %v3539_v10  ;;  %v3354_v15 = vpop.permute.xlu2 %3353  ;;  %v2572_v9 = vperm.slane %v6179_v11, 1 }
 0x689   : > { %v3120_v63 = vld [vmem:[#allocation1] sm:$0xff]  ;;  %v3543_v3 = vsel %vm3495_vm11, %v3542_v6, %v3541_v36  ;;  %v3548_v14 = vperm.slane %v3354_v15, %v6405_v0  ;;  %v2578_v15 = vperm.slane %v6179_v11, 7 }
 0x68a   : > { %3121 = vst [vmem:[#allocation1] ss:$9 sm:$0xff] %v2555_v55  ;;  %3413 = vperm.xlu0 %3831, %v3120_v63   ;;  %v2565_v55 = vperm.slane %v6303_v17, 2  ;;  %v3351_v63 = vpop.permute.xlu0 %3350 }
 0x68b   : > { %3122 = vst [vmem:[#allocation1 + $0x1] ss:$9 sm:$0xff] %v2556_v7  ;;  %v2566_v7 = vperm.slane %v6303_v17, 3  ;;  %v3546_v43 = vperm.slane %v3351_v63, %v6411_v44  ;;  %v2577_v63 = vperm.slane %v6179_v11, 6 }
 0x68c   : > { %3123 = vst [vmem:[#allocation1 + $0x2] ss:$9 sm:$0xff] %v2557_v52  ;;  %v2567_v52 = vperm.slane %v6303_v17, 4 }
 0x68d   : > { %3124 = vst [vmem:[#allocation1 + $0x3] ss:$9 sm:$0xff] %v2558_v23  ;;  %v3348_v23 = vpop.permute.xlu1 %3347 }
 0x68e   : > { %3125 = vst [vmem:[#allocation1 + $0x4] ss:$9 sm:$0xff] %v2559_v50  ;;  %v3544_v1 = vperm.slane %v3348_v23, %v6384_v42  ;;  %v2569_v50 = vperm.slane %v6303_v17, 6 }
 0x68f   : > { %3126 = vst [vmem:[#allocation1 + $0x5] ss:$9 sm:$0xff] %v2560_v54  ;;  %v2570_v54 = vperm.slane %v6303_v17, 7  ;;  %v2571_v17 = vperm.slane %v6179_v11, 0 }
 0x690   : > { %3127 = vst [vmem:[#allocation1 + $0x6] ss:$9 sm:$0xff] %v2561_v29  ;;  %v3545_v29 = vsel %vm3499_vm12, %v3544_v1, %v3543_v3  ;;  %v3363_v33 = vpop.permute.xlu2 %3362 }
 0x691   : > { %3128 = vst [vmem:[#allocation1 + $0x7] ss:$9 sm:$0xff] %v2562_v12  ;;  %v3547_v18 = vsel %vm3503_vm13, %v3546_v43, %v3545_v29  ;;  %v3554_v41 = vperm.slane %v3363_v33, %v6423_v19  ;;  %v2579_v29 = vperm.slane %v6186_v4, 0  ;;  %v2582_v33 = vperm.slane %v6186_v4, 3 }
 0x692   : > { %v3549_v59 = vsel %vm3507_vm14, %v3548_v14, %v3547_v18  ;;  %v3360_v12 = vpop.permute.xlu0 %3359 }
 0x693   : > { %v3552_v53 = vperm.slane %v3360_v12, %v6430_v25  ;;  %v2581_v12 = vperm.slane %v6186_v4, 2 }
 0x695   : > { %v3357_v45 = vpop.permute.xlu1 %3356 }
 0x696   : > { %v3550_v5 = vperm.slane %v3357_v45, %v6408_v37  ;;  %v2583_v45 = vperm.slane %v6186_v4, 4 }
 0x698   : > { %v3129_v60 = vld [vmem:[#allocation1] sm:$0xff]  ;;  %v3551_v21 = vsel %vm3511_vm15, %v3550_v5, %v3549_v59  ;;  %v2584_v5 = vperm.slane %v6186_v4, 5 }
 0x699   : > { %3130 = vst [vmem:[#allocation1] ss:$9 sm:$0xff] %v2563_v22  ;;  %3416 = vperm.xlu2 %3832, %v3129_v60   ;;  %v3553_v10 = vsel %vm3515_vm0, %v3552_v53, %v3551_v21  ;;  %v2573_v22 = vperm.slane %v6179_v11, 2  ;;  %v2575_v60 = vperm.slane %v6179_v11, 4  ;;  %v2585_v53 = vperm.slane %v6186_v4, 6 }
 0x69a   : > { %3131 = vst [vmem:[#allocation1 + $0x1] ss:$9 sm:$0xff] %v2564_v35  ;;  %v3555_v36 = vsel %vm3519_vm1, %v3554_v41, %v3553_v10  ;;  %v2574_v35 = vperm.slane %v6179_v11, 3  ;;  %v3369_v3 = vpop.permute.xlu0 %3368  ;;  %v2587_v41 = vperm.slane %v6309_v51, 0  ;;  %v2588_v21 = vperm.slane %v6309_v51, 1 }
 0x69b   : > { %3132 = vst [vmem:[#allocation1 + $0x2] ss:$9 sm:$0xff] %v2565_v55  ;;  %v2576_v55 = vperm.slane %v6179_v11, 5  ;;  %v3558_v23 = vperm.slane %v3369_v3, %v6447_v48  ;;  %v2580_v11 = vperm.slane %v6186_v4, 1  ;;  %v2590_v10 = vperm.slane %v6309_v51, 3 }
 0x69c   : > { %3133 = vst [vmem:[#allocation1 + $0x3] ss:$9 sm:$0xff] %v2566_v7  ;;  %v2596_v3 = vperm.slane %v6188_v28, 1 }
 0x69d   : > { %3134 = vst [vmem:[#allocation1 + $0x4] ss:$9 sm:$0xff] %v2567_v52  ;;  %v3366_v7 = vpop.permute.xlu1 %3365 }
 0x69e   : > { %3135 = vst [vmem:[#allocation1 + $0x5] ss:$9 sm:$0xff] %v2568_v8  ;;  %v3556_v52 = vperm.slane %v3366_v7, %v6427_v13  ;;  %v2597_v7 = vperm.slane %v6188_v28, 2 }
 0x69f   : > { %3136 = vst [vmem:[#allocation1 + $0x6] ss:$9 sm:$0xff] %v2569_v50  ;;  %v3372_v50 = vpop.permute.xlu2 %3371 }
 0x6a0   : > { %3137 = vst [vmem:[#allocation1 + $0x7] ss:$9 sm:$0xff] %v2570_v54  ;;  %v3557_v8 = vsel %vm3523_vm2, %v3556_v52, %v3555_v36  ;;  %v3560_v54 = vperm.slane %v3372_v50, %v6223_v46  ;;  %v2593_v36 = vperm.slane %v6309_v51, 6  ;;  %v2599_v52 = vperm.slane %v6188_v28, 4 }
 0x6a1   : > { %v6506_v1 = vsel %vm3527_vm3, %v3558_v23, %v3557_v8  ;;  %v2602_v23 = vperm.slane %v6188_v28, 7  ;;  %v2603_v8 = vperm.slane %v6193_v47, 0  ;;  %v2604_v50 = vperm.slane %v6193_v47, 1 }
 0x6a5   : > { %v3375_v43 = vpop.permute.xlu1 %3374 }
 0x6a6   : > { %v3561_v14 = vperm.slane %v3375_v43, %v6230_v31 }
 0x6a7   : > { %v3138_v6 = vld [vmem:[#allocation1] sm:$0xff] }
 0x6a8   : > { %3139 = vst [vmem:[#allocation1] ss:$9 sm:$0xff] %v2571_v17  ;;  %3419 = vperm.xlu1 %3833, %v3138_v6   ;;  %v6513_v59 = vsel %vm3471_vm5, %v3561_v14, %v3560_v54  ;;  %v2586_v17 = vperm.slane %v6186_v4, 7  ;;  %v2589_v6 = vperm.slane %v6309_v51, 2  ;;  %v2592_v4 = vperm.slane %v6309_v51, 5 }
 0x6a9   : > { %3140 = vst [vmem:[#allocation1 + $0x1] ss:$9 sm:$0xff] %v2572_v9  ;;  %v2605_v54 = vperm.slane %v6193_v47, 2  ;;  %v2606_v14 = vperm.slane %v6193_v47, 3 }
 0x6aa   : > { %3141 = vst [vmem:[#allocation1 + $0x2] ss:$9 sm:$0xff] %v2573_v22  ;;  %v2591_v22 = vperm.slane %v6309_v51, 4 }
 0x6ab   : > { %3142 = vst [vmem:[#allocation1 + $0x3] ss:$9 sm:$0xff] %v2574_v35  ;;  %v2594_v35 = vperm.slane %v6309_v51, 7  ;;  %v2600_v51 = vperm.slane %v6188_v28, 5 }
 0x6ac   : > { %3143 = vst [vmem:[#allocation1 + $0x4] ss:$9 sm:$0xff] %v2575_v60  ;;  %v2595_v60 = vperm.slane %v6188_v28, 0 }
 0x6ad   : > { %3144 = vst [vmem:[#allocation1 + $0x5] ss:$9 sm:$0xff] %v2576_v55 }
 0x6ae   : > { %3145 = vst [vmem:[#allocation1 + $0x6] ss:$9 sm:$0xff] %v2577_v63  ;;  %v2598_v63 = vperm.slane %v6188_v28, 3 }
 0x6af   : > { %3146 = vst [vmem:[#allocation1 + $0x7] ss:$9 sm:$0xff] %v2578_v15  ;;  %v2601_v15 = vperm.slane %v6188_v28, 6  ;;  %v2608_v28 = vperm.slane %v6193_v47, 5 }
 0x6b6   : > { %v3147_v18 = vld [vmem:[#allocation1] sm:$0xff] }
 0x6b7   : > { %3148 = vst [vmem:[#allocation1] ss:$9 sm:$0xff] %v2579_v29  ;;  %3422 = vperm.xlu0 %3831, %v3147_v18   ;;  %v2607_v29 = vperm.slane %v6193_v47, 4  ;;  %v2610_v18 = vperm.slane %v6193_v47, 7 }
 0x6b8   : > { %3149 = vst [vmem:[#allocation1 + $0x1] ss:$9 sm:$0xff] %v2580_v11  ;;  %v2609_v11 = vperm.slane %v6193_v47, 6  ;;  %v2616_v47 = vperm.slane %v6320_v39, 5 }
 0x6b9   : > { %3150 = vst [vmem:[#allocation1 + $0x2] ss:$9 sm:$0xff] %v2581_v12  ;;  %v2611_v12 = vperm.slane %v6320_v39, 0 }
 0x6ba   : > { %3151 = vst [vmem:[#allocation1 + $0x3] ss:$9 sm:$0xff] %v2582_v33  ;;  %v2612_v33 = vperm.slane %v6320_v39, 1 }
 0x6bb   : > { %3152 = vst [vmem:[#allocation1 + $0x4] ss:$9 sm:$0xff] %v2583_v45 }
 0x6bc   : > { %3153 = vst [vmem:[#allocation1 + $0x5] ss:$9 sm:$0xff] %v2584_v5  ;;  %v2613_v5 = vperm.slane %v6320_v39, 2 }
 0x6bd   : > { %3154 = vst [vmem:[#allocation1 + $0x6] ss:$9 sm:$0xff] %v2585_v53  ;;  %v2614_v53 = vperm.slane %v6320_v39, 3 }
 0x6be   : > { %3155 = vst [vmem:[#allocation1 + $0x7] ss:$9 sm:$0xff] %v2586_v17  ;;  %v2615_v17 = vperm.slane %v6320_v39, 4 }
 0x6c5   : > { %v3156_v9 = vld [vmem:[#allocation1] sm:$0xff] }
 0x6c6   : > { %3157 = vst [vmem:[#allocation1] ss:$9 sm:$0xff] %v2587_v41  ;;  %3425 = vperm.xlu2 %3832, %v3156_v9   ;;  %v2617_v41 = vperm.slane %v6320_v39, 6  ;;  %v3622_v9 = vrot.slane %v6506_v1, 7  ;;  %v2624_v1 = vperm.slane %v6200_v30, 5 }
 0x6c7   : > { %3158 = vst [vmem:[#allocation1 + $0x1] ss:$9 sm:$0xff] %v2588_v21  ;;  %v2618_v21 = vperm.slane %v6320_v39, 7  ;;  %v2622_v39 = vperm.slane %v6200_v30, 3 }
 0x6c8   : > { %3159 = vst [vmem:[#allocation1 + $0x2] ss:$9 sm:$0xff] %v2589_v6  ;;  %v6555_v6 = vsel %vm3625_vm4, %v6451_v61, %v3622_v9  ;;  %v2625_v61 = vperm.slane %v6200_v30, 6 }
 0x6c9   : > { %3160 = vst [vmem:[#allocation1 + $0x3] ss:$9 sm:$0xff] %v2590_v10  ;;  %v2619_v10 = vperm.slane %v6200_v30, 0 }
 0x6ca   : > { %3161 = vst [vmem:[#allocation1 + $0x4] ss:$9 sm:$0xff] %v2591_v22  ;;  %v2620_v22 = vperm.slane %v6200_v30, 1 }
 0x6cb   : > { %3162 = vst [vmem:[#allocation1 + $0x5] ss:$9 sm:$0xff] %v2592_v4 }
 0x6cc   : > { %3163 = vst [vmem:[#allocation1 + $0x6] ss:$9 sm:$0xff] %v2593_v36  ;;  %v2621_v36 = vperm.slane %v6200_v30, 2 }
 0x6cd   : > { %3164 = vst [vmem:[#allocation1 + $0x7] ss:$9 sm:$0xff] %v2594_v35  ;;  %v2623_v35 = vperm.slane %v6200_v30, 4 }
 0x6d4   : > { %v3165_v55 = vld [vmem:[#allocation1] sm:$0xff] }
 0x6d5   : > { %3166 = vst [vmem:[#allocation1] ss:$9 sm:$0xff] %v2595_v60  ;;  %3428 = vperm.xlu1 %3833, %v3165_v55   ;;  %v2626_v60 = vperm.slane %v6200_v30, 7  ;;  %v2628_v55 = vperm.slane %v6202_v38, 1  ;;  %v2632_v30 = vperm.slane %v6202_v38, 5 }
 0x6d6   : > { %3167 = vst [vmem:[#allocation1 + $0x1] ss:$9 sm:$0xff] %v2596_v3  ;;  %v2627_v3 = vperm.slane %v6202_v38, 0 }
 0x6d7   : > { %3168 = vst [vmem:[#allocation1 + $0x2] ss:$9 sm:$0xff] %v2597_v7 }
 0x6d8   : > { %3169 = vst [vmem:[#allocation1 + $0x3] ss:$9 sm:$0xff] %v2598_v63  ;;  %v2629_v63 = vperm.slane %v6202_v38, 2 }
 0x6d9   : > { %3170 = vst [vmem:[#allocation1 + $0x4] ss:$9 sm:$0xff] %v2599_v52  ;;  %v2630_v52 = vperm.slane %v6202_v38, 3 }
 0x6da   : > { %3171 = vst [vmem:[#allocation1 + $0x5] ss:$9 sm:$0xff] %v2600_v51  ;;  %v2631_v51 = vperm.slane %v6202_v38, 4 }
 0x6db   : > { %3172 = vst [vmem:[#allocation1 + $0x6] ss:$9 sm:$0xff] %v2601_v15  ;;  %v2633_v15 = vperm.slane %v6202_v38, 6 }
 0x6dc   : > { %3173 = vst [vmem:[#allocation1 + $0x7] ss:$9 sm:$0xff] %v2602_v23  ;;  %v2634_v23 = vperm.slane %v6202_v38, 7  ;;  %v2640_v38 = vperm.slane %v6328_v56, 5 }
 0x6e3   : > { %v3174_v43 = vld [vmem:[#allocation1] sm:$0xff] }
 0x6e4   : > { %3431 = vperm.xlu0 %3831, %v3174_v43   ;;  %3175 = vst [vmem:[#allocation1] ss:$9 sm:$0xff] %v2603_v8  ;;  %v2635_v8 = vperm.slane %v6328_v56, 0 }
 0x6e5   : > { %3176 = vst [vmem:[#allocation1 + $0x1] ss:$9 sm:$0xff] %v2604_v50  ;;  %v2636_v50 = vperm.slane %v6328_v56, 1 }
 0x6e6   : > { %3177 = vst [vmem:[#allocation1 + $0x2] ss:$9 sm:$0xff] %v2605_v54  ;;  %v2637_v54 = vperm.slane %v6328_v56, 2 }
 0x6e7   : > { %3178 = vst [vmem:[#allocation1 + $0x3] ss:$9 sm:$0xff] %v2606_v14  ;;  %v2638_v14 = vperm.slane %v6328_v56, 3 }
 0x6e8   : > { %3179 = vst [vmem:[#allocation1 + $0x4] ss:$9 sm:$0xff] %v2607_v29  ;;  %v2639_v29 = vperm.slane %v6328_v56, 4 }
 0x6e9   : > { %3180 = vst [vmem:[#allocation1 + $0x5] ss:$9 sm:$0xff] %v2608_v28  ;;  %v2641_v28 = vperm.slane %v6328_v56, 6 }
 0x6ea   : > { %3181 = vst [vmem:[#allocation1 + $0x6] ss:$9 sm:$0xff] %v2609_v11  ;;  %v2642_v11 = vperm.slane %v6328_v56, 7  ;;  %v2648_v56 = vperm.slane %v6204_v27, 5 }
 0x6eb   : > { %3182 = vst [vmem:[#allocation1 + $0x7] ss:$9 sm:$0xff] %v2610_v18  ;;  %v2643_v18 = vperm.slane %v6204_v27, 0 }
 0x6f2   : > { %v3183_v45 = vld [vmem:[#allocation1] sm:$0xff] }
 0x6f3   : > { %3434 = vperm.xlu2 %3832, %v3183_v45   ;;  %3184 = vst [vmem:[#allocation1] ss:$9 sm:$0xff] %v2611_v12  ;;  %v2644_v12 = vperm.slane %v6204_v27, 1  ;;  %v2645_v45 = vperm.slane %v6204_v27, 2 }
 0x6f4   : > { %3185 = vst [vmem:[#allocation1 + $0x1] ss:$9 sm:$0xff] %v2612_v33 }
 0x6f5   : > { %3186 = vst [vmem:[#allocation1 + $0x2] ss:$9 sm:$0xff] %v2613_v5  ;;  %v2646_v5 = vperm.slane %v6204_v27, 3 }
 0x6f6   : > { %3187 = vst [vmem:[#allocation1 + $0x3] ss:$9 sm:$0xff] %v2614_v53  ;;  %v2647_v53 = vperm.slane %v6204_v27, 4 }
 0x6f7   : > { %3188 = vst [vmem:[#allocation1 + $0x4] ss:$9 sm:$0xff] %v2615_v17  ;;  %v2649_v17 = vperm.slane %v6204_v27, 6 }
 0x6f8   : > { %3189 = vst [vmem:[#allocation1 + $0x5] ss:$9 sm:$0xff] %v2616_v47  ;;  %v2650_v47 = vperm.slane %v6204_v27, 7  ;;  %v2656_v27 = vperm.slane %v6206_v49, 5 }
 0x6f9   : > { %3190 = vst [vmem:[#allocation1 + $0x6] ss:$9 sm:$0xff] %v2617_v41  ;;  %v2651_v41 = vperm.slane %v6206_v49, 0 }
 0x6fa   : > { %3191 = vst [vmem:[#allocation1 + $0x7] ss:$9 sm:$0xff] %v2618_v21  ;;  %v2652_v21 = vperm.slane %v6206_v49, 1 }
 0x701   : > { %v3192_v4 = vld [vmem:[#allocation1] sm:$0xff] }
 0x702   : > { %3437 = vperm.xlu1 %3833, %v3192_v4   ;;  %3193 = vst [vmem:[#allocation1] ss:$9 sm:$0xff] %v2619_v10  ;;  %v2653_v10 = vperm.slane %v6206_v49, 2  ;;  %v2655_v4 = vperm.slane %v6206_v49, 4 }
 0x703   : > { %3194 = vst [vmem:[#allocation1 + $0x1] ss:$9 sm:$0xff] %v2620_v22  ;;  %v2654_v22 = vperm.slane %v6206_v49, 3 }
 0x704   : > { %3195 = vst [vmem:[#allocation1 + $0x2] ss:$9 sm:$0xff] %v2621_v36  ;;  %v2657_v36 = vperm.slane %v6206_v49, 6 }
 0x705   : > { %3196 = vst [vmem:[#allocation1 + $0x3] ss:$9 sm:$0xff] %v2622_v39  ;;  %v2658_v39 = vperm.slane %v6206_v49, 7  ;;  %v2664_v49 = vperm.slane %v6335_v34, 5 }
 0x706   : > { %3197 = vst [vmem:[#allocation1 + $0x4] ss:$9 sm:$0xff] %v2623_v35  ;;  %v2659_v35 = vperm.slane %v6335_v34, 0 }
 0x707   : > { %3198 = vst [vmem:[#allocation1 + $0x5] ss:$9 sm:$0xff] %v2624_v1  ;;  %v2660_v1 = vperm.slane %v6335_v34, 1 }
 0x708   : > { %3199 = vst [vmem:[#allocation1 + $0x6] ss:$9 sm:$0xff] %v2625_v61 }
 0x709   : > { %3200 = vst [vmem:[#allocation1 + $0x7] ss:$9 sm:$0xff] %v2626_v60  ;;  %v2661_v60 = vperm.slane %v6335_v34, 2 }
 0x710   : > { %v3201_v7 = vld [vmem:[#allocation1] sm:$0xff] }
 0x711   : > { %3440 = vperm.xlu0 %3831, %v3201_v7   ;;  %3202 = vst [vmem:[#allocation1] ss:$9 sm:$0xff] %v2627_v3  ;;  %v2662_v3 = vperm.slane %v6335_v34, 3  ;;  %v2665_v7 = vperm.slane %v6335_v34, 6 }
 0x712   : > { %3203 = vst [vmem:[#allocation1 + $0x1] ss:$9 sm:$0xff] %v2628_v55  ;;  %v2663_v55 = vperm.slane %v6335_v34, 4 }
 0x713   : > { %3204 = vst [vmem:[#allocation1 + $0x2] ss:$9 sm:$0xff] %v2629_v63  ;;  %v2666_v63 = vperm.slane %v6335_v34, 7  ;;  %v2672_v34 = vperm.slane %v6208_v62, 5 }
 0x714   : > { %3205 = vst [vmem:[#allocation1 + $0x3] ss:$9 sm:$0xff] %v2630_v52  ;;  %v2667_v52 = vperm.slane %v6208_v62, 0 }
 0x715   : > { %3206 = vst [vmem:[#allocation1 + $0x4] ss:$9 sm:$0xff] %v2631_v51  ;;  %v2668_v51 = vperm.slane %v6208_v62, 1 }
 0x716   : > { %3207 = vst [vmem:[#allocation1 + $0x5] ss:$9 sm:$0xff] %v2632_v30 }
 0x717   : > { %3208 = vst [vmem:[#allocation1 + $0x6] ss:$9 sm:$0xff] %v2633_v15  ;;  %v2669_v15 = vperm.slane %v6208_v62, 2 }
 0x718   : > { %3209 = vst [vmem:[#allocation1 + $0x7] ss:$9 sm:$0xff] %v2634_v23  ;;  %v2670_v23 = vperm.slane %v6208_v62, 3 }
 0x71f   : > { %v3210_v43 = vld [vmem:[#allocation1] sm:$0xff] }
 0x720   : > { %3443 = vperm.xlu2 %3832, %v3210_v43   ;;  %3211 = vst [vmem:[#allocation1] ss:$9 sm:$0xff] %v2635_v8  ;;  %v2671_v8 = vperm.slane %v6208_v62, 4  ;;  %v2674_v43 = vperm.slane %v6208_v62, 7 }
 0x721   : > { %3212 = vst [vmem:[#allocation1 + $0x1] ss:$9 sm:$0xff] %v2636_v50  ;;  %v2673_v50 = vperm.slane %v6208_v62, 6  ;;  %v2680_v62 = vperm.slane %v6215_v2, 5 }
 0x722   : > { %3213 = vst [vmem:[#allocation1 + $0x2] ss:$9 sm:$0xff] %v2637_v54  ;;  %v2675_v54 = vperm.slane %v6215_v2, 0 }
 0x723   : > { %3214 = vst [vmem:[#allocation1 + $0x3] ss:$9 sm:$0xff] %v2638_v14  ;;  %v2676_v14 = vperm.slane %v6215_v2, 1 }
 0x724   : > { %3215 = vst [vmem:[#allocation1 + $0x4] ss:$9 sm:$0xff] %v2639_v29 }
 0x725   : > { %3216 = vst [vmem:[#allocation1 + $0x5] ss:$9 sm:$0xff] %v2640_v38  ;;  %v2677_v38 = vperm.slane %v6215_v2, 2 }
 0x726   : > { %3217 = vst [vmem:[#allocation1 + $0x6] ss:$9 sm:$0xff] %v2641_v28  ;;  %v2678_v28 = vperm.slane %v6215_v2, 3 }
 0x727   : > { %3218 = vst [vmem:[#allocation1 + $0x7] ss:$9 sm:$0xff] %v2642_v11  ;;  %v2679_v11 = vperm.slane %v6215_v2, 4 }
 0x72e   : > { %v3219_v33 = vld [vmem:[#allocation1] sm:$0xff] }
 0x72f   : > { %3446 = vperm.xlu1 %3833, %v3219_v33   ;;  %3220 = vst [vmem:[#allocation1] ss:$9 sm:$0xff] %v2643_v18  ;;  %v2681_v18 = vperm.slane %v6215_v2, 6  ;;  %v2683_v33 = vperm.slane %v6346_v26, 0 }
 0x730   : > { %3221 = vst [vmem:[#allocation1 + $0x1] ss:$9 sm:$0xff] %v2644_v12  ;;  %v2682_v12 = vperm.slane %v6215_v2, 7  ;;  %v2688_v2 = vperm.slane %v6346_v26, 5 }
 0x731   : > { %3222 = vst [vmem:[#allocation1 + $0x2] ss:$9 sm:$0xff] %v2645_v45  ;;  %v2684_v45 = vperm.slane %v6346_v26, 1 }
 0x732   : > { %3223 = vst [vmem:[#allocation1 + $0x3] ss:$9 sm:$0xff] %v2646_v5 }
 0x733   : > { %3224 = vst [vmem:[#allocation1 + $0x4] ss:$9 sm:$0xff] %v2647_v53  ;;  %v2685_v53 = vperm.slane %v6346_v26, 2 }
 0x734   : > { %3225 = vst [vmem:[#allocation1 + $0x5] ss:$9 sm:$0xff] %v2648_v56  ;;  %v2686_v56 = vperm.slane %v6346_v26, 3 }
 0x735   : > { %3226 = vst [vmem:[#allocation1 + $0x6] ss:$9 sm:$0xff] %v2649_v17  ;;  %v2687_v17 = vperm.slane %v6346_v26, 4 }
 0x736   : > { %3227 = vst [vmem:[#allocation1 + $0x7] ss:$9 sm:$0xff] %v2650_v47  ;;  %v2689_v47 = vperm.slane %v6346_v26, 6 }
 0x73d   : > { %v3228_v9 = vld [vmem:[#allocation1] sm:$0xff] }
 0x73e   : > { %3449 = vperm.xlu0 %3831, %v3228_v9   ;;  %3229 = vst [vmem:[#allocation1] ss:$9 sm:$0xff] %v2651_v41  ;;  %v2690_v41 = vperm.slane %v6346_v26, 7  ;;  %v3378_v9 = vpop.permute.xlu0 %3377 }
 0x73f   : > { %3230 = vst [vmem:[#allocation1 + $0x1] ss:$9 sm:$0xff] %v2652_v21 }
 0x740   : > { %3231 = vst [vmem:[#allocation1 + $0x2] ss:$9 sm:$0xff] %v2653_v10  ;;  %v3381_v10 = vpop.permute.xlu2 %3380 }
 0x741   : > { %3232 = vst [vmem:[#allocation1 + $0x3] ss:$9 sm:$0xff] %v2654_v22  ;;  %v3384_v22 = vpop.permute.xlu1 %3383 }
 0x742   : > { %3233 = vst [vmem:[#allocation1 + $0x4] ss:$9 sm:$0xff] %v2655_v4 }
 0x743   : > { %3234 = vst [vmem:[#allocation1 + $0x5] ss:$9 sm:$0xff] %v2656_v27 }
 0x744   : > { %3235 = vst [vmem:[#allocation1 + $0x6] ss:$9 sm:$0xff] %v2657_v36 }
 0x745   : > { %3236 = vst [vmem:[#allocation1 + $0x7] ss:$9 sm:$0xff] %v2658_v39 }
 0x746   : > { %v3387_v4 = vpop.permute.xlu0 %3386 }
 0x748   : > { %v3390_v27 = vpop.permute.xlu2 %3389 }
 0x749   : > { %v3393_v36 = vpop.permute.xlu1 %3392 }
 0x74c   : > { %v3237_v61 = vld [vmem:[#allocation1] sm:$0xff] }
 0x74d   : > { %3452 = vperm.xlu2 %3832, %v3237_v61   ;;  %3238 = vst [vmem:[#allocation1] ss:$9 sm:$0xff] %v2659_v35 }
 0x74e   : > { %3239 = vst [vmem:[#allocation1 + $0x1] ss:$9 sm:$0xff] %v2660_v1  ;;  %v3396_v39 = vpop.permute.xlu0 %3395 }
 0x74f   : > { %3240 = vst [vmem:[#allocation1 + $0x2] ss:$9 sm:$0xff] %v2661_v60 }
 0x750   : > { %3241 = vst [vmem:[#allocation1 + $0x3] ss:$9 sm:$0xff] %v2662_v3  ;;  %v3399_v35 = vpop.permute.xlu2 %3398 }
 0x751   : > { %3242 = vst [vmem:[#allocation1 + $0x4] ss:$9 sm:$0xff] %v2663_v55  ;;  %v3402_v1 = vpop.permute.xlu1 %3401 }
 0x752   : > { %3243 = vst [vmem:[#allocation1 + $0x5] ss:$9 sm:$0xff] %v2664_v49 }
 0x753   : > { %3244 = vst [vmem:[#allocation1 + $0x6] ss:$9 sm:$0xff] %v2665_v7 }
 0x754   : > { %3245 = vst [vmem:[#allocation1 + $0x7] ss:$9 sm:$0xff] %v2666_v63 }
 0x756   : > { %v3405_v61 = vpop.permute.xlu0 %3404 }
 0x758   : > { %v6629_v60 = vpop.permute.xlu2 %3407 }
 0x759   : > { %v6631_v3 = vpop.permute.xlu1 %3410 }
 0x75b   : > { %v3246_v30 = vld [vmem:[#allocation1] sm:$0xff] }
 0x75c   : > { %3455 = vperm.xlu1 %3833, %v3246_v30   ;;  %3247 = vst [vmem:[#allocation1] ss:$9 sm:$0xff] %v2667_v52 }
 0x75d   : > { %3248 = vst [vmem:[#allocation1 + $0x1] ss:$9 sm:$0xff] %v2668_v51 }
 0x75e   : > { %3249 = vst [vmem:[#allocation1 + $0x2] ss:$9 sm:$0xff] %v2669_v15  ;;  %v6633_v26 = vpop.permute.xlu0 %3413 }
 0x75f   : > { %3250 = vst [vmem:[#allocation1 + $0x3] ss:$9 sm:$0xff] %v2670_v23 }
 0x760   : > { %3251 = vst [vmem:[#allocation1 + $0x4] ss:$9 sm:$0xff] %v2671_v8  ;;  %v6635_v55 = vpop.permute.xlu2 %3416  ;;  %v3563_v8 = vperm.slane %v3378_v9, %v6352_v57 }
 0x761   : > { %3252 = vst [vmem:[#allocation1 + $0x5] ss:$9 sm:$0xff] %v2672_v34  ;;  %v3420_v49 = vpop.permute.xlu1 %3419 }
 0x762   : > { %3253 = vst [vmem:[#allocation1 + $0x6] ss:$9 sm:$0xff] %v2673_v50  ;;  %v3591_v50 = vperm.slane %v3420_v49, %v6223_v46 }
 0x763   : > { %3254 = vst [vmem:[#allocation1 + $0x7] ss:$9 sm:$0xff] %v2674_v43  ;;  %v3564_v43 = vsel %vm3475_vm10, %v3563_v8, %v6513_v59 }
 0x766   : > { %v3423_v7 = vpop.permute.xlu0 %3422 }
 0x767   : > { %v3592_v15 = vperm.slane %v3423_v7, %v6230_v31 }
 0x768   : > { %v3426_v63 = vpop.permute.xlu2 %3425 }
 0x769   : > { %v3429_v52 = vpop.permute.xlu1 %3428  ;;  %v3594_v31 = vperm.slane %v3426_v63, %v6352_v57  ;;  %v3575_v57 = vperm.slane %v3396_v39, %v6384_v42 }
 0x76a   : > { %v3255_v29 = vld [vmem:[#allocation1] sm:$0xff] }
 0x76b   : > { %3458 = vperm.xlu0 %3831, %v3255_v29   ;;  %3256 = vst [vmem:[#allocation1] ss:$9 sm:$0xff] %v2675_v54  ;;  %v3567_v54 = vperm.slane %v3384_v22, %v6372_v40  ;;  %v3569_v29 = vperm.slane %v3387_v4, %v6368_v24  ;;  %v3577_v4 = vperm.slane %v3399_v35, %v6411_v44 }
 0x76c   : > { %3257 = vst [vmem:[#allocation1 + $0x1] ss:$9 sm:$0xff] %v2676_v14  ;;  %v3565_v14 = vperm.slane %v3381_v10, %v6349_v20  ;;  %v3579_v10 = vperm.slane %v3402_v1, %v6405_v0 }
 0x76d   : > { %3258 = vst [vmem:[#allocation1 + $0x2] ss:$9 sm:$0xff] %v2677_v38  ;;  %v3593_v38 = vsel %vm3471_vm5, %v3592_v15, %v3591_v50  ;;  %vm3627_vm5 = vcmask 1042434  }
 0x76e   : > { %3259 = vst [vmem:[#allocation1 + $0x3] ss:$9 sm:$0xff] %v2678_v28  ;;  %v3432_v51 = vpop.permute.xlu0 %3431  ;;  %v3596_v28 = vperm.slane %v3429_v52, %v6349_v20  ;;  %v3595_v59 = vsel %vm3475_vm10, %v3594_v31, %v3593_v38  ;;  %v3571_v20 = vperm.slane %v3390_v27, %v6387_v32  ;;  %v3585_v52 = vperm.slane %v6631_v3, %v6423_v19 }
 0x76f   : > { %3260 = vst [vmem:[#allocation1 + $0x4] ss:$9 sm:$0xff] %v2679_v11  ;;  %v3598_v11 = vperm.slane %v3432_v51, %v6372_v40  ;;  %vm3629_vm10 = vcmask 1041408  }
 0x770   : > { %3261 = vst [vmem:[#allocation1 + $0x5] ss:$9 sm:$0xff] %v2680_v62  ;;  %v3435_v30 = vpop.permute.xlu2 %3434  ;;  %v3566_v62 = vsel %vm3479_vm6, %v3565_v14, %v3564_v43 }
 0x771   : > { %3262 = vst [vmem:[#allocation1 + $0x6] ss:$9 sm:$0xff] %v2681_v18  ;;  %v3568_v18 = vsel %vm3483_vm7, %v3567_v54, %v3566_v62 }
 0x772   : > { %3263 = vst [vmem:[#allocation1 + $0x7] ss:$9 sm:$0xff] %v2682_v12  ;;  %v3570_v12 = vsel %vm3487_vm8, %v3569_v29, %v3568_v18 }
 0x774   : > { %v3438_v23 = vpop.permute.xlu1 %3437 }
 0x779   : > { %v3264_v5 = vld [vmem:[#allocation1] sm:$0xff] }
 0x77a   : > { %3461 = vperm.xlu2 %3832, %v3264_v5   ;;  %3265 = vst [vmem:[#allocation1] ss:$9 sm:$0xff] %v2683_v33  ;;  %v3444_v46 = vpop.permute.xlu2 %3443  ;;  %v3573_v33 = vperm.slane %v3393_v36, %v6380_v16 }
 0x77b   : > { %3266 = vst [vmem:[#allocation1 + $0x1] ss:$9 sm:$0xff] %v2684_v45  ;;  %v3597_v45 = vsel %vm3479_vm6, %v3596_v28, %v3595_v59  ;;  %v3606_v36 = vperm.slane %v3444_v46, %v6384_v42  ;;  %v3583_v42 = vperm.slane %v6629_v60, %v6430_v25  ;;  %vm3634_vm6 = vcmp.lt.s32.totalorder %v3466_v58, 512 }
 0x77c   : > { %3267 = vst [vmem:[#allocation1 + $0x2] ss:$9 sm:$0xff] %v2685_v53  ;;  %v3599_v40 = vsel %vm3483_vm7, %v3598_v11, %v3597_v45  ;;  %v3602_v53 = vperm.slane %v3438_v23, %v6387_v32  ;;  %v3581_v32 = vperm.slane %v3405_v61, %v6408_v37 }
 0x77d   : > { %3268 = vst [vmem:[#allocation1 + $0x3] ss:$9 sm:$0xff] %v2686_v56 }
 0x77e   : > { %3269 = vst [vmem:[#allocation1 + $0x4] ss:$9 sm:$0xff] %v2687_v17  ;;  %v3600_v17 = vperm.slane %v3435_v30, %v6368_v24 }
 0x77f   : > { %3270 = vst [vmem:[#allocation1 + $0x5] ss:$9 sm:$0xff] %v2688_v2 }
 0x780   : > { %3271 = vst [vmem:[#allocation1 + $0x6] ss:$9 sm:$0xff] %v2689_v47  ;;  %v3572_v47 = vsel %vm3491_vm9, %v3571_v20, %v3570_v12 }
 0x781   : > { %3272 = vst [vmem:[#allocation1 + $0x7] ss:$9 sm:$0xff] %v2690_v41  ;;  %v3574_v41 = vsel %vm3495_vm11, %v3573_v33, %v3572_v47 }
 0x782   : > { %v3576_v9 = vsel %vm3499_vm12, %v3575_v57, %v3574_v41 }
 0x783   : > { %v3441_v34 = vpop.permute.xlu0 %3440  ;;  %v3578_v49 = vsel %vm3503_vm13, %v3577_v4, %v3576_v9 }
 0x784   : > { %v3604_v2 = vperm.slane %v3441_v34, %v6380_v16  ;;  %v3580_v1 = vsel %vm3507_vm14, %v3579_v10, %v3578_v49 }
 0x785   : > { %v3582_v61 = vsel %vm3511_vm15, %v3581_v32, %v3580_v1 }
 0x786   : > { %v3584_v8 = vsel %vm3515_vm0, %v3583_v42, %v3582_v61 }
 0x787   : > { %v3586_v3 = vsel %vm3519_vm1, %v3585_v52, %v3584_v8 }
 0x788   : > { %v3273_v21 = vld [vmem:[#allocation1] sm:$0xff] }
 0x789   : > { %3464 = vperm.xlu1 %3833, %v3273_v21   ;;  %v3601_v21 = vsel %vm3487_vm8, %v3600_v17, %v3599_v40 }
 0x78a   : > { %v3603_v22 = vsel %vm3491_vm9, %v3602_v53, %v3601_v21 }
 0x78b   : > { %v3605_v24 = vsel %vm3495_vm11, %v3604_v2, %v3603_v22 }
 0x78c   : > { %v3607_v63 = vsel %vm3499_vm12, %v3606_v36, %v3605_v24 }
 0x7a1   : > { %v3447_v5 = vpop.permute.xlu1 %3446 }
 0x7a2   : > { %v3608_v16 = vperm.slane %v3447_v5, %v6411_v44 }
 0x7a4   : > { %v3609_v44 = vsel %vm3503_vm13, %v3608_v16, %v3607_v63 }
 0x7a7   : > { %v3453_v27 = vpop.permute.xlu2 %3452 }
 0x7a8   : > { %v3612_v15 = vperm.slane %v3453_v27, %v6408_v37 }
 0x7b0   : > { %v3450_v56 = vpop.permute.xlu0 %3449 }
 0x7b1   : > { %v3610_v39 = vperm.slane %v3450_v56, %v6405_v0  ;;  %v3587_v0 = vperm.slane %v6633_v26, %v6427_v13 }
 0x7b3   : > { %v3611_v51 = vsel %vm3507_vm14, %v3610_v39, %v3609_v44  ;;  %v3588_v60 = vsel %vm3523_vm2, %v3587_v0, %v3586_v3 }
 0x7b4   : > { %v3613_v50 = vsel %vm3511_vm15, %v3612_v15, %v3611_v51 }
 0x7ce   : > { %v3456_v7 = vpop.permute.xlu1 %3455 }
 0x7cf   : > { %v3614_v30 = vperm.slane %v3456_v7, %v6430_v25  ;;  %v3589_v25 = vperm.slane %v6635_v55, %v6447_v48 }
 0x7d1   : > { %v3615_v26 = vsel %vm3515_vm0, %v3614_v30, %v3613_v50  ;;  %v3590_v54 = vsel %vm3527_vm3, %v3589_v25, %v3588_v60 }
 0x7d4   : > { %v3462_v34 = vpop.permute.xlu2 %3461 }
 0x7dd   : > { %v3459_v35 = vpop.permute.xlu0 %3458 }
 0x7de   : > { %v3616_v23 = vperm.slane %v3459_v35, %v6423_v19  ;;  %v3618_v19 = vperm.slane %v3462_v34, %v6427_v13  ;;  %v3623_v13 = vrot.slane %v3590_v54, 6 }
 0x7e0   : > { %v3617_v37 = vsel %vm3519_vm1, %v3616_v23, %v3615_v26 }
 0x7e1   : > { %v3619_v29 = vsel %vm3523_vm2, %v3618_v19, %v3617_v37 }
 0x7fb   : > { %v3465_v43 = vpop.permute.xlu1 %3464 }
 0x7fc   : > { %v3620_v14 = vperm.slane %v3465_v43, %v6447_v48 }
 0x7fe   : > { %v3621_v38 = vsel %vm3527_vm3, %v3620_v14, %v3619_v29 }
 0x7ff   : > { %v3624_v55 = vrot.slane %v3621_v38, 5 }
 0x801   : > { %v3628_v28 = vsel %vm3627_vm5, %v3623_v13, %v3624_v55 }
 0x802   : > { %v3630_v48 = vsel %vm3629_vm10, %v6555_v6, %v3628_v28 }
 0x803   : > { %3636 = vst.msk [vmem:[%s207_s19] sm:$0xf] %vm3634_vm6, %v3630_v48 }
 0x804   : > { %3927 = shalt.err (!%p3924_p3)
}
 0x805   : > { %3785 = dma.vmem_to_hbm [thread:$0]  (%p4030_p5), %s3651_s5, 64, %s3653_s7, %s3638_s8  }
 0x806 PF: > { %p3791_p4 = scmp.ge.s32.totalorder %s3962_s18, 2  ;;  %s3664_s14 = sand.u32 1, %s3950_s15  }
 0x807   : > { %s3665_s20 = scalar_lea.sflag [#allocation3], %s3664_s14 }
 0x808   : > { %p3788_p7 = pnand %p3791_p4, %p4034_p6 }
 0x80a   : > { %p3789_p8 = pneg %p3788_p7 }
 0x80c   : > { %3945 = dma.done.wait (%p3789_p8), %s3665_s20, 64  }
 0x80d   : > { %3947 = vsyncadd (%p3789_p8), %s3665_s20, 4294967232  ;;  %p14_p9 = scmp.ge.s32.totalorder %s4017_s21, 4   ;;  %s7249_s15 = smov %s3954_s16 }
 0x80e   : > { %s7250_s16 = smov %s3958_s17  ;;  %s7251_s17 = smov %s4028_s24 }
 0x80f   : > { %s7252_s18 = smov %s4017_s21  ;;  %16 = sbr.rel (!%p14_p9) target bundleno = 3 (0x3), region = 81 }
 0x814   :  { %3671 = vsyncpa [#allocation3], 1 }
 0x815   :  { %3673 = vsyncpa [#allocation3 + $0x1], 1 }

</bundles_post_ra>
